<compile_context>
chip_gen: v6e
topology: v6e:2x2x1
jax: 0.10.0
libtpu: 0.0.40
codegen_flags: <defaults>
</compile_context>

<pallas_src>
import functools

import jax
import jax.numpy as jnp
from jax import lax
from jax.experimental import pallas as pl
from jax.experimental.pallas import tpu as pltpu

CP = 128  # lane-dense internal channel width (all channel dims padded to this)


# ----------------------------------------------------------------------------
# Kernel 1: fused pyramid level
#   y   = SiLU(x @ w1 + b1) [+ nearest-up(skip)]     (lateral conv, f32 epilogue)
#   det = y @ w2 + b2                                (chained detection head)
# Tiled over rows (grid = (M // TM,), "parallel").  The skip block holds one
# row per output row-PAIR (W already expanded in the wrapper); the H
# duplication happens in-kernel via a broadcast, so no 4x skip tensor in HBM.
# ----------------------------------------------------------------------------
def _fused_level_kernel(*refs, has_skip, emit_y, img_w):
    it = iter(refs)
    x_ref, w1_ref, b1_ref = next(it), next(it), next(it)
    skip_ref = next(it) if has_skip else None
    w2_ref, b2_ref = next(it), next(it)
    y_ref = next(it) if emit_y else None
    det_ref = next(it)

    tm = x_ref.shape[0]
    y = jnp.dot(x_ref[...], w1_ref[...], preferred_element_type=jnp.float32)
    y = y + b1_ref[...]
    y = y * jax.nn.sigmoid(y)                       # SiLU (f32, VPU/EUP)
    if has_skip:
        nh2 = tm // (2 * img_w)                     # output row-pairs in this tile
        s = skip_ref[...].astype(jnp.float32).reshape(nh2, 1, img_w, CP)
        y = (y.reshape(nh2, 2, img_w, CP) + s).reshape(tm, CP)
    if emit_y:
        y_ref[...] = y.astype(y_ref.dtype)
    det = jnp.dot(y.astype(jnp.bfloat16), w2_ref[...],
                  preferred_element_type=jnp.float32) + b2_ref[...]
    det_ref[...] = det.astype(det_ref.dtype)


def _pick_tile_m(m, unit, cap=1024):
    """Largest row tile that is a multiple of `unit`, divides M, is <= cap,
    and (if possible) leaves >= 2 grid steps (v7x: both TensorCores busy)."""
    cands = [t for t in range(unit, min(m, cap) + 1, unit) if m % t == 0]
    two_step = [t for t in cands if m // t >= 2]
    if two_step:
        return two_step[-1]
    if cands:
        return cands[-1]
    return m


def fused_level(x2d, w1, b1, w2, b2, skip2d=None, img_w=None, emit_y=True):
    m, k = x2d.shape
    assert k == CP and w1.shape == (CP, CP) and w2.shape == (CP, CP)
    has_skip = skip2d is not None
    unit = 2 * img_w if has_skip else 16            # skip tiles need whole row pairs
    tm = _pick_tile_m(m, unit)
    grid = (m // tm,)

    in_specs = [
        pl.BlockSpec((tm, CP), lambda i: (i, 0)),
        pl.BlockSpec((CP, CP), lambda i: (0, 0)),
        pl.BlockSpec((1, CP), lambda i: (0, 0)),
    ]
    args = [x2d, w1, b1]
    if has_skip:
        in_specs.append(pl.BlockSpec((tm // 2, CP), lambda i: (i, 0)))
        args.append(skip2d)
    in_specs += [
        pl.BlockSpec((CP, CP), lambda i: (0, 0)),
        pl.BlockSpec((1, CP), lambda i: (0, 0)),
    ]
    args += [w2, b2]

    blk = pl.BlockSpec((tm, CP), lambda i: (i, 0))
    det_sds = jax.ShapeDtypeStruct((m, CP), jnp.bfloat16)
    if emit_y:
        out_shape = (jax.ShapeDtypeStruct((m, CP), jnp.bfloat16), det_sds)
        out_specs = (blk, blk)
    else:
        out_shape = det_sds
        out_specs = blk

    bytes_accessed = (m * CP * 2 + 2 * CP * CP * 2 + 2 * CP * 4
                      + (m // 2 * CP * 2 if has_skip else 0)
                      + (m * CP * 2 if emit_y else 0) + m * CP * 2)
    out = pl.pallas_call(
        functools.partial(_fused_level_kernel, has_skip=has_skip,
                          emit_y=emit_y, img_w=img_w),
        out_shape=out_shape, grid=grid, in_specs=in_specs, out_specs=out_specs,
        compiler_params=pltpu.CompilerParams(dimension_semantics=("parallel",)),
        cost_estimate=pl.CostEstimate(flops=int(4 * m * CP * CP),
                                      transcendentals=int(m * CP),
                                      bytes_accessed=int(bytes_accessed)),
    )(*args)
    if emit_y:
        return out[0], out[1]
    return None, out


# ----------------------------------------------------------------------------
# Kernel 2: stage4 = 3x3 stride-2 pad-1 conv + SiLU, without im2col.
# Input is space-to-depth(2) rearranged and row-flattened in the wrapper (bf16,
# ~1.1x traffic); the conv is 4 statically-unrolled shifted-window matmuls
# accumulated in registers, then one bias+SiLU epilogue.  Grid = (N,) parallel.
# ----------------------------------------------------------------------------
def _stage4_kernel(xs_ref, w_ref, b_ref, o_ref, *, wo, ro):
    acc = None
    for t in range(4):                              # taps statically unrolled
        shift = (t // 2) * (wo + 1) + (t % 2)       # static row shift per tap
        lhs = xs_ref[0, pl.ds(shift, ro), :]        # (ro, 4*CP) bf16
        d = jnp.dot(lhs, w_ref[t], preferred_element_type=jnp.float32)
        acc = d if acc is None else acc + d
    y = acc + b_ref[...]
    y = y * jax.nn.sigmoid(y)                       # SiLU
    o_ref[0] = y.astype(o_ref.dtype)


def stage4_conv(b3_nhwc, w22, bias):
    """3x3/s2/p1 conv + SiLU.  b3_nhwc: (N,H,W,CP) bf16 (H,W even);
    w22: (4, 4*CP, CP) bf16 (space-to-depth tap layout); bias: (1, CP) f32."""
    n, h, w, cp = b3_nhwc.shape
    assert cp == CP and h % 2 == 0 and w % 2 == 0
    ho, wo = h // 2, w // 2

    # pad spatially by 1, space-to-depth(2): xs[n,u,v,(dy*2+dx)*CP+c] = xpad[n,2u+dy,2v+dx,c]
    xp = jnp.pad(b3_nhwc, ((0, 0), (1, 1), (1, 1), (0, 0)))
    xs = xp.reshape(n, ho + 1, 2, wo + 1, 2, cp).transpose(0, 1, 3, 2, 4, 5)
    xs = xs.reshape(n, (ho + 1) * (wo + 1), 4 * cp)

    ro = ho * (wo + 1)                              # valid rows (col wo is junk)
    ro_p = -(-ro // 16) * 16                        # 16-row aligned compute/store
    rp = -(-(ro_p + wo + 2) // 16) * 16             # keep max tap shift in range
    xs = jnp.pad(xs, ((0, 0), (0, rp - (ho + 1) * (wo + 1)), (0, 0)))

    cout = w22.shape[-1]
    out = pl.pallas_call(
        functools.partial(_stage4_kernel, wo=wo, ro=ro_p),
        out_shape=jax.ShapeDtypeStruct((n, ro_p, cout), jnp.bfloat16),
        grid=(n,),
        in_specs=[
            pl.BlockSpec((1, rp, 4 * cp), lambda b: (b, 0, 0)),
            pl.BlockSpec((4, 4 * cp, cout), lambda b: (0, 0, 0)),
            pl.BlockSpec((1, cout), lambda b: (0, 0)),
        ],
        out_specs=pl.BlockSpec((1, ro_p, cout), lambda b: (b, 0, 0)),
        compiler_params=pltpu.CompilerParams(dimension_semantics=("parallel",)),
        cost_estimate=pl.CostEstimate(
            flops=int(2 * 4 * n * ro_p * 4 * cp * cout),
            transcendentals=int(n * ro_p * cout),
            bytes_accessed=int(n * rp * 4 * cp * 2 + 4 * 4 * cp * cout * 2
                               + n * ro_p * cout * 2)),
    )(xs, w22, bias)
    # drop padded rows and the junk column (v == wo) of the flattened layout
    return out[:, :ro].reshape(n, ho, wo + 1, cout)[:, :, :wo, :]


# ----------------------------------------------------------------------------
# Glue (layout plumbing)
# ----------------------------------------------------------------------------
def _to_nhwc_padded(x_nchw, cp=CP, dtype=jnp.bfloat16):
    x = jnp.transpose(x_nchw, (0, 2, 3, 1)).astype(dtype)
    return jnp.pad(x, ((0, 0), (0, 0), (0, 0), (0, cp - x.shape[-1])))


def upsample2x(x_nhwc):
    # nearest-neighbour 2x (torch.nn.Upsample(scale_factor=2)); reference only.
    return jnp.repeat(jnp.repeat(x_nhwc, 2, axis=1), 2, axis=2)


# ----------------------------------------------------------------------------
# Parameters (deterministic synthetic init, stored pre-padded for the kernels)
# ----------------------------------------------------------------------------
def init_params(key, c2, c3, c4, cn, dout):
    ks = jax.random.split(key, 8)

    def dense(k, cin, cout):
        w = jax.random.normal(k, (cin, cout), jnp.float32) / jnp.sqrt(cin)
        return jnp.zeros((CP, CP), jnp.float32).at[:cin, :cout].set(w).astype(jnp.bfloat16)

    zb = jnp.zeros((1, CP), jnp.float32)

    # stage4: 3x3 stride-2 conv weight (HWIO), padded to CP lanes, bf16-rounded
    w3 = jax.random.normal(ks[0], (3, 3, c3, c4), jnp.float32) / jnp.sqrt(9 * c3)
    w3p = jnp.zeros((3, 3, CP, CP), jnp.float32).at[:, :, :c3, :c4].set(w3)
    w3p = w3p.astype(jnp.bfloat16).astype(jnp.float32)
    # rearrange into the space-to-depth 4-tap layout: tap (a,b), channel slot (dy,dx)
    w22 = jnp.zeros((2, 2, 4, CP, CP), jnp.float32)
    for ky in range(3):
        for kx in range(3):
            a, dy = divmod(ky, 2)
            b, dx = divmod(kx, 2)
            w22 = w22.at[a, b, 2 * dy + dx].set(w3p[ky, kx])
    w22 = w22.reshape(4, 4 * CP, CP).astype(jnp.bfloat16)

    return {
        "w4": w22, "b4": zb, "w4_hwio": w3p,          # w4_hwio only used by the jnp reference
        "wl2": dense(ks[1], c2, cn), "bl2": zb,
        "wl3": dense(ks[2], c3, cn), "bl3": zb,
        "wl4": dense(ks[3], c4, cn), "bl4": zb,
        "wh0": dense(ks[4], cn, dout), "bh0": zb,
        "wh1": dense(ks[5], cn, dout), "bh1": zb,
        "wh2": dense(ks[6], cn, dout), "bh2": zb,
    }


# ----------------------------------------------------------------------------
# Forward: mirrors YoloBlock4.forward((b2, b3)) -> (det0, det1, det2)
# ----------------------------------------------------------------------------
def yolo_block4_forward(b2_nchw, b3_nchw, params, *, dout):
    n, _, h2, w2 = b2_nchw.shape
    _, _, h3, w3 = b3_nchw.shape
    b2 = _to_nhwc_padded(b2_nchw)                                 # bf16
    b3 = _to_nhwc_padded(b3_nchw)                                 # bf16

    # backbone.stage4: 3x3 stride-2 conv + SiLU
    b4 = stage4_conv(b3, params["w4"], params["b4"])              # (n, h3/2, w3/2, CP) bf16
    h4, w4 = b4.shape[1], b4.shape[2]

    # level 4: lateral + head fused; l4 kept (bf16) for the top-down path
    l4_f, det2_f = fused_level(b4.reshape(-1, CP), params["wl4"], params["bl4"],
                               params["wh2"], params["bh2"])
    l4 = l4_f.reshape(n, h4, w4, CP)

    # level 3: SiLU(lateral(b3)) + up2(l4) + head, fused.
    # Only W is expanded here (small tensor); H duplication is in-kernel.
    skip3 = jnp.repeat(l4, 2, axis=2).reshape(-1, CP)
    p3_f, det1_f = fused_level(b3.reshape(-1, CP), params["wl3"], params["bl3"],
                               params["wh1"], params["bh1"],
                               skip2d=skip3, img_w=w3)
    p3 = p3_f.reshape(n, h3, w3, CP)

    # level 2: p2 itself is never consumed -> emit_y=False (no dead HBM write)
    skip2 = jnp.repeat(p3, 2, axis=2).reshape(-1, CP)
    _, det0_f = fused_level(b2.reshape(-1, CP), params["wl2"], params["bl2"],
                            params["wh0"], params["bh0"],
                            skip2d=skip2, img_w=w2, emit_y=False)

    def finish(det_f, h, w):
        det = det_f.reshape(n, h, w, CP)[:, :, :, :dout].astype(jnp.float32)
        return jnp.transpose(det, (0, 3, 1, 2))                   # NHWC -> NCHW
    return finish(det0_f, h2, w2), finish(det1_f, h3, w3), finish(det2_f, h4, w4)


# ----------------------------------------------------------------------------
# Pure-jnp reference (f32, XLA) used only for validation
# ----------------------------------------------------------------------------
def reference_forward(b2_nchw, b3_nchw, params, *, dout):
    hi = lax.Precision.HIGHEST
    b2 = _to_nhwc_padded(b2_nchw, dtype=jnp.float32)
    b3 = _to_nhwc_padded(b3_nchw, dtype=jnp.float32)
    silu = lambda v: v * jax.nn.sigmoid(v)

    b4 = lax.conv_general_dilated(b3, params["w4_hwio"], (2, 2), ((1, 1), (1, 1)),
                                  dimension_numbers=("NHWC", "HWIO", "NHWC"),
                                  precision=hi)
    b4 = silu(b4 + params["b4"].reshape(1, 1, 1, -1))

    def c1(x, w, b, act):
        y = jnp.einsum("nhwc,cd->nhwd", x, w.astype(jnp.float32), precision=hi)
        y = y + b.reshape(1, 1, 1, -1)
        return silu(y) if act else y

    l4 = c1(b4, params["wl4"], params["bl4"], True)
    det2 = c1(l4, params["wh2"], params["bh2"], False)
    p3 = c1(b3, params["wl3"], params["bl3"], True) + upsample2x(l4)
    det1 = c1(p3, params["wh1"], params["bh1"], False)
    p2 = c1(b2, params["wl2"], params["bl2"], True) + upsample2x(p3)
    det0 = c1(p2, params["wh0"], params["bh0"], False)

    to_nchw = lambda t: jnp.transpose(t[:, :, :, :dout], (0, 3, 1, 2))
    return to_nchw(det0), to_nchw(det1), to_nchw(det2)


if __name__ == "__main__":
    key = jax.random.PRNGKey(0)
    k_b2, k_b3, k_p = jax.random.split(key, 3)

    N = 2
    C2, H2 = 8, 32     # b2: stride-8 feature map
    C3, H3 = 16, 16    # b3: stride-16 feature map
    C4 = 32            # stage4 output channels
    CN = 16            # neck width
    DOUT = 8           # (num_classes=3 + 5) * num_anchors=1

    b2 = jax.random.normal(k_b2, (N, C2, H2, H2), jnp.float32)
    b3 = jax.random.normal(k_b3, (N, C3, H3, H3), jnp.float32)
    params = init_params(k_p, C2, C3, C4, CN, DOUT)

    fwd = jax.jit(functools.partial(yolo_block4_forward, dout=DOUT))
    det0, det1, det2 = fwd(b2, b3, params)
    jax.block_until_ready((det0, det1, det2))

    assert det0.shape == (N, DOUT, H2, H2)
    assert det1.shape == (N, DOUT, H3, H3)
    assert det2.shape == (N, DOUT, H3 // 2, H3 // 2)

    # validate against the pure-f32 reference (bf16 MXU inputs + bf16 activation
    # storage in the kernel path -> loose tolerance)
    ref_fwd = jax.jit(functools.partial(reference_forward, dout=DOUT))
    r0, r1, r2 = ref_fwd(b2, b3, params)
    jax.block_until_ready((r0, r1, r2))
    for got, ref in ((det0, r0), (det1, r1), (det2, r2)):
        err = float(jnp.max(jnp.abs(got - ref)))
        assert err < 2e-1, f"max abs err {err}"

    print("KERNEL_OK")
</pallas_src>

<mosaic_0001>
module attributes {stable_mosaic.version = 11 : i64} {
  func.func @_stage4_kernel(%arg0: i32, %arg1: memref<1x96x512xbf16, #tpu.memory_space<vmem>>, %arg2: memref<4x512x128xbf16, #tpu.memory_space<vmem>>, %arg3: memref<1x128xf32, #tpu.memory_space<vmem>>, %arg4: memref<1x80x128xbf16, #tpu.memory_space<vmem>>) attributes {dimension_semantics = [#tpu.dimension_semantics<parallel>], iteration_bounds = array<i64: 2>, scalar_prefetch = 0 : i64, scratch_operands = 0 : i64, tpu.core_type = #tpu.core_type<tc>, window_params = [{transform_indices = @transform_0, window_bounds = array<i64: 1, 96, 512>}, {pipeline_mode = #tpu.pipeline_mode<synchronous>, transform_indices = @transform_1, window_bounds = array<i64: 4, 512, 128>}, {pipeline_mode = #tpu.pipeline_mode<synchronous>, transform_indices = @transform_2, window_bounds = array<i64: 1, 128>}, {transform_indices = @transform_3, window_bounds = array<i64: 1, 80, 128>}]} {
    %c0 = arith.constant 0 : index
    %c0_0 = arith.constant 0 : index
    %c0_1 = arith.constant 0 : index
    %0 = vector.load %arg1[%c0, %c0_0, %c0_1] : memref<1x96x512xbf16, #tpu.memory_space<vmem>>, vector<1x80x512xbf16>
    %1 = vector.shape_cast %0 : vector<1x80x512xbf16> to vector<80x512xbf16>
    %c0_2 = arith.constant 0 : index
    %c0_3 = arith.constant 0 : index
    %c0_4 = arith.constant 0 : index
    %2 = vector.load %arg2[%c0_2, %c0_3, %c0_4] : memref<4x512x128xbf16, #tpu.memory_space<vmem>>, vector<1x512x128xbf16>
    %3 = vector.shape_cast %2 : vector<1x512x128xbf16> to vector<512x128xbf16>
    %cst = arith.constant dense<0.000000e+00> : vector<80x128xf32>
    %4 = tpu.matmul %1, %3, %cst {dimension_numbers = #tpu.dot_dimension_numbers<[1], [0], [0], [1], [0, 0, 1, 1], [], []>} : vector<80x512xbf16>, vector<512x128xbf16>, vector<80x128xf32> -> vector<80x128xf32>
    %c0_5 = arith.constant 0 : index
    %c1 = arith.constant 1 : index
    %c0_6 = arith.constant 0 : index
    %5 = vector.load %arg1[%c0_5, %c1, %c0_6] : memref<1x96x512xbf16, #tpu.memory_space<vmem>>, vector<1x80x512xbf16>
    %6 = vector.shape_cast %5 : vector<1x80x512xbf16> to vector<80x512xbf16>
    %c1_7 = arith.constant 1 : index
    %c0_8 = arith.constant 0 : index
    %c0_9 = arith.constant 0 : index
    %7 = vector.load %arg2[%c1_7, %c0_8, %c0_9] : memref<4x512x128xbf16, #tpu.memory_space<vmem>>, vector<1x512x128xbf16>
    %8 = vector.shape_cast %7 : vector<1x512x128xbf16> to vector<512x128xbf16>
    %cst_10 = arith.constant dense<0.000000e+00> : vector<80x128xf32>
    %9 = tpu.matmul %6, %8, %cst_10 {dimension_numbers = #tpu.dot_dimension_numbers<[1], [0], [0], [1], [0, 0, 1, 1], [], []>} : vector<80x512xbf16>, vector<512x128xbf16>, vector<80x128xf32> -> vector<80x128xf32>
    %10 = arith.addf %4, %9 : vector<80x128xf32>
    %c0_11 = arith.constant 0 : index
    %c9 = arith.constant 9 : index
    %c0_12 = arith.constant 0 : index
    %11 = vector.load %arg1[%c0_11, %c9, %c0_12] : memref<1x96x512xbf16, #tpu.memory_space<vmem>>, vector<1x80x512xbf16>
    %12 = vector.shape_cast %11 : vector<1x80x512xbf16> to vector<80x512xbf16>
    %c2 = arith.constant 2 : index
    %c0_13 = arith.constant 0 : index
    %c0_14 = arith.constant 0 : index
    %13 = vector.load %arg2[%c2, %c0_13, %c0_14] : memref<4x512x128xbf16, #tpu.memory_space<vmem>>, vector<1x512x128xbf16>
    %14 = vector.shape_cast %13 : vector<1x512x128xbf16> to vector<512x128xbf16>
    %cst_15 = arith.constant dense<0.000000e+00> : vector<80x128xf32>
    %15 = tpu.matmul %12, %14, %cst_15 {dimension_numbers = #tpu.dot_dimension_numbers<[1], [0], [0], [1], [0, 0, 1, 1], [], []>} : vector<80x512xbf16>, vector<512x128xbf16>, vector<80x128xf32> -> vector<80x128xf32>
    %16 = arith.addf %10, %15 : vector<80x128xf32>
    %c0_16 = arith.constant 0 : index
    %c10 = arith.constant 10 : index
    %c0_17 = arith.constant 0 : index
    %17 = vector.load %arg1[%c0_16, %c10, %c0_17] : memref<1x96x512xbf16, #tpu.memory_space<vmem>>, vector<1x80x512xbf16>
    %18 = vector.shape_cast %17 : vector<1x80x512xbf16> to vector<80x512xbf16>
    %c3 = arith.constant 3 : index
    %c0_18 = arith.constant 0 : index
    %c0_19 = arith.constant 0 : index
    %19 = vector.load %arg2[%c3, %c0_18, %c0_19] : memref<4x512x128xbf16, #tpu.memory_space<vmem>>, vector<1x512x128xbf16>
    %20 = vector.shape_cast %19 : vector<1x512x128xbf16> to vector<512x128xbf16>
    %cst_20 = arith.constant dense<0.000000e+00> : vector<80x128xf32>
    %21 = tpu.matmul %18, %20, %cst_20 {dimension_numbers = #tpu.dot_dimension_numbers<[1], [0], [0], [1], [0, 0, 1, 1], [], []>} : vector<80x512xbf16>, vector<512x128xbf16>, vector<80x128xf32> -> vector<80x128xf32>
    %22 = arith.addf %16, %21 : vector<80x128xf32>
    %c0_21 = arith.constant 0 : index
    %c0_22 = arith.constant 0 : index
    %23 = vector.load %arg3[%c0_21, %c0_22] : memref<1x128xf32, #tpu.memory_space<vmem>>, vector<1x128xf32>
    %24 = vector.broadcast %23 : vector<1x128xf32> to vector<80x128xf32>
    %25 = arith.addf %22, %24 : vector<80x128xf32>
    %26 = arith.negf %25 : vector<80x128xf32>
    %27 = math.exp %26 : vector<80x128xf32>
    %cst_23 = arith.constant 1.000000e+00 : f32
    %28 = vector.broadcast %cst_23 : f32 to vector<80x128xf32>
    %29 = arith.addf %28, %27 : vector<80x128xf32>
    %30 = arith.divf %28, %29 : vector<80x128xf32>
    %31 = arith.mulf %25, %30 : vector<80x128xf32>
    %32 = arith.truncf %31 : vector<80x128xf32> to vector<80x128xbf16>
    %c0_24 = arith.constant 0 : index
    %c0_25 = arith.constant 0 : index
    %c0_26 = arith.constant 0 : index
    %33 = vector.load %arg4[%c0_24, %c0_25, %c0_26] : memref<1x80x128xbf16, #tpu.memory_space<vmem>>, vector<1x80x128xbf16>
    %34 = vector.shape_cast %33 : vector<1x80x128xbf16> to vector<80x128xbf16>
    %35 = vector.shape_cast %32 : vector<80x128xbf16> to vector<1x80x128xbf16>
    tpu.vector_store %arg4[%c0_24, %c0_25, %c0_26], %35 {strides = array<i32>} : memref<1x80x128xbf16, #tpu.memory_space<vmem>>, vector<1x80x128xbf16>,
    return
  }
  func.func @transform_0(%arg0: i32) -> (i32, i32, i32) {
    %c0_i32 = arith.constant 0 : i32
    %c0_i32_0 = arith.constant 0 : i32
    %c0_i32_1 = arith.constant 0 : i32
    return %arg0, %c0_i32, %c0_i32_0 : i32, i32, i32
  }
  func.func @transform_1(%arg0: i32) -> (i32, i32, i32) {
    %c0_i32 = arith.constant 0 : i32
    %c0_i32_0 = arith.constant 0 : i32
    %c0_i32_1 = arith.constant 0 : i32
    %c0_i32_2 = arith.constant 0 : i32
    return %c0_i32, %c0_i32_0, %c0_i32_1 : i32, i32, i32
  }
  func.func @transform_2(%arg0: i32) -> (i32, i32) {
    %c0_i32 = arith.constant 0 : i32
    %c0_i32_0 = arith.constant 0 : i32
    %c0_i32_1 = arith.constant 0 : i32
    return %c0_i32, %c0_i32_0 : i32, i32
  }
  func.func @transform_3(%arg0: i32) -> (i32, i32, i32) {
    %c0_i32 = arith.constant 0 : i32
    %c0_i32_0 = arith.constant 0 : i32
    %c0_i32_1 = arith.constant 0 : i32
    return %arg0, %c0_i32, %c0_i32_0 : i32, i32, i32
  }
}

module attributes {stable_mosaic.version = 11 : i64} {
  func.func @_fused_level_kernel(%arg0: i32, %arg1: memref<64x128xbf16, #tpu.memory_space<vmem>>, %arg2: memref<128x128xbf16, #tpu.memory_space<vmem>>, %arg3: memref<1x128xf32, #tpu.memory_space<vmem>>, %arg4: memref<128x128xbf16, #tpu.memory_space<vmem>>, %arg5: memref<1x128xf32, #tpu.memory_space<vmem>>, %arg6: memref<64x128xbf16, #tpu.memory_space<vmem>>, %arg7: memref<64x128xbf16, #tpu.memory_space<vmem>>) attributes {dimension_semantics = [#tpu.dimension_semantics<parallel>], iteration_bounds = array<i64: 2>, scalar_prefetch = 0 : i64, scratch_operands = 0 : i64, tpu.core_type = #tpu.core_type<tc>, window_params = [{transform_indices = @transform_0, window_bounds = array<i64: 64, 128>}, {pipeline_mode = #tpu.pipeline_mode<synchronous>, transform_indices = @transform_1, window_bounds = array<i64: 128, 128>}, {pipeline_mode = #tpu.pipeline_mode<synchronous>, transform_indices = @transform_2, window_bounds = array<i64: 1, 128>}, {pipeline_mode = #tpu.pipeline_mode<synchronous>, transform_indices = @transform_3, window_bounds = array<i64: 128, 128>}, {pipeline_mode = #tpu.pipeline_mode<synchronous>, transform_indices = @transform_4, window_bounds = array<i64: 1, 128>}, {transform_indices = @transform_5, window_bounds = array<i64: 64, 128>}, {transform_indices = @transform_6, window_bounds = array<i64: 64, 128>}]} {
    %c0 = arith.constant 0 : index
    %c0_0 = arith.constant 0 : index
    %0 = vector.load %arg1[%c0, %c0_0] : memref<64x128xbf16, #tpu.memory_space<vmem>>, vector<64x128xbf16>
    %c0_1 = arith.constant 0 : index
    %c0_2 = arith.constant 0 : index
    %1 = vector.load %arg2[%c0_1, %c0_2] : memref<128x128xbf16, #tpu.memory_space<vmem>>, vector<128x128xbf16>
    %cst = arith.constant dense<0.000000e+00> : vector<64x128xf32>
    %2 = tpu.matmul %0, %1, %cst {dimension_numbers = #tpu.dot_dimension_numbers<[1], [0], [0], [1], [0, 0, 1, 1], [], []>} : vector<64x128xbf16>, vector<128x128xbf16>, vector<64x128xf32> -> vector<64x128xf32>
    %c0_3 = arith.constant 0 : index
    %c0_4 = arith.constant 0 : index
    %3 = vector.load %arg3[%c0_3, %c0_4] : memref<1x128xf32, #tpu.memory_space<vmem>>, vector<1x128xf32>
    %4 = vector.broadcast %3 : vector<1x128xf32> to vector<64x128xf32>
    %5 = arith.addf %2, %4 : vector<64x128xf32>
    %6 = arith.negf %5 : vector<64x128xf32>
    %7 = math.exp %6 : vector<64x128xf32>
    %cst_5 = arith.constant 1.000000e+00 : f32
    %8 = vector.broadcast %cst_5 : f32 to vector<64x128xf32>
    %9 = arith.addf %8, %7 : vector<64x128xf32>
    %10 = arith.divf %8, %9 : vector<64x128xf32>
    %11 = arith.mulf %5, %10 : vector<64x128xf32>
    %12 = arith.truncf %11 : vector<64x128xf32> to vector<64x128xbf16>
    %c0_6 = arith.constant 0 : index
    %c0_7 = arith.constant 0 : index
    %13 = vector.load %arg6[%c0_6, %c0_7] : memref<64x128xbf16, #tpu.memory_space<vmem>>, vector<64x128xbf16>
    tpu.vector_store %arg6[%c0_6, %c0_7], %12 {strides = array<i32>} : memref<64x128xbf16, #tpu.memory_space<vmem>>, vector<64x128xbf16>,
    %14 = arith.truncf %11 : vector<64x128xf32> to vector<64x128xbf16>
    %c0_8 = arith.constant 0 : index
    %c0_9 = arith.constant 0 : index
    %15 = vector.load %arg4[%c0_8, %c0_9] : memref<128x128xbf16, #tpu.memory_space<vmem>>, vector<128x128xbf16>
    %cst_10 = arith.constant dense<0.000000e+00> : vector<64x128xf32>
    %16 = tpu.matmul %14, %15, %cst_10 {dimension_numbers = #tpu.dot_dimension_numbers<[1], [0], [0], [1], [0, 0, 1, 1], [], []>} : vector<64x128xbf16>, vector<128x128xbf16>, vector<64x128xf32> -> vector<64x128xf32>
    %c0_11 = arith.constant 0 : index
    %c0_12 = arith.constant 0 : index
    %17 = vector.load %arg5[%c0_11, %c0_12] : memref<1x128xf32, #tpu.memory_space<vmem>>, vector<1x128xf32>
    %18 = vector.broadcast %17 : vector<1x128xf32> to vector<64x128xf32>
    %19 = arith.addf %16, %18 : vector<64x128xf32>
    %20 = arith.truncf %19 : vector<64x128xf32> to vector<64x128xbf16>
    %c0_13 = arith.constant 0 : index
    %c0_14 = arith.constant 0 : index
    %21 = vector.load %arg7[%c0_13, %c0_14] : memref<64x128xbf16, #tpu.memory_space<vmem>>, vector<64x128xbf16>
    tpu.vector_store %arg7[%c0_13, %c0_14], %20 {strides = array<i32>} : memref<64x128xbf16, #tpu.memory_space<vmem>>, vector<64x128xbf16>,
    return
  }
  func.func @transform_0(%arg0: i32) -> (i32, i32) {
    %c0_i32 = arith.constant 0 : i32
    %c0_i32_0 = arith.constant 0 : i32
    return %arg0, %c0_i32 : i32, i32
  }
  func.func @transform_1(%arg0: i32) -> (i32, i32) {
    %c0_i32 = arith.constant 0 : i32
    %c0_i32_0 = arith.constant 0 : i32
    %c0_i32_1 = arith.constant 0 : i32
    return %c0_i32, %c0_i32_0 : i32, i32
  }
  func.func @transform_2(%arg0: i32) -> (i32, i32) {
    %c0_i32 = arith.constant 0 : i32
    %c0_i32_0 = arith.constant 0 : i32
    %c0_i32_1 = arith.constant 0 : i32
    return %c0_i32, %c0_i32_0 : i32, i32
  }
  func.func @transform_3(%arg0: i32) -> (i32, i32) {
    %c0_i32 = arith.constant 0 : i32
    %c0_i32_0 = arith.constant 0 : i32
    %c0_i32_1 = arith.constant 0 : i32
    return %c0_i32, %c0_i32_0 : i32, i32
  }
  func.func @transform_4(%arg0: i32) -> (i32, i32) {
    %c0_i32 = arith.constant 0 : i32
    %c0_i32_0 = arith.constant 0 : i32
    %c0_i32_1 = arith.constant 0 : i32
    return %c0_i32, %c0_i32_0 : i32, i32
  }
  func.func @transform_5(%arg0: i32) -> (i32, i32) {
    %c0_i32 = arith.constant 0 : i32
    %c0_i32_0 = arith.constant 0 : i32
    return %arg0, %c0_i32 : i32, i32
  }
  func.func @transform_6(%arg0: i32) -> (i32, i32) {
    %c0_i32 = arith.constant 0 : i32
    %c0_i32_0 = arith.constant 0 : i32
    return %arg0, %c0_i32 : i32, i32
  }
}

module attributes {stable_mosaic.version = 11 : i64} {
  func.func @_fused_level_kernel(%arg0: i32, %arg1: memref<256x128xbf16, #tpu.memory_space<vmem>>, %arg2: memref<128x128xbf16, #tpu.memory_space<vmem>>, %arg3: memref<1x128xf32, #tpu.memory_space<vmem>>, %arg4: memref<128x128xbf16, #tpu.memory_space<vmem>>, %arg5: memref<128x128xbf16, #tpu.memory_space<vmem>>, %arg6: memref<1x128xf32, #tpu.memory_space<vmem>>, %arg7: memref<256x128xbf16, #tpu.memory_space<vmem>>, %arg8: memref<256x128xbf16, #tpu.memory_space<vmem>>) attributes {dimension_semantics = [#tpu.dimension_semantics<parallel>], iteration_bounds = array<i64: 2>, scalar_prefetch = 0 : i64, scratch_operands = 0 : i64, tpu.core_type = #tpu.core_type<tc>, window_params = [{transform_indices = @transform_0, window_bounds = array<i64: 256, 128>}, {pipeline_mode = #tpu.pipeline_mode<synchronous>, transform_indices = @transform_1, window_bounds = array<i64: 128, 128>}, {pipeline_mode = #tpu.pipeline_mode<synchronous>, transform_indices = @transform_2, window_bounds = array<i64: 1, 128>}, {transform_indices = @transform_3, window_bounds = array<i64: 128, 128>}, {pipeline_mode = #tpu.pipeline_mode<synchronous>, transform_indices = @transform_4, window_bounds = array<i64: 128, 128>}, {pipeline_mode = #tpu.pipeline_mode<synchronous>, transform_indices = @transform_5, window_bounds = array<i64: 1, 128>}, {transform_indices = @transform_6, window_bounds = array<i64: 256, 128>}, {transform_indices = @transform_7, window_bounds = array<i64: 256, 128>}]} {
    %c0 = arith.constant 0 : index
    %c0_0 = arith.constant 0 : index
    %0 = vector.load %arg1[%c0, %c0_0] : memref<256x128xbf16, #tpu.memory_space<vmem>>, vector<256x128xbf16>
    %c0_1 = arith.constant 0 : index
    %c0_2 = arith.constant 0 : index
    %1 = vector.load %arg2[%c0_1, %c0_2] : memref<128x128xbf16, #tpu.memory_space<vmem>>, vector<128x128xbf16>
    %cst = arith.constant dense<0.000000e+00> : vector<256x128xf32>
    %2 = tpu.matmul %0, %1, %cst {dimension_numbers = #tpu.dot_dimension_numbers<[1], [0], [0], [1], [0, 0, 1, 1], [], []>} : vector<256x128xbf16>, vector<128x128xbf16>, vector<256x128xf32> -> vector<256x128xf32>
    %c0_3 = arith.constant 0 : index
    %c0_4 = arith.constant 0 : index
    %3 = vector.load %arg3[%c0_3, %c0_4] : memref<1x128xf32, #tpu.memory_space<vmem>>, vector<1x128xf32>
    %4 = vector.broadcast %3 : vector<1x128xf32> to vector<256x128xf32>
    %5 = arith.addf %2, %4 : vector<256x128xf32>
    %6 = arith.negf %5 : vector<256x128xf32>
    %7 = math.exp %6 : vector<256x128xf32>
    %cst_5 = arith.constant 1.000000e+00 : f32
    %8 = vector.broadcast %cst_5 : f32 to vector<256x128xf32>
    %9 = arith.addf %8, %7 : vector<256x128xf32>
    %10 = arith.divf %8, %9 : vector<256x128xf32>
    %11 = arith.mulf %5, %10 : vector<256x128xf32>
    %c0_6 = arith.constant 0 : index
    %c0_7 = arith.constant 0 : index
    %12 = vector.load %arg4[%c0_6, %c0_7] : memref<128x128xbf16, #tpu.memory_space<vmem>>, vector<128x128xbf16>
    %13 = arith.extf %12 : vector<128x128xbf16> to vector<128x128xf32>
    %14 = vector.shape_cast %13 : vector<128x128xf32> to vector<8x1x16x128xf32>
    %15 = vector.shape_cast %11 : vector<256x128xf32> to vector<8x2x16x128xf32>
    %16 = vector.broadcast %14 : vector<8x1x16x128xf32> to vector<8x2x16x128xf32>
    %17 = arith.addf %15, %16 : vector<8x2x16x128xf32>
    %18 = vector.shape_cast %17 : vector<8x2x16x128xf32> to vector<256x128xf32>
    %19 = arith.truncf %18 : vector<256x128xf32> to vector<256x128xbf16>
    %c0_8 = arith.constant 0 : index
    %c0_9 = arith.constant 0 : index
    %20 = vector.load %arg7[%c0_8, %c0_9] : memref<256x128xbf16, #tpu.memory_space<vmem>>, vector<256x128xbf16>
    tpu.vector_store %arg7[%c0_8, %c0_9], %19 {strides = array<i32>} : memref<256x128xbf16, #tpu.memory_space<vmem>>, vector<256x128xbf16>,
    %21 = arith.truncf %18 : vector<256x128xf32> to vector<256x128xbf16>
    %c0_10 = arith.constant 0 : index
    %c0_11 = arith.constant 0 : index
    %22 = vector.load %arg5[%c0_10, %c0_11] : memref<128x128xbf16, #tpu.memory_space<vmem>>, vector<128x128xbf16>
    %cst_12 = arith.constant dense<0.000000e+00> : vector<256x128xf32>
    %23 = tpu.matmul %21, %22, %cst_12 {dimension_numbers = #tpu.dot_dimension_numbers<[1], [0], [0], [1], [0, 0, 1, 1], [], []>} : vector<256x128xbf16>, vector<128x128xbf16>, vector<256x128xf32> -> vector<256x128xf32>
    %c0_13 = arith.constant 0 : index
    %c0_14 = arith.constant 0 : index
    %24 = vector.load %arg6[%c0_13, %c0_14] : memref<1x128xf32, #tpu.memory_space<vmem>>, vector<1x128xf32>
    %25 = vector.broadcast %24 : vector<1x128xf32> to vector<256x128xf32>
    %26 = arith.addf %23, %25 : vector<256x128xf32>
    %27 = arith.truncf %26 : vector<256x128xf32> to vector<256x128xbf16>
    %c0_15 = arith.constant 0 : index
    %c0_16 = arith.constant 0 : index
    %28 = vector.load %arg8[%c0_15, %c0_16] : memref<256x128xbf16, #tpu.memory_space<vmem>>, vector<256x128xbf16>
    tpu.vector_store %arg8[%c0_15, %c0_16], %27 {strides = array<i32>} : memref<256x128xbf16, #tpu.memory_space<vmem>>, vector<256x128xbf16>,
    return
  }
  func.func @transform_0(%arg0: i32) -> (i32, i32) {
    %c0_i32 = arith.constant 0 : i32
    %c0_i32_0 = arith.constant 0 : i32
    return %arg0, %c0_i32 : i32, i32
  }
  func.func @transform_1(%arg0: i32) -> (i32, i32) {
    %c0_i32 = arith.constant 0 : i32
    %c0_i32_0 = arith.constant 0 : i32
    %c0_i32_1 = arith.constant 0 : i32
    return %c0_i32, %c0_i32_0 : i32, i32
  }
  func.func @transform_2(%arg0: i32) -> (i32, i32) {
    %c0_i32 = arith.constant 0 : i32
    %c0_i32_0 = arith.constant 0 : i32
    %c0_i32_1 = arith.constant 0 : i32
    return %c0_i32, %c0_i32_0 : i32, i32
  }
  func.func @transform_3(%arg0: i32) -> (i32, i32) {
    %c0_i32 = arith.constant 0 : i32
    %c0_i32_0 = arith.constant 0 : i32
    return %arg0, %c0_i32 : i32, i32
  }
  func.func @transform_4(%arg0: i32) -> (i32, i32) {
    %c0_i32 = arith.constant 0 : i32
    %c0_i32_0 = arith.constant 0 : i32
    %c0_i32_1 = arith.constant 0 : i32
    return %c0_i32, %c0_i32_0 : i32, i32
  }
  func.func @transform_5(%arg0: i32) -> (i32, i32) {
    %c0_i32 = arith.constant 0 : i32
    %c0_i32_0 = arith.constant 0 : i32
    %c0_i32_1 = arith.constant 0 : i32
    return %c0_i32, %c0_i32_0 : i32, i32
  }
  func.func @transform_6(%arg0: i32) -> (i32, i32) {
    %c0_i32 = arith.constant 0 : i32
    %c0_i32_0 = arith.constant 0 : i32
    return %arg0, %c0_i32 : i32, i32
  }
  func.func @transform_7(%arg0: i32) -> (i32, i32) {
    %c0_i32 = arith.constant 0 : i32
    %c0_i32_0 = arith.constant 0 : i32
    return %arg0, %c0_i32 : i32, i32
  }
}

module attributes {stable_mosaic.version = 11 : i64} {
  func.func @_fused_level_kernel(%arg0: i32, %arg1: memref<1024x128xbf16, #tpu.memory_space<vmem>>, %arg2: memref<128x128xbf16, #tpu.memory_space<vmem>>, %arg3: memref<1x128xf32, #tpu.memory_space<vmem>>, %arg4: memref<512x128xbf16, #tpu.memory_space<vmem>>, %arg5: memref<128x128xbf16, #tpu.memory_space<vmem>>, %arg6: memref<1x128xf32, #tpu.memory_space<vmem>>, %arg7: memref<1024x128xbf16, #tpu.memory_space<vmem>>) attributes {dimension_semantics = [#tpu.dimension_semantics<parallel>], iteration_bounds = array<i64: 2>, scalar_prefetch = 0 : i64, scratch_operands = 0 : i64, tpu.core_type = #tpu.core_type<tc>, window_params = [{transform_indices = @transform_0, window_bounds = array<i64: 1024, 128>}, {pipeline_mode = #tpu.pipeline_mode<synchronous>, transform_indices = @transform_1, window_bounds = array<i64: 128, 128>}, {pipeline_mode = #tpu.pipeline_mode<synchronous>, transform_indices = @transform_2, window_bounds = array<i64: 1, 128>}, {transform_indices = @transform_3, window_bounds = array<i64: 512, 128>}, {pipeline_mode = #tpu.pipeline_mode<synchronous>, transform_indices = @transform_4, window_bounds = array<i64: 128, 128>}, {pipeline_mode = #tpu.pipeline_mode<synchronous>, transform_indices = @transform_5, window_bounds = array<i64: 1, 128>}, {transform_indices = @transform_6, window_bounds = array<i64: 1024, 128>}]} {
    %c0 = arith.constant 0 : index
    %c0_0 = arith.constant 0 : index
    %0 = vector.load %arg1[%c0, %c0_0] : memref<1024x128xbf16, #tpu.memory_space<vmem>>, vector<1024x128xbf16>
    %c0_1 = arith.constant 0 : index
    %c0_2 = arith.constant 0 : index
    %1 = vector.load %arg2[%c0_1, %c0_2] : memref<128x128xbf16, #tpu.memory_space<vmem>>, vector<128x128xbf16>
    %cst = arith.constant dense<0.000000e+00> : vector<1024x128xf32>
    %2 = tpu.matmul %0, %1, %cst {dimension_numbers = #tpu.dot_dimension_numbers<[1], [0], [0], [1], [0, 0, 1, 1], [], []>} : vector<1024x128xbf16>, vector<128x128xbf16>, vector<1024x128xf32> -> vector<1024x128xf32>
    %c0_3 = arith.constant 0 : index
    %c0_4 = arith.constant 0 : index
    %3 = vector.load %arg3[%c0_3, %c0_4] : memref<1x128xf32, #tpu.memory_space<vmem>>, vector<1x128xf32>
    %4 = vector.broadcast %3 : vector<1x128xf32> to vector<1024x128xf32>
    %5 = arith.addf %2, %4 : vector<1024x128xf32>
    %6 = arith.negf %5 : vector<1024x128xf32>
    %7 = math.exp %6 : vector<1024x128xf32>
    %cst_5 = arith.constant 1.000000e+00 : f32
    %8 = vector.broadcast %cst_5 : f32 to vector<1024x128xf32>
    %9 = arith.addf %8, %7 : vector<1024x128xf32>
    %10 = arith.divf %8, %9 : vector<1024x128xf32>
    %11 = arith.mulf %5, %10 : vector<1024x128xf32>
    %c0_6 = arith.constant 0 : index
    %c0_7 = arith.constant 0 : index
    %12 = vector.load %arg4[%c0_6, %c0_7] : memref<512x128xbf16, #tpu.memory_space<vmem>>, vector<512x128xbf16>
    %13 = arith.extf %12 : vector<512x128xbf16> to vector<512x128xf32>
    %14 = vector.shape_cast %13 : vector<512x128xf32> to vector<16x1x32x128xf32>
    %15 = vector.shape_cast %11 : vector<1024x128xf32> to vector<16x2x32x128xf32>
    %16 = vector.broadcast %14 : vector<16x1x32x128xf32> to vector<16x2x32x128xf32>
    %17 = arith.addf %15, %16 : vector<16x2x32x128xf32>
    %18 = vector.shape_cast %17 : vector<16x2x32x128xf32> to vector<1024x128xf32>
    %19 = arith.truncf %18 : vector<1024x128xf32> to vector<1024x128xbf16>
    %c0_8 = arith.constant 0 : index
    %c0_9 = arith.constant 0 : index
    %20 = vector.load %arg5[%c0_8, %c0_9] : memref<128x128xbf16, #tpu.memory_space<vmem>>, vector<128x128xbf16>
    %cst_10 = arith.constant dense<0.000000e+00> : vector<1024x128xf32>
    %21 = tpu.matmul %19, %20, %cst_10 {dimension_numbers = #tpu.dot_dimension_numbers<[1], [0], [0], [1], [0, 0, 1, 1], [], []>} : vector<1024x128xbf16>, vector<128x128xbf16>, vector<1024x128xf32> -> vector<1024x128xf32>
    %c0_11 = arith.constant 0 : index
    %c0_12 = arith.constant 0 : index
    %22 = vector.load %arg6[%c0_11, %c0_12] : memref<1x128xf32, #tpu.memory_space<vmem>>, vector<1x128xf32>
    %23 = vector.broadcast %22 : vector<1x128xf32> to vector<1024x128xf32>
    %24 = arith.addf %21, %23 : vector<1024x128xf32>
    %25 = arith.truncf %24 : vector<1024x128xf32> to vector<1024x128xbf16>
    %c0_13 = arith.constant 0 : index
    %c0_14 = arith.constant 0 : index
    %26 = vector.load %arg7[%c0_13, %c0_14] : memref<1024x128xbf16, #tpu.memory_space<vmem>>, vector<1024x128xbf16>
    tpu.vector_store %arg7[%c0_13, %c0_14], %25 {strides = array<i32>} : memref<1024x128xbf16, #tpu.memory_space<vmem>>, vector<1024x128xbf16>,
    return
  }
  func.func @transform_0(%arg0: i32) -> (i32, i32) {
    %c0_i32 = arith.constant 0 : i32
    %c0_i32_0 = arith.constant 0 : i32
    return %arg0, %c0_i32 : i32, i32
  }
  func.func @transform_1(%arg0: i32) -> (i32, i32) {
    %c0_i32 = arith.constant 0 : i32
    %c0_i32_0 = arith.constant 0 : i32
    %c0_i32_1 = arith.constant 0 : i32
    return %c0_i32, %c0_i32_0 : i32, i32
  }
  func.func @transform_2(%arg0: i32) -> (i32, i32) {
    %c0_i32 = arith.constant 0 : i32
    %c0_i32_0 = arith.constant 0 : i32
    %c0_i32_1 = arith.constant 0 : i32
    return %c0_i32, %c0_i32_0 : i32, i32
  }
  func.func @transform_3(%arg0: i32) -> (i32, i32) {
    %c0_i32 = arith.constant 0 : i32
    %c0_i32_0 = arith.constant 0 : i32
    return %arg0, %c0_i32 : i32, i32
  }
  func.func @transform_4(%arg0: i32) -> (i32, i32) {
    %c0_i32 = arith.constant 0 : i32
    %c0_i32_0 = arith.constant 0 : i32
    %c0_i32_1 = arith.constant 0 : i32
    return %c0_i32, %c0_i32_0 : i32, i32
  }
  func.func @transform_5(%arg0: i32) -> (i32, i32) {
    %c0_i32 = arith.constant 0 : i32
    %c0_i32_0 = arith.constant 0 : i32
    %c0_i32_1 = arith.constant 0 : i32
    return %c0_i32, %c0_i32_0 : i32, i32
  }
  func.func @transform_6(%arg0: i32) -> (i32, i32) {
    %c0_i32 = arith.constant 0 : i32
    %c0_i32_0 = arith.constant 0 : i32
    return %arg0, %c0_i32 : i32, i32
  }
}

</mosaic_0001>

<bundles_post_ra>
// kernel: yolo_block4_forward.5
= control target key start
LH: loop header
LB: loop body
LE: loop exit
PB: predicated region body
PF: predicated region fallthrough
CT: control target
= control target key end

     0   :  { %s1096_s21 = smov 0   ;;  %s1175_s0 = inlined_call_operand.vmem [shape: bf16[128,128], index: 0, kind: input, shape index: {}]   ;;  %s1176_s1 = inlined_call_operand.vmem [shape: bf16[128,128], index: 1, kind: input, shape index: {}]   ;;  %s1177_s2 = inlined_call_operand.vmem [shape: f32[1,128], index: 2, kind: input, shape index: {}]   ;;  %s1178_s3 = inlined_call_operand.vmem [shape: bf16[128,128], index: 3, kind: input, shape index: {}]   ;;  %s1179_s4 = inlined_call_operand.vmem [shape: f32[1,128], index: 4, kind: input, shape index: {}]   ;;  %s1180_s5 = inlined_call_operand.vmem [shape: bf16[128,128], index: 5, kind: output, shape index: {0}]   ;;  %s1181_s6 = inlined_call_operand.vmem [shape: bf16[128,128], index: 6, kind: output, shape index: {1}]  }
   0x1 LB: > { %s800_s22 = sadd.s32 4294967295, %s1059_s21   ;;  %p804_p0 = scmp.ge.s32.totalorder %s1059_s21, 1  ;;  %s1059_s21 = sphi %s1096_s21, %s17_s21  }
   0x2   : > { %p216_p1 = scmp.lt.s32.totalorder %s1059_s21, 3 }
   0x4   : > { %p217_p2 = pnand %p804_p0, %p216_p1 }
   0x5   : > { %s805_s25 = sshll.u32 (!%p217_p2), %s800_s22, 3 }
   0x6   : > { %220 = sbr.rel (%p217_p2) target bundleno = 494 (0x1ee), region = 40  ;;  %p252_p3 = scmp.lt.s32.totalorder (!%p217_p2), %s805_s25, 15 }
   0xb   : > { %v1001_v0 = vld [vmem:[%s1176_s1 + $0x38] sm:$0xff]   ;;  %v1002_v1 = vld [vmem:[%s1176_s1 + $0x30] sm:$0xff]   ;;  %s1183_s25 = smov (!%p252_p3, %s805_s25), 15  ;;  %v1003_v2 = vld [vmem:[%s1176_s1 + $0x28] sm:$0xff]  }
   0xc   : > { %945 = vmatprep.subr.bf16.mxu0 %v1001_v0  ;;  %s1113_s30 = sshll.u32 %s1183_s25, 2  ;;  %v1004_v3 = vld [vmem:[%s1176_s1 + $0x20] sm:$0xff]   ;;  %v1005_v5 = vld [vmem:[%s1176_s1 + $0x18] sm:$0xff]   ;;  %v1006_v6 = vld [vmem:[%s1176_s1 + $0x10] sm:$0xff]  }
   0xd   : > { %946 = vmatpush3.bf16.msra.mxu0 %v1001_v0  ;;  %s255_s9 = scalar_lea.vmem %s1175_s0, %s1113_s30  ;;  %v1007_v7 = vld [vmem:[%s1176_s1 + $0x8] sm:$0xff]   ;;  %v1008_v8 = vld [vmem:[%s1176_s1] sm:$0xff]   ;;  %v1013_v12 = vld [vmem:[%s1178_s3 + $0x38] sm:$0xff]   ;;  %s261_s18 = scalar_lea.vmem %s1180_s5, %s1113_s30 }
   0xe   : > { %947 = vmatprep.subr.bf16.mxu0 %v1002_v1  ;;  %v1009_v4 = vld [vmem:[%s255_s9] sm:$0xff]   ;;  %v1010_v9 = vld [vmem:[%s255_s9 + $0x8] sm:$0xff]   ;;  %v1011_v10 = vld [vmem:[%s255_s9 + $0x10] sm:$0xff]   ;;  %969 = vmatprep.subr.bf16.mxu1 %v1013_v12  ;;  %s267_s24 = scalar_lea.vmem %s1181_s6, %s1113_s30 }
   0xf   : > { %961 = vmatprep.mubr.bf16.mxu0 %v1009_v4  ;;  %v1012_v11 = vld [vmem:[%s255_s9 + $0x18] sm:$0xff]   ;;  %970 = vmatpush3.bf16.msra.mxu1 %v1013_v12  ;;  %v1014_v13 = vld [vmem:[%s1178_s3 + $0x30] sm:$0xff]   ;;  %v1015_v14 = vld [vmem:[%s1178_s3 + $0x28] sm:$0xff]  }
  0x10   : > { %971 = vmatprep.subr.bf16.mxu1 %v1014_v13  ;;  %v1016_v15 = vld [vmem:[%s1178_s3 + $0x20] sm:$0xff]   ;;  %v1017_v16 = vld [vmem:[%s1178_s3 + $0x18] sm:$0xff]   ;;  %v1018_v17 = vld [vmem:[%s1178_s3 + $0x10] sm:$0xff]  }
  0x11   : > { %948 = vmatpush3.bf16.msra.mxu0 %v1002_v1  ;;  %v1019_v18 = vld [vmem:[%s1178_s3 + $0x8] sm:$0xff]   ;;  %v1020_v19 = vld [vmem:[%s1178_s3] sm:$0xff]  }
  0x12   : > { %949 = vmatprep.subr.bf16.mxu0 %v1003_v2  ;;  %v811_v20 = vld [vmem:[%s1177_s2] ss:$0 sm:$0xff] }
  0x13   : > { %972 = vmatpush3.bf16.msra.mxu1 %v1014_v13 }
  0x14   : > { %973 = vmatprep.subr.bf16.mxu1 %v1015_v14 }
  0x15   : > { %950 = vmatpush3.bf16.msra.mxu0 %v1003_v2 }
  0x16   : > { %951 = vmatprep.subr.bf16.mxu0 %v1004_v3 }
  0x17   : > { %974 = vmatpush3.bf16.msra.mxu1 %v1015_v14 }
  0x18   : > { %975 = vmatprep.subr.bf16.mxu1 %v1016_v15 }
  0x19   : > { %952 = vmatpush3.bf16.msra.mxu0 %v1004_v3 }
  0x1a   : > { %953 = vmatprep.subr.bf16.mxu0 %v1005_v5 }
  0x1b   : > { %976 = vmatpush3.bf16.msra.mxu1 %v1016_v15 }
  0x1c   : > { %977 = vmatprep.subr.bf16.mxu1 %v1017_v16 }
  0x1d   : > { %954 = vmatpush3.bf16.msra.mxu0 %v1005_v5 }
  0x1e   : > { %955 = vmatprep.subr.bf16.mxu0 %v1006_v6 }
  0x1f   : > { %978 = vmatpush3.bf16.msra.mxu1 %v1017_v16 }
  0x20   : > { %979 = vmatprep.subr.bf16.mxu1 %v1018_v17 }
  0x21   : > { %956 = vmatpush3.bf16.msra.mxu0 %v1006_v6 }
  0x22   : > { %957 = vmatprep.subr.bf16.mxu0 %v1007_v7 }
  0x23   : > { %980 = vmatpush3.bf16.msra.mxu1 %v1018_v17 }
  0x24   : > { %981 = vmatprep.subr.bf16.mxu1 %v1019_v18 }
  0x25   : > { %958 = vmatpush3.bf16.msra.mxu0 %v1007_v7 }
  0x26   : > { %959 = vmatprep.subr.bf16.mxu0 %v1008_v8 }
  0x27   : > { %982 = vmatpush3.bf16.msra.mxu1 %v1019_v18  ;;  %v840_v18 = vld [vmem:[%s1179_s4] ss:$0 sm:$0xff] }
  0x28   : > { %983 = vmatprep.subr.bf16.mxu1 %v1020_v19 }
  0x29   : > { %960 = vmatpush3.bf16.msra.mxu0 %v1008_v8 }
  0x2b   : > { %984 = vmatpush3.bf16.msra.mxu1 %v1020_v19 }
  0x2c   : > { %962 = vmatmul.mubr.bf16.vlgmr.msra.gmra.mxu0 %v1010_v9 }
  0x2d   : > { %965 = vmatprep.mubr.bf16.mxu0 %v1011_v10 }
  0x34   : > { %966 = vmatmul.mubr.bf16.gmra.mxu0 %v1012_v11 }
  0xec   : > { %v963_v21 = vpop.f32.mrf.mxu0 }
  0xed   : > { %v416_v22 = vadd.f32 %v963_v21, %v811_v20 }
  0xee   : > { %v407_v23 = vpop.f32.mrf.mxu0 }
  0xef   : > { %v826_v24 = vmul.f32 -1.442695, %v416_v22  ;;  %v408_v25 = vadd.f32 %v811_v20, %v407_v23 }
  0xf0   : > { %v964_v26 = vpop.f32.mrf.mxu0 }
  0xf1   : > { %1021 = vpow2.f32 %v826_v24  ;;  %v824_v27 = vmul.f32 -1.442695, %v408_v25  ;;  %v419_v28 = vadd.f32 %v964_v26, %v811_v20 }
  0xf2   : > { %v410_v29 = vpop.f32.mrf.mxu0 }
  0xf3   : > { %1023 = vpow2.f32 %v824_v27  ;;  %v827_v30 = vmul.f32 -1.442695, %v419_v28  ;;  %v411_v31 = vadd.f32 %v811_v20, %v410_v29 }
  0xf4   : > { %v967_v32 = vpop.f32.mrf.mxu0 }
  0xf5   : > { %1025 = vpow2.f32 %v827_v30  ;;  %v825_v33 = vmul.f32 -1.442695, %v411_v31  ;;  %v432_v34 = vadd.f32 %v967_v32, %v811_v20 }
  0xf6   : > { %v423_v35 = vpop.f32.mrf.mxu0 }
  0xf7   : > { %1027 = vpow2.f32 %v825_v33  ;;  %v830_v36 = vmul.f32 -1.442695, %v432_v34  ;;  %v424_v37 = vadd.f32 %v811_v20, %v423_v35 }
  0xf8   : > { %v968_v38 = vpop.f32.mrf.mxu0 }
  0xf9   : > { %1029 = vpow2.f32 %v830_v36  ;;  %v828_v39 = vmul.f32 -1.442695, %v424_v37  ;;  %v435_v40 = vadd.f32 %v968_v38, %v811_v20 }
  0xfa   : > { %v426_v41 = vpop.f32.mrf.mxu0 }
  0xfb   : > { %1031 = vpow2.f32 %v828_v39  ;;  %v831_v42 = vmul.f32 -1.442695, %v435_v40  ;;  %v427_v43 = vadd.f32 %v811_v20, %v426_v41 }
  0xfd   : > { %1033 = vpow2.f32 %v831_v42  ;;  %v829_v44 = vmul.f32 -1.442695, %v427_v43 }
  0xfe   : > { %v1022_v45 = vpop.eup %1021 }
  0xff   : > { %v464_v46 = vadd.f32 1.0, %v1022_v45  ;;  %1035 = vpow2.f32 %v829_v44 }
 0x100   : > { %v1024_v47 = vpop.eup %1023 }
 0x101   : > { %v462_v48 = vadd.f32 1.0, %v1024_v47  ;;  %1037 = vrcp.f32 %v464_v46 }
 0x102   : > { %v1026_v49 = vpop.eup %1025 }
 0x103   : > { %v465_v50 = vadd.f32 1.0, %v1026_v49  ;;  %1039 = vrcp.f32 %v462_v48 }
 0x104   : > { %v1028_v51 = vpop.eup %1027 }
 0x105   : > { %1041 = vrcp.f32 %v465_v50  ;;  %v463_v52 = vadd.f32 1.0, %v1028_v51 }
 0x106   : > { %v1030_v53 = vpop.eup %1029 }
 0x107   : > { %1043 = vrcp.f32 %v463_v52  ;;  %v468_v54 = vadd.f32 1.0, %v1030_v53 }
 0x108   : > { %v1032_v55 = vpop.eup %1031 }
 0x109   : > { %v466_v56 = vadd.f32 1.0, %v1032_v55  ;;  %1045 = vrcp.f32 %v468_v54 }
 0x10a   : > { %v1034_v57 = vpop.eup %1033 }
 0x10b   : > { %v469_v58 = vadd.f32 1.0, %v1034_v57  ;;  %1047 = vrcp.f32 %v466_v56 }
 0x10c   : > { %v1036_v59 = vpop.eup %1035 }
 0x10d   : > { %1049 = vrcp.f32 %v469_v58  ;;  %v467_v60 = vadd.f32 1.0, %v1036_v59 }
 0x10e   : > { %v1038_v61 = vpop.eup %1037 }
 0x10f   : > { %1051 = vrcp.f32 %v467_v60  ;;  %v488_v0 = vmul.f32 %v1038_v61, %v416_v22 }
 0x110   : > { %v1040_v62 = vpop.eup %1039 }
 0x111   : > { %v486_v3 = vmul.f32 %v1040_v62, %v408_v25 }
 0x112   : > { %v1042_v63 = vpop.eup %1041 }
 0x113   : > { %v489_v1 = vmul.f32 %v1042_v63, %v419_v28 }
 0x114   : > { %v1044_v2 = vpop.eup %1043 }
 0x115   : > { %v487_v4 = vmul.f32 %v1044_v2, %v411_v31  ;;  %v495_v5 = vpack.c.bf16 %v489_v1, %v488_v0 }
 0x116   : > { %v1046_v7 = vpop.eup %1045 }
 0x117   : > { %v494_v6 = vpack.c.bf16 %v487_v4, %v486_v3  ;;  %915 = vst [vmem:[%s261_s18 + $0x8] sm:$0xff] %v495_v5   ;;  %v492_v10 = vmul.f32 %v1046_v7, %v432_v34 }
 0x118   : > { %v1048_v8 = vpop.eup %1047 }
 0x119   : > { %879 = vst [vmem:[%s261_s18] sm:$0xff] %v494_v6   ;;  %985 = vmatprep.mubr.bf16.mxu1 %v494_v6  ;;  %v490_v13 = vmul.f32 %v1048_v8, %v424_v37 }
 0x11a   : > { %v1050_v9 = vpop.eup %1049  ;;  %986 = vmatmul.mubr.bf16.vlgmr.msra.gmra.mxu1 %v495_v5 }
 0x11b   : > { %v493_v11 = vmul.f32 %v1050_v9, %v435_v40 }
 0x11c   : > { %v1052_v12 = vpop.eup %1051 }
 0x11d   : > { %v491_v14 = vmul.f32 %v1052_v12, %v427_v43  ;;  %v497_v15 = vpack.c.bf16 %v493_v11, %v492_v10 }
 0x11f   : > { %v496_v16 = vpack.c.bf16 %v491_v14, %v490_v13  ;;  %917 = vst [vmem:[%s261_s18 + $0x18] sm:$0xff] %v497_v15  }
 0x121   : > { %916 = vst [vmem:[%s261_s18 + $0x10] sm:$0xff] %v496_v16   ;;  %989 = vmatprep.mubr.bf16.mxu1 %v496_v16 }
 0x122   : > { %990 = vmatmul.mubr.bf16.gmra.mxu1 %v497_v15 }
 0x1da   : > { %v987_v17 = vpop.f32.mrf.mxu1 }
 0x1db   : > { %v648_v21 = vadd.f32 %v987_v17, %v840_v18 }
 0x1dc   : > { %v639_v19 = vpop.f32.mrf.mxu1 }
 0x1dd   : > { %v640_v24 = vadd.f32 %v840_v18, %v639_v19 }
 0x1de   : > { %v988_v20 = vpop.f32.mrf.mxu1 }
 0x1df   : > { %v651_v22 = vadd.f32 %v988_v20, %v840_v18 }
 0x1e0   : > { %v642_v23 = vpop.f32.mrf.mxu1 }
 0x1e1   : > { %v903_v25 = vpack.c.bf16 %v651_v22, %v648_v21  ;;  %v643_v26 = vadd.f32 %v840_v18, %v642_v23 }
 0x1e2   : > { %v991_v27 = vpop.f32.mrf.mxu1 }
 0x1e3   : > { %918 = vst [vmem:[%s267_s24 + $0x8] sm:$0xff] %v903_v25   ;;  %v898_v28 = vpack.c.bf16 %v643_v26, %v640_v24  ;;  %v664_v31 = vadd.f32 %v991_v27, %v840_v18 }
 0x1e4   : > { %v655_v29 = vpop.f32.mrf.mxu1 }
 0x1e5   : > { %899 = vst [vmem:[%s267_s24] sm:$0xff] %v898_v28   ;;  %v656_v34 = vadd.f32 %v840_v18, %v655_v29 }
 0x1e6   : > { %v992_v30 = vpop.f32.mrf.mxu1 }
 0x1e7   : > { %v667_v32 = vadd.f32 %v992_v30, %v840_v18 }
 0x1e8   : > { %v658_v33 = vpop.f32.mrf.mxu1 }
 0x1e9   : > { %v913_v35 = vpack.c.bf16 %v667_v32, %v664_v31  ;;  %v659_v36 = vadd.f32 %v840_v18, %v658_v33 }
 0x1eb   : > { %920 = vst [vmem:[%s267_s24 + $0x18] sm:$0xff] %v913_v35   ;;  %v908_v37 = vpack.c.bf16 %v659_v36, %v656_v34 }
 0x1ed   : > { %919 = vst [vmem:[%s267_s24 + $0x10] sm:$0xff] %v908_v37  }
 0x1ee PF: > { %s17_s21 = sadd.s32 1, %s1059_s21  }
 0x1ef   : > { %p14_p4 = scmp.ge.s32.totalorder %s17_s21, 4  }
 0x1f1   :  { %16 = sbr.rel (!%p14_p4) target bundleno = 1 (0x1), region = 82 }

// kernel: yolo_block4_forward.4
= control target key start
LH: loop header
LB: loop body
LE: loop exit
PB: predicated region body
PF: predicated region fallthrough
CT: control target
= control target key end

     0   :  { %s3778_s12 = smov 0   ;;  %s4843_s0 = inlined_call_operand.vmem [shape: bf16[2,96,512], index: 0, kind: input, shape index: {}]   ;;  %s4844_s1 = inlined_call_operand.vmem [shape: bf16[4,512,128], index: 1, kind: input, shape index: {}]   ;;  %s4845_s2 = inlined_call_operand.vmem [shape: f32[1,128], index: 2, kind: input, shape index: {}]   ;;  %s4846_s3 = inlined_call_operand.vmem [shape: bf16[2,80,128], index: 3, kind: output, shape index: {}]  }
   0x1 LB: > { %s2709_s13 = sadd.s32 4294967295, %s3756_s12   ;;  %p2713_p0 = scmp.ge.s32.totalorder %s3756_s12, 1  ;;  %s3756_s12 = sphi %s3778_s12, %s13_s12  }
   0x2   : > { %p137_p1 = scmp.lt.s32.totalorder %s3756_s12, 3 }
   0x4   : > { %p138_p2 = pnand %p2713_p0, %p137_p1 }
   0x6   : > { %141 = sbr.rel (%p138_p2) target bundleno = 442 (0x1ba), region = 32 }
   0xb   : > { %v3528_v0 = vld [vmem:[%s4844_s1 + $0x178] sm:$0xff]   ;;  %v3532_v4 = vld [vmem:[%s4844_s1 + $0x170] sm:$0xff]   ;;  %v3536_v8 = vld [vmem:[%s4844_s1 + $0x168] sm:$0xff]   ;;  %p161_p3 = scmp.lt.s32.totalorder %s2709_s13, 1  ;;  %vm413_vm0 = vsmask.f32 7424 }
   0xc   : > { %v3529_v1 = vld [vmem:[%s4844_s1 + $0x1f8] sm:$0xff]   ;;  %3150 = vmatprep.subr.bf16.mxu0 %v3528_v0  ;;  %v3533_v5 = vld [vmem:[%s4844_s1 + $0x1f0] sm:$0xff]   ;;  %v3537_v9 = vld [vmem:[%s4844_s1 + $0x1e8] sm:$0xff]   ;;  %vm2104_vm1 = vcmask 1046528  }
   0xd   : > { %v3530_v2 = vld [vmem:[%s4844_s1 + $0x138] sm:$0xff]   ;;  %3196 = vmatprep.subr.bf16.mxu1 %v3529_v1  ;;  %v3534_v6 = vld [vmem:[%s4844_s1 + $0x130] sm:$0xff]   ;;  %v3538_v10 = vld [vmem:[%s4844_s1 + $0x128] sm:$0xff]   ;;  %s4852_s13 = smov (!%p161_p3, %s2709_s13), 1 }
   0xe   : > { %v3531_v3 = vld [vmem:[%s4844_s1 + $0x1b8] sm:$0xff]   ;;  %3151 = vmatpush3.bf16.msra.mxu0 %v3530_v2  ;;  %v3535_v7 = vld [vmem:[%s4844_s1 + $0x1b0] sm:$0xff]   ;;  %v3539_v11 = vld [vmem:[%s4844_s1 + $0x1a8] sm:$0xff]   ;;  %s3518_s16 = smul.u32 192, %s4852_s13 }
   0xf   : > { %3197 = vmatpush3.bf16.msra.mxu1 %v3531_v3  ;;  %3152 = vmatprep.subr.bf16.mxu0 %v3532_v4  ;;  %v3540_v12 = vld [vmem:[%s4844_s1 + $0x160] sm:$0xff]   ;;  %v3544_v16 = vld [vmem:[%s4844_s1 + $0x158] sm:$0xff]   ;;  %v3548_v20 = vld [vmem:[%s4844_s1 + $0x150] sm:$0xff]   ;;  %s3519_s6 = smul.u32 40, %s4852_s13 }
  0x10   : > { %3198 = vmatprep.subr.bf16.mxu1 %v3533_v5  ;;  %v3541_v13 = vld [vmem:[%s4844_s1 + $0x1e0] sm:$0xff]   ;;  %v3545_v17 = vld [vmem:[%s4844_s1 + $0x1d8] sm:$0xff]   ;;  %v3549_v21 = vld [vmem:[%s4844_s1 + $0x1d0] sm:$0xff]   ;;  %s3886_s27 = scalar_lea.vmem %s4843_s0, %s3518_s16 }
  0x11   : > { %v3542_v14 = vld [vmem:[%s4844_s1 + $0x120] sm:$0xff]   ;;  %v3546_v18 = vld [vmem:[%s4844_s1 + $0x118] sm:$0xff]   ;;  %v3550_v22 = vld [vmem:[%s4844_s1 + $0x110] sm:$0xff]   ;;  %s4827_s9 = scalar_lea.vmem %s4846_s3, %s3519_s6 }
  0x12   : > { %3153 = vmatpush3.bf16.msra.mxu0 %v3534_v6  ;;  %v3543_v15 = vld [vmem:[%s4844_s1 + $0x1a0] sm:$0xff]   ;;  %v3547_v19 = vld [vmem:[%s4844_s1 + $0x198] sm:$0xff]   ;;  %v3551_v23 = vld [vmem:[%s4844_s1 + $0x190] sm:$0xff]  }
  0x13   : > { %3199 = vmatpush3.bf16.msra.mxu1 %v3535_v7  ;;  %3154 = vmatprep.subr.bf16.mxu0 %v3536_v8  ;;  %v3552_v24 = vld [vmem:[%s4844_s1 + $0x148] sm:$0xff]   ;;  %v3556_v28 = vld [vmem:[%s4844_s1 + $0x140] sm:$0xff]   ;;  %v3896_v33 = vld [vmem:[%s3886_s27 + $0x10] sm:$0xff] }
  0x14   : > { %3200 = vmatprep.subr.bf16.mxu1 %v3537_v9  ;;  %v3553_v25 = vld [vmem:[%s4844_s1 + $0x1c8] sm:$0xff]   ;;  %v3557_v29 = vld [vmem:[%s4844_s1 + $0x1c0] sm:$0xff]   ;;  %v3902_v35 = vld [vmem:[%s3886_s27 + $0x30] sm:$0xff] }
  0x15   : > { %v3554_v26 = vld [vmem:[%s4844_s1 + $0x108] sm:$0xff]   ;;  %v3558_v30 = vld [vmem:[%s4844_s1 + $0x100] sm:$0xff]   ;;  %v3909_v38 = vld [vmem:[%s3886_s27 + $0x18] sm:$0xff] }
  0x16   : > { %3155 = vmatpush3.bf16.msra.mxu0 %v3538_v10  ;;  %v3555_v27 = vld [vmem:[%s4844_s1 + $0x188] sm:$0xff]   ;;  %v3559_v31 = vld [vmem:[%s4844_s1 + $0x180] sm:$0xff]   ;;  %v3922_v42 = vld [vmem:[%s3886_s27 + $0x38] sm:$0xff] }
  0x17   : > { %3201 = vmatpush3.bf16.msra.mxu1 %v3539_v11  ;;  %3156 = vmatprep.subr.bf16.mxu0 %v3540_v12  ;;  %v172_v32 = vld [vmem:[%s3886_s27] sm:$0xff]  ;;  %v173_v37 = vld [vmem:[%s3886_s27 + $0x8] sm:$0xff]  ;;  %v3568_v50 = vld [vmem:[%s4844_s1 + $0x78] sm:$0xff]  }
  0x18   : > { %3202 = vmatprep.subr.bf16.mxu1 %v3541_v13  ;;  %v3899_v34 = vld [vmem:[%s3886_s27 + $0x20] sm:$0xff]  ;;  %v3905_v36 = vcombine.high %v172_v32, %v3896_v33  ;;  %v3912_v39 = vcombine.low %v172_v32, %v3896_v33  ;;  %v3919_v41 = vld [vmem:[%s3886_s27 + $0x28] sm:$0xff]  ;;  %v3925_v43 = vcombine.high %v173_v37, %v3909_v38  ;;  %v3932_v45 = vcombine.low %v173_v37, %v3909_v38  ;;  %v3569_v59 = vld [vmem:[%s4844_s1 + $0xf8] sm:$0xff]  }
  0x19   : > { %v3916_v40 = vcombine.high %v3899_v34, %v3902_v35  ;;  %v3929_v44 = vcombine.low %v3899_v34, %v3902_v35  ;;  %v3938_v48 = vcombine.high %v3919_v41, %v3922_v42  ;;  %v3952_v58 = vcombine.low %v3919_v41, %v3922_v42  ;;  %v3570_v7 = vld [vmem:[%s4844_s1 + $0x38] sm:$0xff]   ;;  %v3572_v10 = vld [vmem:[%s4844_s1 + $0x70] sm:$0xff]  }
  0x1a   : > { %3157 = vmatpush3.bf16.msra.mxu0 %v3542_v14  ;;  %v427_v46 = vshrl.u32 %v3905_v36, 16  ;;  %v429_v47 = vshll.u32 %v3905_v36, 16  ;;  %v415_v49 = vshrl.u32 %v3912_v39, 16  ;;  %v451_v52 = vshrl.u32 %v3925_v43, 16  ;;  %v3571_v14 = vld [vmem:[%s4844_s1 + $0xb8] sm:$0xff]  }
  0x1b   : > { %3203 = vmatpush3.bf16.msra.mxu1 %v3543_v15  ;;  %3158 = vmatprep.subr.bf16.mxu0 %v3544_v16  ;;  %v434_v51 = vshll.u32 %v3916_v40, 16  ;;  %v453_v53 = vshll.u32 %v3925_v43, 16  ;;  %v417_v54 = vshll.u32 %v3912_v39, 16  ;;  %v458_v56 = vshll.u32 %v3938_v48, 16  ;;  %v3573_v16 = vld [vmem:[%s4844_s1 + $0xf0] sm:$0xff]  }
  0x1c   : > { %3204 = vmatprep.subr.bf16.mxu1 %v3545_v17  ;;  %v431_v55 = vrot.slane %v429_v47, 1  ;;  %v422_v57 = vshll.u32 %v3929_v44, 16  ;;  %v439_v63 = vshrl.u32 %v3932_v45, 16  ;;  %v441_v3 = vshll.u32 %v3932_v45, 16 }
  0x1d   : > { %v436_v60 = vrot.slane %v434_v51, 1  ;;  %v455_v61 = vrot.slane %v453_v53, 1  ;;  %v419_v62 = vrot.slane %v417_v54, 1  ;;  %v460_v1 = vrot.slane %v458_v56, 1  ;;  %v3582_v53 = vld [vmem:[%s4844_s1 + $0x28] sm:$0xff]  }
  0x1e   : > { %3159 = vmatpush3.bf16.msra.mxu0 %v3546_v18  ;;  %v432_v0 = vor.u32 %v431_v55, %v427_v46  ;;  %v424_v2 = vrot.slane %v422_v57, 1  ;;  %v446_v6 = vshll.u32 %v3952_v58, 16  ;;  %v443_v9 = vrot.slane %v441_v3, 1  ;;  %v3574_v18 = vld [vmem:[%s4844_s1 + $0x30] sm:$0xff]  }
  0x1f   : > { %3205 = vmatpush3.bf16.msra.mxu1 %v3547_v19  ;;  %3160 = vmatprep.subr.bf16.mxu0 %v3548_v20  ;;  %v456_v4 = vor.u32 %v455_v61, %v451_v52  ;;  %v420_v5 = vor.u32 %v419_v62, %v415_v49  ;;  %v470_v17 = vshrl.u32 %v3916_v40, 16  ;;  %v486_v19 = vshrl.u32 %v3938_v48, 16  ;;  %v3580_v49 = vld [vmem:[%s4844_s1 + $0x68] sm:$0xff]  }
  0x20   : > { %3206 = vmatprep.subr.bf16.mxu1 %v3549_v21  ;;  %v437_v8 = vsel %vm413_vm0, %v432_v0, %v436_v60  ;;  %v448_v13 = vrot.slane %v446_v6, 1  ;;  %v444_v15 = vor.u32 %v443_v9, %v439_v63  ;;  %v3575_v21 = vld [vmem:[%s4844_s1 + $0xb0] sm:$0xff]   ;;  %v3581_v52 = vld [vmem:[%s4844_s1 + $0xe8] sm:$0xff]   ;;  %v184_v63 = vld [vmem:[%s3886_s27 + $0x60] sm:$0xff] }
  0x21   : > { %834 = vmatprep.mubr.bf16.mxu0 %v437_v8  ;;  %v461_v11 = vsel %vm413_vm0, %v456_v4, %v460_v1  ;;  %v425_v12 = vsel %vm413_vm0, %v420_v5, %v424_v2  ;;  %v488_v37 = vor.u32 %v486_v19, %v460_v1  ;;  %v185_v4 = vld [vmem:[%s3886_s27 + $0x68] sm:$0xff]  ;;  %v4041_v5 = vld [vmem:[%s3886_s27 + $0x78] sm:$0xff] }
  0x22   : > { %3161 = vmatpush3.bf16.msra.mxu0 %v3550_v22  ;;  %907 = vmatprep.mubr.bf16.mxu1 %v461_v11  ;;  %v449_v20 = vsel %vm413_vm0, %v444_v15, %v448_v13  ;;  %v180_v22 = vld [vmem:[%s3886_s27 + $0x40] sm:$0xff] }
  0x23   : > { %3207 = vmatpush3.bf16.msra.mxu1 %v3551_v23  ;;  %3162 = vmatprep.subr.bf16.mxu0 %v3552_v24  ;;  %v3986_v23 = vld [vmem:[%s3886_s27 + $0x50] sm:$0xff]  ;;  %v181_v24 = vld [vmem:[%s3886_s27 + $0x48] sm:$0xff]  ;;  %v4021_v54 = vcombine.high %v3902_v35, %v180_v22  ;;  %v3587_v15 = vld [vmem:[%s4844_s1 + $0xe0] sm:$0xff]  }
  0x24   : > { %3208 = vmatprep.subr.bf16.mxu1 %v3553_v25  ;;  %v462_v25 = vshrl.u32 %v3929_v44, 16  ;;  %v4024_v55 = vcombine.low %v3922_v42, %v181_v24 }
  0x26   : > { %3163 = vmatpush3.bf16.msra.mxu0 %v3554_v26  ;;  %v478_v26 = vshrl.u32 %v3952_v58, 16  ;;  %v464_v46 = vor.u32 %v462_v25, %v424_v2  ;;  %v4036_v2 = vld [vmem:[%s3886_s27 + $0x70] sm:$0xff]  ;;  %v3591_v25 = vld [vmem:[%s4844_s1 + $0xa0] sm:$0xff]  }
  0x27   : > { %3209 = vmatpush3.bf16.msra.mxu1 %v3555_v27  ;;  %3164 = vmatprep.subr.bf16.mxu0 %v3556_v28  ;;  %v3992_v27 = vcombine.high %v180_v22, %v3986_v23  ;;  %v472_v28 = vor.u32 %v470_v17, %v436_v60  ;;  %v4029_v60 = vcombine.high %v3922_v42, %v181_v24 }
  0x28   : > { %3210 = vmatprep.subr.bf16.mxu1 %v3557_v29  ;;  %v3995_v29 = vld [vmem:[%s3886_s27 + $0x58] sm:$0xff]  ;;  %v480_v57 = vor.u32 %v478_v26, %v448_v13  ;;  %v4044_v42 = vcombine.high %v3986_v23, %v184_v63  ;;  %v4049_v8 = vcombine.high %v184_v63, %v4036_v2 }
  0x29   : > { %v4004_v32 = vcombine.high %v181_v24, %v3995_v29  ;;  %v4007_v47 = vcombine.low %v181_v24, %v3995_v29  ;;  %v502_v3 = vshrl.u32 %v3992_v27, 16  ;;  %v3590_v24 = vld [vmem:[%s4844_s1 + $0x20] sm:$0xff]   ;;  %v4080_v26 = vcombine.high %v3995_v29, %v185_v4 }
  0x2a   : > { %3165 = vmatpush3.bf16.msra.mxu0 %v3558_v30  ;;  %v3998_v30 = vcombine.low %v180_v22, %v3986_v23 }
  0x2b   : > { %3211 = vmatpush3.bf16.msra.mxu1 %v3559_v31  ;;  %3242 = vmatprep.subr.bf16.mxu0 %v3568_v50  ;;  %v4001_v31 = vcombine.low %v3902_v35, %v180_v22  ;;  %v474_v50 = vshll.u32 %v3992_v27, 16  ;;  %v490_v56 = vshll.u32 %v4004_v32, 16  ;;  %v3583_v35 = vld [vmem:[%s4844_s1 + $0xa8] sm:$0xff]   ;;  %v518_v9 = vshrl.u32 %v4004_v32, 16 }
  0x2c   : > { %3288 = vmatprep.subr.bf16.mxu1 %v3569_v59  ;;  %v466_v51 = vshll.u32 %v3998_v30, 16  ;;  %v482_v59 = vshll.u32 %v4007_v47, 16  ;;  %v494_v19 = vshrl.u32 %v3998_v30, 16  ;;  %v510_v22 = vshrl.u32 %v4007_v47, 16 }
  0x2d   : > { %835 = vmatmul.mubr.bf16.vlgmr.msra.gmra.mxu0 %v425_v12  ;;  %v476_v61 = vrot.slane %v474_v50, 1  ;;  %v492_v0 = vrot.slane %v490_v56, 1  ;;  %v3593_v56 = vld [vmem:[%s4844_s1 + $0xd8] sm:$0xff]  }
  0x2e   : > { %3243 = vmatpush3.bf16.msra.mxu0 %v3570_v7  ;;  %908 = vmatmul.mubr.bf16.vlgmr.msra.gmra.mxu1 %v449_v20  ;;  %v468_v62 = vrot.slane %v466_v51, 1  ;;  %v484_v1 = vrot.slane %v482_v59, 1 }
  0x2f   : > { %3244 = vmatprep.subr.bf16.mxu0 %v3572_v10  ;;  %3289 = vmatpush3.bf16.msra.mxu1 %v3571_v14  ;;  %v477_v6 = vsel %vm413_vm0, %v472_v28, %v476_v61  ;;  %v3586_v10 = vld [vmem:[%s4844_s1 + $0x60] sm:$0xff]   ;;  %v493_v11 = vsel %vm413_vm0, %v488_v37, %v492_v0  ;;  %v504_v13 = vor.u32 %v502_v3, %v476_v61  ;;  %v3594_v61 = vld [vmem:[%s4844_s1 + $0x18] sm:$0xff]  }
  0x30   : > { %3290 = vmatprep.subr.bf16.mxu1 %v3573_v16  ;;  %v469_v7 = vsel %vm413_vm0, %v464_v46, %v468_v62  ;;  %842 = vmatprep.mubr.bf16.mxu0 %v477_v6  ;;  %v485_v12 = vsel %vm413_vm0, %v480_v57, %v484_v1  ;;  %v4058_v14 = vcombine.high %v185_v4, %v4041_v5  ;;  %v506_v16 = vshll.u32 %v4049_v8, 16  ;;  %v189_v6 = vld [vmem:[%s3886_s27 + $0x88] sm:$0xff] }
  0x31   : > { %915 = vmatprep.mubr.bf16.mxu1 %v493_v11  ;;  %v520_v17 = vor.u32 %v518_v9, %v492_v0  ;;  %v496_v37 = vor.u32 %v494_v19, %v468_v62  ;;  %v512_v51 = vor.u32 %v510_v22, %v484_v1  ;;  %v4094_v57 = vcombine.low %v3995_v29, %v185_v4  ;;  %v3595_v29 = vld [vmem:[%s4844_s1 + $0x98] sm:$0xff]   ;;  %v188_v0 = vld [vmem:[%s3886_s27 + $0x80] sm:$0xff] }
  0x32   : > { %3245 = vmatpush3.bf16.msra.mxu0 %v3574_v18  ;;  %v4065_v18 = vcombine.low %v184_v63, %v4036_v2  ;;  %v522_v20 = vshll.u32 %v4058_v14, 16  ;;  %v508_v28 = vrot.slane %v506_v16, 1  ;;  %v534_v1 = vshrl.u32 %v4049_v8, 16 }
  0x33   : > { %3246 = vmatprep.subr.bf16.mxu0 %v3580_v49  ;;  %3291 = vmatpush3.bf16.msra.mxu1 %v3575_v21  ;;  %v4070_v21 = vcombine.low %v185_v4, %v4041_v5  ;;  %v4084_v49 = vcombine.low %v3986_v23, %v184_v63  ;;  %v4109_v4 = vld [vmem:[%s3886_s27 + $0x90] sm:$0xff]  ;;  %v550_v9 = vshrl.u32 %v4058_v14, 16 }
  0x34   : > { %3292 = vmatprep.subr.bf16.mxu1 %v3581_v52  ;;  %v498_v46 = vshll.u32 %v4065_v18, 16  ;;  %v524_v50 = vrot.slane %v522_v20, 1  ;;  %v509_v23 = vsel %vm413_vm0, %v504_v13, %v508_v28  ;;  %v536_v13 = vor.u32 %v534_v1, %v508_v28  ;;  %v3605_v1 = vld [vmem:[%s4844_s1 + $0xc8] sm:$0xff]  }
  0x35   : > { %843 = vmatmul.mubr.bf16.gmra.mxu0 %v469_v7  ;;  %v514_v52 = vshll.u32 %v4070_v21, 16  ;;  %v4113_v7 = vld [vmem:[%s3886_s27 + $0x98] sm:$0xff]  ;;  %v542_v11 = vshrl.u32 %v4070_v21, 16  ;;  %v4125_v16 = vcombine.low %v188_v0, %v4109_v4 }
  0x36   : > { %3247 = vmatpush3.bf16.msra.mxu0 %v3582_v53  ;;  %916 = vmatmul.mubr.bf16.gmra.mxu1 %v485_v12  ;;  %v3592_v53 = vld [vmem:[%s4844_s1 + $0x58] sm:$0xff]   ;;  %v500_v59 = vrot.slane %v498_v46, 1  ;;  %v525_v62 = vsel %vm413_vm0, %v520_v17, %v524_v50  ;;  %v4119_v12 = vcombine.high %v188_v0, %v4109_v4  ;;  %v3600_v17 = vld [vmem:[%s4844_s1 + $0x50] sm:$0xff]   ;;  %v552_v19 = vor.u32 %v550_v9, %v524_v50 }
  0x37   : > { %3248 = vmatprep.subr.bf16.mxu0 %v3586_v10  ;;  %3293 = vmatpush3.bf16.msra.mxu1 %v3583_v35  ;;  %v516_v35 = vrot.slane %v514_v52, 1  ;;  %v526_v10 = vshrl.u32 %v4065_v18, 16  ;;  %v4131_v22 = vcombine.low %v189_v6, %v4113_v7  ;;  %v530_v46 = vshll.u32 %v4125_v16, 16  ;;  %v3602_v50 = vld [vmem:[%s4844_s1 + $0x10] sm:$0xff]  }
  0x38   : > { %3294 = vmatprep.subr.bf16.mxu1 %v3587_v15  ;;  %850 = vmatprep.mubr.bf16.mxu0 %v509_v23  ;;  %v501_v63 = vsel %vm413_vm0, %v496_v37, %v500_v59  ;;  %v4122_v15 = vcombine.high %v189_v6, %v4113_v7  ;;  %v538_v28 = vshll.u32 %v4119_v12, 16  ;;  %v4153_v23 = vcombine.low %v4036_v2, %v188_v0 }
  0x39   : > { %923 = vmatprep.mubr.bf16.mxu1 %v525_v62  ;;  %v517_v3 = vsel %vm413_vm0, %v512_v51, %v516_v35  ;;  %v528_v20 = vor.u32 %v526_v10, %v500_v59  ;;  %v4143_v51 = vcombine.high %v4036_v2, %v188_v0  ;;  %v546_v52 = vshll.u32 %v4131_v22, 16 }
  0x3a   : > { %3249 = vmatpush3.bf16.msra.mxu0 %v3590_v24  ;;  %v544_v24 = vor.u32 %v542_v11, %v516_v35  ;;  %v554_v37 = vshll.u32 %v4122_v15, 16  ;;  %v4156_v59 = vcombine.low %v4041_v5, %v189_v6  ;;  %v532_v35 = vrot.slane %v530_v46, 1  ;;  %v257_v11 = vld [vmem:[%s3886_s27 + $0xa8] sm:$0x11] }
  0x3b   : > { %3250 = vmatprep.subr.bf16.mxu0 %v3592_v53  ;;  %3295 = vmatpush3.bf16.msra.mxu1 %v3591_v25  ;;  %v3601_v25 = vld [vmem:[%s4844_s1 + $0xd0] sm:$0xff]   ;;  %v566_v10 = vshrl.u32 %v4119_v12, 16 }
  0x3c   : > { %3296 = vmatprep.subr.bf16.mxu1 %v3593_v56  ;;  %v3603_v53 = vld [vmem:[%s4844_s1 + $0x90] sm:$0xff]   ;;  %v4150_v56 = vcombine.high %v4041_v5, %v189_v6  ;;  %v556_v62 = vrot.slane %v554_v37, 1  ;;  %v533_v5 = vsel %vm413_vm0, %v528_v20, %v532_v35 }
  0x3d   : > { %851 = vmatmul.mubr.bf16.gmra.mxu0 %v501_v63  ;;  %v548_v63 = vrot.slane %v546_v52, 1  ;;  %v574_v52 = vshrl.u32 %v4131_v22, 16 }
  0x3e   : > { %3251 = vmatpush3.bf16.msra.mxu0 %v3594_v61  ;;  %924 = vmatmul.mubr.bf16.gmra.mxu1 %v517_v3  ;;  %v540_v61 = vrot.slane %v538_v28, 1  ;;  %v557_v0 = vsel %vm413_vm0, %v552_v19, %v556_v62  ;;  %v256_v3 = vld [vmem:[%s3886_s27 + $0xa0] sm:$0x11]  ;;  %v3608_v19 = vld [vmem:[%s4844_s1 + $0x8] sm:$0xff]   ;;  %v2802_v28 = vcombine.low %v257_v11, %v257_v11 }
  0x3f   : > { %3297 = vmatpush3.bf16.msra.mxu1 %v3595_v29  ;;  %3252 = vmatprep.subr.bf16.mxu0 %v3600_v17  ;;  %v3604_v29 = vld [vmem:[%s4844_s1 + $0x48] sm:$0xff]   ;;  %v549_v6 = vsel %vm413_vm0, %v544_v24, %v548_v63  ;;  %v2801_v9 = vcombine.high %v256_v3, %v256_v3  ;;  %v582_v17 = vshrl.u32 %v4122_v15, 16  ;;  %v2800_v20 = vcombine.low %v256_v3, %v256_v3  ;;  %v3614_v3 = vld [vmem:[%s4844_s1] sm:$0xff]  }
  0x40   : > { %3298 = vmatprep.subr.bf16.mxu1 %v3601_v25  ;;  %v541_v2 = vsel %vm413_vm0, %v536_v13, %v540_v61  ;;  %931 = vmatprep.mubr.bf16.mxu1 %v557_v0  ;;  %v2803_v13 = vcombine.high %v257_v11, %v257_v11  ;;  %v558_v25 = vshrl.u32 %v4125_v16, 16  ;;  %v568_v37 = vor.u32 %v566_v10, %v540_v61  ;;  %v3613_v61 = vld [vmem:[%s4844_s1 + $0xc0] sm:$0xff]  }
  0x41   : > { %858 = vmatprep.mubr.bf16.mxu0 %v541_v2  ;;  %v570_v24 = vshll.u32 %v2801_v9, 16  ;;  %v584_v46 = vor.u32 %v582_v17, %v556_v62  ;;  %v562_v2 = vshll.u32 %v2800_v20, 16  ;;  %v578_v0 = vshll.u32 %v2802_v28, 16  ;;  %v3616_v20 = vld [vmem:[%s4844_s1 + $0x278] sm:$0xff]  }
  0x42   : > { %3253 = vmatpush3.bf16.msra.mxu0 %v3602_v50  ;;  %v3609_v50 = vld [vmem:[%s4844_s1 + $0x88] sm:$0xff]   ;;  %v2933_v11 = vcombine.high %v3896_v33, %v3899_v34  ;;  %v3617_v28 = vld [vmem:[%s4844_s1 + $0x2f8] sm:$0xff]  }
  0x43   : > { %3299 = vmatpush3.bf16.msra.mxu1 %v3603_v53  ;;  %3254 = vmatprep.subr.bf16.mxu0 %v3604_v29  ;;  %v3612_v53 = vld [vmem:[%s4844_s1 + $0x40] sm:$0xff]   ;;  %v586_v29 = vshll.u32 %v2803_v13, 16  ;;  %v572_v62 = vrot.slane %v570_v24, 1  ;;  %v564_v9 = vrot.slane %v562_v2, 1  ;;  %v580_v10 = vrot.slane %v578_v0, 1  ;;  %v3621_v0 = vld [vmem:[%s4844_s1 + $0x2f0] sm:$0xff]  }
  0x44   : > { %3300 = vmatprep.subr.bf16.mxu1 %v3605_v1  ;;  %v560_v1 = vor.u32 %v558_v25, %v532_v35  ;;  %v3615_v35 = vld [vmem:[%s4844_s1 + $0x80] sm:$0xff]   ;;  %v1496_v25 = vshrl.u32 %v2933_v11, 16  ;;  %v1503_v24 = vshll.u32 %v4021_v54, 16 }
  0x45   : > { %859 = vmatmul.mubr.bf16.gmra.mxu0 %v533_v5  ;;  %v576_v5 = vor.u32 %v574_v52, %v548_v63  ;;  %v573_v17 = vsel %vm413_vm0, %v568_v37, %v572_v62  ;;  %v1498_v37 = vshll.u32 %v2933_v11, 16  ;;  %v3618_v52 = vld [vmem:[%s4844_s1 + $0x238] sm:$0xff]  }
  0x46   : > { %932 = vmatmul.mubr.bf16.gmra.mxu1 %v549_v6  ;;  %3255 = vmatpush3.bf16.msra.mxu0 %v3608_v19  ;;  %v588_v6 = vrot.slane %v586_v29, 1  ;;  %v565_v13 = vsel %vm413_vm0, %v560_v1, %v564_v9  ;;  %v3620_v29 = vld [vmem:[%s4844_s1 + $0x270] sm:$0xff]  }
  0x47   : > { %3301 = vmatpush3.bf16.msra.mxu1 %v3609_v50  ;;  %3256 = vmatprep.subr.bf16.mxu0 %v3612_v53  ;;  %v581_v19 = vsel %vm413_vm0, %v576_v5, %v580_v10  ;;  %v1500_v50 = vrot.slane %v1498_v37, 1  ;;  %v4212_v53 = vrot.slane %v1503_v24, 1  ;;  %v1527_v5 = vshll.u32 %v4029_v60, 16  ;;  %v3623_v9 = vld [vmem:[%s4844_s1 + $0x2b0] sm:$0xff]   ;;  %v3625_v10 = vld [vmem:[%s4844_s1 + $0x2e8] sm:$0xff]   ;;  %v3630_v37 = vld [vmem:[%s4844_s1 + $0x220] sm:$0xff]  }
  0x48   : > { %3302 = vmatprep.subr.bf16.mxu1 %v3613_v61  ;;  %866 = vmatprep.mubr.bf16.mxu0 %v573_v17  ;;  %v589_v63 = vsel %vm413_vm0, %v584_v46, %v588_v6  ;;  %v2935_v46 = vcombine.high %v3909_v38, %v3919_v41  ;;  %v2932_v61 = vcombine.low %v3896_v33, %v3899_v34  ;;  %v3624_v33 = vld [vmem:[%s4844_s1 + $0x268] sm:$0xff]  }
  0x49   : > { %939 = vmatprep.mubr.bf16.mxu1 %v589_v63  ;;  %v1501_v1 = vor.u32 %v1500_v50, %v1496_v25  ;;  %v1529_v34 = vrot.slane %v1527_v5, 1  ;;  %v3626_v17 = vld [vmem:[%s4844_s1 + $0x228] sm:$0xff]   ;;  %v3631_v50 = vld [vmem:[%s4844_s1 + $0x2a0] sm:$0xff]   ;;  %v3636_v5 = vld [vmem:[%s4844_s1 + $0x250] sm:$0xff]  }
  0x4a   : > { %3257 = vmatpush3.bf16.msra.mxu0 %v3614_v3  ;;  %v1520_v2 = vshrl.u32 %v2935_v46, 16  ;;  %v3622_v3 = vld [vmem:[%s4844_s1 + $0x230] sm:$0xff]   ;;  %v1486_v11 = vshll.u32 %v2932_v61, 16 }
  0x4b   : > { %3303 = vmatpush3.bf16.msra.mxu1 %v3615_v35  ;;  %3334 = vmatprep.subr.bf16.mxu0 %v3616_v20  ;;  %v4227_v62 = vsel %vm413_vm0, %v1501_v1, %v4212_v53  ;;  %v1539_v1 = vshrl.u32 %v4021_v54, 16 }
  0x4c   : > { %3380 = vmatprep.subr.bf16.mxu1 %v3617_v28  ;;  %v1488_v20 = vrot.slane %v1486_v11, 1 }
  0x4d   : > { %867 = vmatmul.mubr.bf16.gmra.mxu0 %v565_v13  ;;  %v1491_v13 = vshll.u32 %v4001_v31, 16 }
  0x4e   : > { %940 = vmatmul.mubr.bf16.gmra.mxu1 %v581_v19  ;;  %1192 = vmatprep.mubr.bf16.mxu0 %v3905_v36  ;;  %v3619_v36 = vld [vmem:[%s4844_s1 + $0x2b8] sm:$0xff]   ;;  %v3627_v19 = vld [vmem:[%s4844_s1 + $0x2a8] sm:$0xff]  }
  0x4f   : > { %1265 = vmatprep.mubr.bf16.mxu1 %v3925_v43  ;;  %v1522_v43 = vshll.u32 %v2935_v46, 16  ;;  %v1493_v25 = vrot.slane %v1491_v13, 1  ;;  %v1515_v46 = vshll.u32 %v4024_v55, 16  ;;  %v1547_v13 = vshrl.u32 %v4024_v55, 16 }
  0x51   : > { %v1524_v6 = vrot.slane %v1522_v43, 1 }
  0x53   : > { %v1525_v35 = vor.u32 %v1524_v6, %v1520_v2  ;;  %v1543_v2 = vshll.u32 %v4044_v42, 16  ;;  %v3637_v6 = vld [vmem:[%s4844_s1 + $0x2d0] sm:$0xff]  }
  0x55   : > { %1193 = vmatmul.mubr.bf16.vlgmr.msra.gmra.mxu0 %v3912_v39  ;;  %v1484_v39 = vshrl.u32 %v2932_v61, 16  ;;  %v4251_v63 = vsel %vm413_vm0, %v1525_v35, %v1529_v34  ;;  %v1555_v61 = vshrl.u32 %v4029_v60, 16  ;;  %v1531_v35 = vshrl.u32 %v4001_v31, 16 }
  0x56   : > { %1266 = vmatmul.mubr.bf16.vlgmr.msra.gmra.mxu1 %v3932_v45  ;;  %3335 = vmatpush3.bf16.msra.mxu0 %v3618_v52  ;;  %v2934_v45 = vcombine.low %v3909_v38, %v3919_v41  ;;  %v3629_v38 = vld [vmem:[%s4844_s1 + $0x2e0] sm:$0xff]  }
  0x57   : > { %3381 = vmatpush3.bf16.msra.mxu1 %v3619_v36  ;;  %3336 = vmatprep.subr.bf16.mxu0 %v3620_v29  ;;  %v1489_v41 = vor.u32 %v1488_v20, %v1484_v39  ;;  %v1517_v36 = vrot.slane %v1515_v46, 1  ;;  %v1533_v11 = vor.u32 %v1531_v35, %v1493_v25  ;;  %v1575_v46 = vshll.u32 %v4143_v51, 16  ;;  %v3662_v35 = vld [vmem:[%s4844_s1 + $0x330] sm:$0xff]  }
  0x58   : > { %3382 = vmatprep.subr.bf16.mxu1 %v3621_v0  ;;  %1200 = vmatprep.mubr.bf16.mxu0 %v3916_v40  ;;  %v3628_v40 = vld [vmem:[%s4844_s1 + $0x260] sm:$0xff]   ;;  %v1510_v28 = vshll.u32 %v2934_v45, 16  ;;  %v1541_v0 = vor.u32 %v1539_v1, %v4212_v53  ;;  %v3638_v53 = vld [vmem:[%s4844_s1 + $0x210] sm:$0xff]   ;;  %v1563_v1 = vshrl.u32 %v4084_v49, 16 }
  0x59   : > { %1273 = vmatprep.mubr.bf16.mxu1 %v3938_v48  ;;  %v1508_v48 = vshrl.u32 %v2934_v45, 16  ;;  %v4269_v24 = vsel %vm413_vm0, %v1489_v41, %v1493_v25  ;;  %v1549_v20 = vor.u32 %v1547_v13, %v1517_v36  ;;  %v3644_v41 = vld [vmem:[%s4844_s1 + $0x240] sm:$0xff]   ;;  %v2106_v13 = vrot.slane %v4001_v31, 1 }
  0x5a   : > { %3337 = vmatpush3.bf16.msra.mxu0 %v3622_v3  ;;  %v1512_v52 = vrot.slane %v1510_v28, 1  ;;  %v1545_v3 = vrot.slane %v1543_v2, 1  ;;  %v3645_v28 = vld [vmem:[%s4844_s1 + $0x2c0] sm:$0xff]  }
  0x5b   : > { %3383 = vmatpush3.bf16.msra.mxu1 %v3623_v9  ;;  %3338 = vmatprep.subr.bf16.mxu0 %v3624_v33  ;;  %v1557_v9 = vor.u32 %v1555_v61, %v1529_v34  ;;  %v1559_v33 = vshll.u32 %v4080_v26, 16  ;;  %v3639_v34 = vld [vmem:[%s4844_s1 + $0x290] sm:$0xff]   ;;  %v1579_v61 = vshrl.u32 %v4094_v57, 16 }
  0x5c   : > { %3384 = vmatprep.subr.bf16.mxu1 %v3625_v10  ;;  %v1513_v29 = vor.u32 %v1512_v52, %v1508_v48  ;;  %v4309_v10 = vsel %vm413_vm0, %v1541_v0, %v1545_v3 }
  0x5d   : > { %1201 = vmatmul.mubr.bf16.gmra.mxu0 %v3929_v44  ;;  %v3632_v44 = vld [vmem:[%s4844_s1 + $0x258] sm:$0xff]   ;;  %v1561_v39 = vrot.slane %v1559_v33, 1 }
  0x5e   : > { %1274 = vmatmul.mubr.bf16.gmra.mxu1 %v3952_v58  ;;  %3339 = vmatpush3.bf16.msra.mxu0 %v3626_v17  ;;  %v3633_v58 = vld [vmem:[%s4844_s1 + $0x2d8] sm:$0xff]   ;;  %v4293_v43 = vsel %vm413_vm0, %v1513_v29, %v1517_v36  ;;  %v1535_v17 = vshll.u32 %v4084_v49, 16  ;;  %v4361_v36 = vrot.slane %v1575_v46, 1  ;;  %v1603_v46 = vshrl.u32 %v4143_v51, 16 }
  0x5f   : > { %3385 = vmatpush3.bf16.msra.mxu1 %v3627_v19  ;;  %1208 = vmatprep.mubr.bf16.mxu0 %v3992_v27  ;;  %v3634_v27 = vld [vmem:[%s4844_s1 + $0x218] sm:$0xff]   ;;  %v4326_v45 = vsel %vm413_vm0, %v1557_v9, %v1561_v39  ;;  %v3642_v19 = vld [vmem:[%s4844_s1 + $0x208] sm:$0xff]  }
  0x60   : > { %1281 = vmatprep.mubr.bf16.mxu1 %v4004_v32  ;;  %3340 = vmatprep.subr.bf16.mxu0 %v3628_v40  ;;  %v3635_v32 = vld [vmem:[%s4844_s1 + $0x298] sm:$0xff]   ;;  %v3643_v40 = vld [vmem:[%s4844_s1 + $0x288] sm:$0xff]  }
  0x61   : > { %3386 = vmatprep.subr.bf16.mxu1 %v3629_v38  ;;  %v1571_v38 = vshrl.u32 %v4044_v42, 16 }
  0x62   : > { %3341 = vmatpush3.bf16.msra.mxu0 %v3630_v37 }
  0x63   : > { %3387 = vmatpush3.bf16.msra.mxu1 %v3631_v50  ;;  %3342 = vmatprep.subr.bf16.mxu0 %v3632_v44  ;;  %v1573_v37 = vor.u32 %v1571_v38, %v1545_v3  ;;  %v3646_v50 = vld [vmem:[%s4844_s1 + $0x200] sm:$0xff]  }
  0x64   : > { %3388 = vmatprep.subr.bf16.mxu1 %v3633_v58  ;;  %v3647_v44 = vld [vmem:[%s4844_s1 + $0x280] sm:$0xff]   ;;  %v1591_v58 = vshll.u32 %v4150_v56, 16 }
  0x65   : > { %1209 = vmatmul.mubr.bf16.gmra.mxu0 %v3998_v30  ;;  %v3640_v30 = vld [vmem:[%s4844_s1 + $0x248] sm:$0xff]   ;;  %v4372_v29 = vsel %vm413_vm0, %v1573_v37, %v4361_v36  ;;  %v3674_v37 = vld [vmem:[%s4844_s1 + $0x360] sm:$0xff]  }
  0x66   : > { %1282 = vmatmul.mubr.bf16.gmra.mxu1 %v4007_v47  ;;  %3343 = vmatpush3.bf16.msra.mxu0 %v3634_v27  ;;  %v3641_v47 = vld [vmem:[%s4844_s1 + $0x2c8] sm:$0xff]   ;;  %v4375_v27 = vrot.slane %v1591_v58, 1 }
  0x67   : > { %3389 = vmatpush3.bf16.msra.mxu1 %v3635_v32  ;;  %1216 = vmatprep.mubr.bf16.mxu0 %v4049_v8  ;;  %v1537_v8 = vrot.slane %v1535_v17, 1  ;;  %v1567_v32 = vshll.u32 %v4153_v23, 16  ;;  %v1325_v17 = vld [vmem:[%s3886_s27 + $0xa8] sm:$0xff] }
  0x68   : > { %1289 = vmatprep.mubr.bf16.mxu1 %v4058_v14  ;;  %3344 = vmatprep.subr.bf16.mxu0 %v3636_v5  ;;  %v1551_v14 = vshll.u32 %v4094_v57, 16  ;;  %v4494_v58 = vcombine.low %v4113_v7, %v1325_v17 }
  0x69   : > { %3390 = vmatprep.subr.bf16.mxu1 %v3637_v6  ;;  %v4337_v25 = vsel %vm413_vm0, %v1533_v11, %v1537_v8  ;;  %v1565_v2 = vor.u32 %v1563_v1, %v1537_v8  ;;  %v4384_v5 = vrot.slane %v1567_v32, 1  ;;  %v1583_v6 = vshll.u32 %v4156_v59, 16  ;;  %v3680_v1 = vld [vmem:[%s4844_s1 + $0x358] sm:$0xff]   ;;  %v1326_v32 = vld [vmem:[%s3886_s27 + $0xb0] sm:$0x11] }
  0x6a   : > { %3345 = vmatpush3.bf16.msra.mxu0 %v3638_v53  ;;  %v1553_v48 = vrot.slane %v1551_v14, 1  ;;  %v3661_v53 = vld [vmem:[%s4844_s1 + $0x3f0] sm:$0xff]   ;;  %v2109_v11 = vrot.slane %v4021_v54, 1  ;;  %v2119_v8 = vrot.slane %v4044_v42, 1  ;;  %v2117_v14 = vrot.slane %v4084_v49, 1 }
  0x6b   : > { %3391 = vmatpush3.bf16.msra.mxu1 %v3639_v34  ;;  %3346 = vmatprep.subr.bf16.mxu0 %v3640_v30  ;;  %v4392_v9 = vsel %vm413_vm0, %v1565_v2, %v4384_v5  ;;  %v4397_v33 = vrot.slane %v1583_v6, 1  ;;  %v3663_v34 = vld [vmem:[%s4844_s1 + $0x3b0] sm:$0xff]   ;;  %v3669_v30 = vld [vmem:[%s4844_s1 + $0x3e8] sm:$0xff]   ;;  %v1605_v6 = vor.u32 %v1603_v46, %v4361_v36  ;;  %v3683_v36 = vld [vmem:[%s4844_s1 + $0x398] sm:$0xff]  }
  0x6c   : > { %3392 = vmatprep.subr.bf16.mxu1 %v3641_v47  ;;  %v4354_v52 = vsel %vm413_vm0, %v1549_v20, %v1553_v48  ;;  %v1581_v3 = vor.u32 %v1579_v61, %v1553_v48  ;;  %v2115_v47 = vrot.slane %v4029_v60, 1  ;;  %v2112_v20 = vrot.slane %v4024_v55, 1  ;;  %v3671_v48 = vld [vmem:[%s4844_s1 + $0x3a8] sm:$0xff]  }
  0x6d   : > { %1217 = vmatmul.mubr.bf16.gmra.mxu0 %v4065_v18  ;;  %v1587_v18 = vshrl.u32 %v4080_v26, 16  ;;  %v4448_v38 = vsel %vm2104_vm1, %v2109_v11, %v2119_v8  ;;  %v4511_v61 = vcombine.high %v1326_v32, %v1326_v32 }
  0x6e   : > { %1290 = vmatmul.mubr.bf16.gmra.mxu1 %v4070_v21  ;;  %1224 = vmatprep.mubr.bf16.mxu0 %v4119_v12  ;;  %v3656_v21 = vld [vmem:[%s4844_s1 + $0x378] sm:$0xff]  }
  0x6f   : > { %1297 = vmatprep.mubr.bf16.mxu1 %v4122_v15  ;;  %3347 = vmatpush3.bf16.msra.mxu0 %v3642_v19  ;;  %v1589_v12 = vor.u32 %v1587_v18, %v1561_v39  ;;  %v3657_v15 = vld [vmem:[%s4844_s1 + $0x3f8] sm:$0xff]   ;;  %v3668_v39 = vld [vmem:[%s4844_s1 + $0x368] sm:$0xff]   ;;  %v2123_v19 = vrot.slane %v4080_v26, 1 }
  0x70   : > { %3393 = vmatpush3.bf16.msra.mxu1 %v3643_v40  ;;  %3348 = vmatprep.subr.bf16.mxu0 %v3644_v41  ;;  %v4441_v40 = vcombine.high %v4113_v7, %v1325_v17  ;;  %v2121_v41 = vrot.slane %v4094_v57, 1  ;;  %v3681_v7 = vld [vmem:[%s4844_s1 + $0x3d8] sm:$0xff]   ;;  %v3696_v26 = vld [vmem:[%s4844_s1 + $0x308] sm:$0xff]  }
  0x71   : > { %3394 = vmatprep.subr.bf16.mxu1 %v3645_v28  ;;  %v4380_v0 = vsel %vm413_vm0, %v1589_v12, %v4375_v27  ;;  %v4469_v28 = vsel %vm2104_vm1, %v2106_v13, %v2117_v14  ;;  %v1619_v12 = vshrl.u32 %v4150_v56, 16  ;;  %v3697_v57 = vld [vmem:[%s4844_s1 + $0x388] sm:$0xff]  }
  0x72   : > { %v4483_v18 = vsel %vm2104_vm1, %v2112_v20, %v2121_v41  ;;  %v1623_v2 = vshll.u32 %v4441_v40, 16  ;;  %v2139_v60 = vrot.slane %v4441_v40, 1 }
  0x73   : > { %3349 = vmatpush3.bf16.msra.mxu0 %v3646_v50 }
  0x74   : > { %3395 = vmatpush3.bf16.msra.mxu1 %v3647_v44  ;;  %3426 = vmatprep.subr.bf16.mxu0 %v3656_v21  ;;  %v3675_v44 = vld [vmem:[%s4844_s1 + $0x3e0] sm:$0xff]  }
  0x75   : > { %1225 = vmatmul.mubr.bf16.gmra.mxu0 %v4125_v16  ;;  %3472 = vmatprep.subr.bf16.mxu1 %v3657_v15  ;;  %v3658_v16 = vld [vmem:[%s4844_s1 + $0x338] sm:$0xff]   ;;  %v3678_v21 = vld [vmem:[%s4844_s1 + $0x320] sm:$0xff]  }
  0x76   : > { %1298 = vmatmul.mubr.bf16.gmra.mxu1 %v4131_v22  ;;  %1903 = vmatprep.mubr.bf16.mxu0 %v4227_v62  ;;  %v3659_v22 = vld [vmem:[%s4844_s1 + $0x3b8] sm:$0xff]   ;;  %v3660_v62 = vld [vmem:[%s4844_s1 + $0x370] sm:$0xff]   ;;  %v3679_v15 = vld [vmem:[%s4844_s1 + $0x3a0] sm:$0xff]  }
  0x77   : > { %1976 = vmatprep.mubr.bf16.mxu1 %v4251_v63  ;;  %v4407_v63 = vsel %vm413_vm0, %v1581_v3, %v4397_v33  ;;  %v1327_v3 = vld [vmem:[%s3886_s27 + $0xb8] sm:$0x11] }
  0x7d   : > { %1904 = vmatmul.mubr.bf16.vlgmr.msra.gmra.mxu0 %v4269_v24  ;;  %v1324_v24 = vld [vmem:[%s3886_s27 + $0xa0] sm:$0xff] }
  0x7e   : > { %1977 = vmatmul.mubr.bf16.vlgmr.msra.gmra.mxu1 %v4293_v43  ;;  %3427 = vmatpush3.bf16.msra.mxu0 %v3658_v16  ;;  %v4435_v43 = vcombine.high %v4109_v4, %v1324_v24  ;;  %v4476_v50 = vcombine.low %v4109_v4, %v1324_v24  ;;  %v1615_v16 = vshll.u32 %v4494_v58, 16 }
  0x7f   : > { %3473 = vmatpush3.bf16.msra.mxu1 %v3659_v22  ;;  %3428 = vmatprep.subr.bf16.mxu0 %v3660_v62  ;;  %v4517_v22 = vcombine.high %v1327_v3, %v1327_v3  ;;  %v1621_v62 = vor.u32 %v1619_v12, %v4375_v27  ;;  %v1639_v27 = vshll.u32 %v4511_v61, 16  ;;  %v4547_v12 = vcombine.low %v1326_v32, %v1326_v32 }
  0x80   : > { %3474 = vmatprep.subr.bf16.mxu1 %v3661_v53  ;;  %1911 = vmatprep.mubr.bf16.mxu0 %v4309_v10  ;;  %v4455_v10 = vsel %vm2104_vm1, %v2115_v47, %v2123_v19  ;;  %v1607_v4 = vshll.u32 %v4435_v43, 16  ;;  %v1625_v53 = vrot.slane %v1623_v2, 1  ;;  %v2127_v32 = vrot.slane %v4143_v51, 1 }
  0x81   : > { %1984 = vmatprep.mubr.bf16.mxu1 %v4326_v45  ;;  %v3670_v45 = vld [vmem:[%s4844_s1 + $0x328] sm:$0xff]   ;;  %v2135_v31 = vrot.slane %v4435_v43, 1 }
  0x82   : > { %3429 = vmatpush3.bf16.msra.mxu0 %v3662_v35  ;;  %v1595_v35 = vshrl.u32 %v4153_v23, 16  ;;  %v1626_v46 = vsel %vm413_vm0, %v1621_v62, %v1625_v53 }
  0x83   : > { %3475 = vmatpush3.bf16.msra.mxu1 %v3663_v34  ;;  %3430 = vmatprep.subr.bf16.mxu0 %v3668_v39  ;;  %v3688_v34 = vld [vmem:[%s4844_s1 + $0x350] sm:$0xff]   ;;  %v1635_v39 = vshrl.u32 %v4435_v43, 16  ;;  %v2136_v55 = vsel %vm2104_vm1, %v2127_v32, %v2135_v31  ;;  %v2143_v43 = vrot.slane %v4511_v61, 1 }
  0x84   : > { %3476 = vmatprep.subr.bf16.mxu1 %v3669_v30  ;;  %v1651_v30 = vshrl.u32 %v4441_v40, 16 }
  0x85   : > { %1912 = vmatmul.mubr.bf16.gmra.mxu0 %v4337_v25  ;;  %v1599_v25 = vshll.u32 %v4476_v50, 16  ;;  %v2144_v40 = vsel %vm2104_vm1, %v2135_v31, %v2143_v43 }
  0x86   : > { %1985 = vmatmul.mubr.bf16.gmra.mxu1 %v4354_v52  ;;  %3431 = vmatpush3.bf16.msra.mxu0 %v3670_v45  ;;  %v1609_v52 = vrot.slane %v1607_v4, 1  ;;  %v1617_v45 = vrot.slane %v1615_v16, 1  ;;  %v3690_v4 = vld [vmem:[%s4844_s1 + $0x310] sm:$0xff]   ;;  %v1653_v2 = vor.u32 %v1651_v30, %v1625_v53  ;;  %v2129_v16 = vrot.slane %v4156_v59, 1  ;;  %v2028_v53 = vld [vmem:[%s3886_s27 + $0x18] sm:$0xee] }
  0x87   : > { %3477 = vmatpush3.bf16.msra.mxu1 %v3671_v48  ;;  %1919 = vmatprep.mubr.bf16.mxu0 %v4372_v29  ;;  %v3682_v29 = vld [vmem:[%s4844_s1 + $0x318] sm:$0xff]   ;;  %v1601_v17 = vrot.slane %v1599_v25, 1  ;;  %v3689_v48 = vld [vmem:[%s4844_s1 + $0x3d0] sm:$0xff]   ;;  %v3749_v30 = vld [vmem:[%s3886_s27 + $0x28] sm:$0xff] }
  0x88   : > { %1992 = vmatprep.mubr.bf16.mxu1 %v4380_v0  ;;  %3432 = vmatprep.subr.bf16.mxu0 %v3674_v37  ;;  %v1611_v0 = vshrl.u32 %v4156_v59, 16  ;;  %v1610_v24 = vsel %vm413_vm0, %v1605_v6, %v1609_v52  ;;  %v1655_v37 = vshll.u32 %v4517_v22, 16  ;;  %v2027_v25 = vld [vmem:[%s3886_s27 + $0x10] sm:$0xee]  ;;  %v2125_v6 = vrot.slane %v4153_v23, 1 }
  0x89   : > { %3478 = vmatprep.subr.bf16.mxu1 %v3675_v44  ;;  %v1597_v44 = vor.u32 %v1595_v35, %v4384_v5  ;;  %v3691_v5 = vld [vmem:[%s4844_s1 + $0x390] sm:$0xff]   ;;  %v2128_v35 = vsel %vm2104_vm1, %v2119_v8, %v2127_v32  ;;  %v2130_v42 = vsel %vm2104_vm1, %v2121_v41, %v2129_v16  ;;  %v3700_v41 = vld [vmem:[%s4844_s1 + $0x340] sm:$0xff]  }
  0x8a   : > { %3433 = vmatpush3.bf16.msra.mxu0 %v3678_v21  ;;  %v1613_v21 = vor.u32 %v1611_v0, %v4397_v33  ;;  %v3693_v33 = vld [vmem:[%s4844_s1 + $0x3c8] sm:$0xff]   ;;  %v1631_v0 = vshll.u32 %v4547_v12, 16 }
  0x8b   : > { %3479 = vmatpush3.bf16.msra.mxu1 %v3679_v15  ;;  %3434 = vmatprep.subr.bf16.mxu0 %v3680_v1  ;;  %v4549_v15 = vcombine.low %v1327_v3, %v1327_v3  ;;  %v1641_v1 = vrot.slane %v1639_v27, 1  ;;  %v2131_v3 = vrot.slane %v4150_v56, 1 }
  0x8c   : > { %3480 = vmatprep.subr.bf16.mxu1 %v3681_v7  ;;  %v1657_v7 = vrot.slane %v1655_v37, 1  ;;  %v1618_v62 = vsel %vm413_vm0, %v1613_v21, %v1617_v45 }
  0x8d   : > { %1920 = vmatmul.mubr.bf16.gmra.mxu0 %v4392_v9  ;;  %v3692_v9 = vld [vmem:[%s4844_s1 + $0x348] sm:$0xff]   ;;  %v1647_v49 = vshll.u32 %v4549_v15, 16 }
  0x8e   : > { %1993 = vmatmul.mubr.bf16.gmra.mxu1 %v4407_v63  ;;  %3435 = vmatpush3.bf16.msra.mxu0 %v3682_v29  ;;  %v1637_v63 = vor.u32 %v1635_v39, %v1609_v52  ;;  %v1602_v29 = vsel %vm413_vm0, %v1597_v44, %v1601_v17  ;;  %v1627_v52 = vshrl.u32 %v4476_v50, 16  ;;  %v3748_v39 = vld [vmem:[%s3886_s27 + $0x20] sm:$0xff]  ;;  %v1658_v27 = vsel %vm413_vm0, %v1653_v2, %v1657_v7 }
  0x8f   : > { %3481 = vmatpush3.bf16.msra.mxu1 %v3683_v36  ;;  %1927 = vmatprep.mubr.bf16.mxu0 %v1610_v24  ;;  %v2132_v36 = vsel %vm2104_vm1, %v2123_v19, %v2131_v3  ;;  %v1643_v19 = vshrl.u32 %v4494_v58, 16  ;;  %v3055_v24 = vcombine.high %v2028_v53, %v3749_v30  ;;  %v1649_v21 = vrot.slane %v1647_v49, 1 }
  0x90   : > { %2000 = vmatprep.mubr.bf16.mxu1 %v1626_v46  ;;  %3436 = vmatprep.subr.bf16.mxu0 %v3688_v34  ;;  %v2126_v34 = vsel %vm2104_vm1, %v2117_v14, %v2125_v6  ;;  %v1642_v8 = vsel %vm413_vm0, %v1637_v63, %v1641_v1  ;;  %v3053_v14 = vcombine.high %v2027_v25, %v3748_v39  ;;  %v1633_v46 = vrot.slane %v1631_v0, 1 }
  0x91   : > { %3482 = vmatprep.subr.bf16.mxu1 %v3689_v48  ;;  %v3701_v48 = vld [vmem:[%s4844_s1 + $0x3c0] sm:$0xff]   ;;  %v1629_v37 = vor.u32 %v1627_v52, %v1601_v17  ;;  %v1645_v44 = vor.u32 %v1643_v19, %v1617_v45  ;;  %v3052_v63 = vcombine.low %v2027_v25, %v3748_v39  ;;  %v3054_v2 = vcombine.low %v2028_v53, %v3749_v30 }
  0x92   : > { %3437 = vmatpush3.bf16.msra.mxu0 %v3690_v4  ;;  %v3702_v4 = vld [vmem:[%s4844_s1 + $0x300] sm:$0xff]  }
  0x93   : > { %3483 = vmatpush3.bf16.msra.mxu1 %v3691_v5  ;;  %3438 = vmatprep.subr.bf16.mxu0 %v3692_v9  ;;  %v2108_v5 = vrot.slane %v3053_v14, 1  ;;  %v3703_v9 = vld [vmem:[%s4844_s1 + $0x380] sm:$0xff]   ;;  %v1634_v17 = vsel %vm413_vm0, %v1629_v37, %v1633_v46  ;;  %v1650_v1 = vsel %vm413_vm0, %v1645_v44, %v1649_v21 }
  0x94   : > { %3484 = vmatprep.subr.bf16.mxu1 %v3693_v33  ;;  %v2114_v33 = vrot.slane %v3055_v24, 1 }
  0x95   : > { %1928 = vmatmul.mubr.bf16.gmra.mxu0 %v1602_v29  ;;  %v2110_v45 = vsel %vm2104_vm1, %v2108_v5, %v2109_v11  ;;  %v2105_v29 = vrot.slane %v3052_v63, 1  ;;  %v2140_v11 = vsel %vm2104_vm1, %v2131_v3, %v2139_v60 }
  0x96   : > { %2001 = vmatmul.mubr.bf16.gmra.mxu1 %v1618_v62  ;;  %1935 = vmatprep.mubr.bf16.mxu0 %v1642_v8  ;;  %v2116_v7 = vsel %vm2104_vm1, %v2114_v33, %v2115_v47  ;;  %v2111_v62 = vrot.slane %v3054_v2, 1  ;;  %v2133_v47 = vrot.slane %v4476_v50, 1 }
  0x97   : > { %2008 = vmatprep.mubr.bf16.mxu1 %v1658_v27  ;;  %3439 = vmatpush3.bf16.msra.mxu0 %v3696_v26  ;;  %v2107_v25 = vsel %vm2104_vm1, %v2105_v29, %v2106_v13  ;;  %v2137_v13 = vrot.slane %v4494_v58, 1 }
  0x98   : > { %3485 = vmatpush3.bf16.msra.mxu1 %v3697_v57  ;;  %3440 = vmatprep.subr.bf16.mxu0 %v3700_v41  ;;  %v2113_v54 = vsel %vm2104_vm1, %v2111_v62, %v2112_v20  ;;  %v2147_v20 = vrot.slane %v4517_v22, 1  ;;  %v2134_v51 = vsel %vm2104_vm1, %v2125_v6, %v2133_v47 }
  0x99   : > { %3486 = vmatprep.subr.bf16.mxu1 %v3701_v48  ;;  %v2138_v56 = vsel %vm2104_vm1, %v2129_v16, %v2137_v13 }
  0x9b   : > { %3441 = vmatpush3.bf16.msra.mxu0 %v3702_v4 }
  0x9c   : > { %3487 = vmatpush3.bf16.msra.mxu1 %v3703_v9 }
  0x9d   : > { %1936 = vmatmul.mubr.bf16.gmra.mxu0 %v1634_v17 }
  0x9e   : > { %2009 = vmatmul.mubr.bf16.gmra.mxu1 %v1650_v1  ;;  %2393 = vmatprep.mubr.bf16.mxu0 %v2110_v45 }
  0x9f   : > { %2466 = vmatprep.mubr.bf16.mxu1 %v2116_v7 }
  0xa5   : > { %2394 = vmatmul.mubr.bf16.vlgmr.msra.gmra.mxu0 %v2107_v25 }
  0xa6   : > { %2467 = vmatmul.mubr.bf16.vlgmr.msra.gmra.mxu1 %v2113_v54  ;;  %2401 = vmatprep.mubr.bf16.mxu0 %v4448_v38  ;;  %v2148_v38 = vsel %vm2104_vm1, %v2139_v60, %v2147_v20 }
  0xa7   : > { %2474 = vmatprep.mubr.bf16.mxu1 %v4455_v10  ;;  %v2141_v10 = vrot.slane %v4547_v12, 1 }
  0xa9   : > { %v2142_v23 = vsel %vm2104_vm1, %v2133_v47, %v2141_v10 }
  0xad   : > { %2402 = vmatmul.mubr.bf16.gmra.mxu0 %v4469_v28  ;;  %v2145_v28 = vrot.slane %v4549_v15, 1 }
  0xae   : > { %2475 = vmatmul.mubr.bf16.gmra.mxu1 %v4483_v18  ;;  %2409 = vmatprep.mubr.bf16.mxu0 %v2128_v35 }
  0xaf   : > { %2482 = vmatprep.mubr.bf16.mxu1 %v2132_v36  ;;  %v2146_v50 = vsel %vm2104_vm1, %v2137_v13, %v2145_v28 }
  0xb5   : > { %2410 = vmatmul.mubr.bf16.gmra.mxu0 %v2126_v34 }
  0xb6   : > { %2483 = vmatmul.mubr.bf16.gmra.mxu1 %v2130_v42  ;;  %2417 = vmatprep.mubr.bf16.mxu0 %v2136_v55 }
  0xb7   : > { %2490 = vmatprep.mubr.bf16.mxu1 %v2140_v11 }
  0xbd   : > { %2418 = vmatmul.mubr.bf16.gmra.mxu0 %v2134_v51 }
  0xbe   : > { %2491 = vmatmul.mubr.bf16.gmra.mxu1 %v2138_v56  ;;  %2425 = vmatprep.mubr.bf16.mxu0 %v2144_v40 }
  0xbf   : > { %2498 = vmatprep.mubr.bf16.mxu1 %v2148_v38 }
  0xc5   : > { %2426 = vmatmul.mubr.bf16.gmra.mxu0 %v2142_v23 }
  0xc6   : > { %2499 = vmatmul.mubr.bf16.gmra.mxu1 %v2146_v50 }
  0xed   : > { %v3166_v59 = vpop.f32.mrf.mxu0 }
  0xee   : > { %v3212_v58 = vpop.f32.mrf.mxu1 }
  0xef   : > { %v3167_v18 = vpop.f32.mrf.mxu0 }
  0xf0   : > { %v3168_v61 = vadd.f32 %v3167_v18, %v3166_v59  ;;  %v3213_v32 = vpop.f32.mrf.mxu1 }
  0xf1   : > { %v3169_v22 = vpop.f32.mrf.mxu0  ;;  %v3214_v3 = vadd.f32 %v3213_v32, %v3212_v58 }
  0xf2   : > { %v3215_v16 = vpop.f32.mrf.mxu1 }
  0xf3   : > { %v3170_v6 = vpop.f32.mrf.mxu0  ;;  %v4656_v12 = vadd.f32 %v3214_v3, %v3168_v61 }
  0xf4   : > { %v3171_v52 = vadd.f32 %v3170_v6, %v3169_v22  ;;  %v3216_v53 = vpop.f32.mrf.mxu1 }
  0xf5   : > { %v3217_v15 = vadd.f32 %v3216_v53, %v3215_v16  ;;  %v3172_v35 = vpop.f32.mrf.mxu0 }
  0xf6   : > { %v3218_v36 = vpop.f32.mrf.mxu1 }
  0xf7   : > { %v4658_v0 = vadd.f32 %v3217_v15, %v3171_v52  ;;  %v3173_v34 = vpop.f32.mrf.mxu0 }
  0xf8   : > { %v3174_v42 = vadd.f32 %v3173_v34, %v3172_v35  ;;  %v3219_v8 = vpop.f32.mrf.mxu1 }
  0xf9   : > { %v3220_v26 = vadd.f32 %v3219_v8, %v3218_v36  ;;  %v3175_v19 = vpop.f32.mrf.mxu0 }
  0xfa   : > { %v3221_v49 = vpop.f32.mrf.mxu1 }
  0xfb   : > { %v4660_v39 = vadd.f32 %v3220_v26, %v3174_v42  ;;  %v3176_v14 = vpop.f32.mrf.mxu0 }
  0xfc   : > { %v3177_v27 = vadd.f32 %v3176_v14, %v3175_v19  ;;  %v3222_v57 = vpop.f32.mrf.mxu1 }
  0xfd   : > { %v3223_v41 = vadd.f32 %v3222_v57, %v3221_v49  ;;  %v3178_v30 = vpop.f32.mrf.mxu0 }
  0xfe   : > { %v3224_v24 = vpop.f32.mrf.mxu1 }
  0xff   : > { %v4662_v48 = vadd.f32 %v3223_v41, %v3177_v27  ;;  %v3179_v37 = vpop.f32.mrf.mxu0 }
 0x100   : > { %v3180_v46 = vadd.f32 %v3179_v37, %v3178_v30  ;;  %v3225_v44 = vpop.f32.mrf.mxu1 }
 0x101   : > { %v3226_v21 = vadd.f32 %v3225_v44, %v3224_v24  ;;  %v3181_v4 = vpop.f32.mrf.mxu0 }
 0x102   : > { %v3227_v5 = vpop.f32.mrf.mxu1 }
 0x103   : > { %v4664_v9 = vadd.f32 %v3226_v21, %v3180_v46  ;;  %v3182_v33 = vpop.f32.mrf.mxu0 }
 0x104   : > { %v3183_v17 = vadd.f32 %v3182_v33, %v3181_v4  ;;  %v3228_v63 = vpop.f32.mrf.mxu1 }
 0x105   : > { %v3229_v1 = vadd.f32 %v3228_v63, %v3227_v5  ;;  %v3184_v45 = vpop.f32.mrf.mxu0 }
 0x106   : > { %v3230_v2 = vpop.f32.mrf.mxu1 }
 0x107   : > { %v4666_v7 = vadd.f32 %v3229_v1, %v3183_v17  ;;  %v3185_v29 = vpop.f32.mrf.mxu0 }
 0x108   : > { %v3186_v62 = vadd.f32 %v3185_v29, %v3184_v45  ;;  %v3231_v25 = vpop.f32.mrf.mxu1 }
 0x109   : > { %v3232_v54 = vadd.f32 %v3231_v25, %v3230_v2  ;;  %v3187_v31 = vpop.f32.mrf.mxu0 }
 0x10a   : > { %v3233_v60 = vpop.f32.mrf.mxu1 }
 0x10b   : > { %v4668_v55 = vadd.f32 %v3232_v54, %v3186_v62  ;;  %v3188_v11 = vpop.f32.mrf.mxu0 }
 0x10c   : > { %v3189_v47 = vadd.f32 %v3188_v11, %v3187_v31  ;;  %v3234_v13 = vpop.f32.mrf.mxu1 }
 0x10d   : > { %v3235_v43 = vadd.f32 %v3234_v13, %v3233_v60  ;;  %v3190_v20 = vpop.f32.mrf.mxu0 }
 0x10e   : > { %v3236_v51 = vpop.f32.mrf.mxu1 }
 0x10f   : > { %v4670_v56 = vadd.f32 %v3235_v43, %v3189_v47  ;;  %v3191_v40 = vpop.f32.mrf.mxu0 }
 0x110   : > { %v3192_v38 = vadd.f32 %v3191_v40, %v3190_v20  ;;  %v3237_v10 = vpop.f32.mrf.mxu1 }
 0x111   : > { %v3238_v28 = vadd.f32 %v3237_v10, %v3236_v51  ;;  %v3193_v23 = vpop.f32.mrf.mxu0 }
 0x112   : > { %v3239_v50 = vpop.f32.mrf.mxu1 }
 0x113   : > { %v4672_v59 = vadd.f32 %v3238_v28, %v3192_v38  ;;  %v3194_v18 = vpop.f32.mrf.mxu0 }
 0x114   : > { %v3195_v58 = vadd.f32 %v3194_v18, %v3193_v23  ;;  %v3240_v61 = vpop.f32.mrf.mxu1 }
 0x115   : > { %v3241_v22 = vadd.f32 %v3240_v61, %v3239_v50  ;;  %v3258_v32 = vpop.f32.mrf.mxu0 }
 0x116   : > { %v3304_v3 = vpop.f32.mrf.mxu1 }
 0x117   : > { %v4674_v6 = vadd.f32 %v3241_v22, %v3195_v58  ;;  %v3259_v16 = vpop.f32.mrf.mxu0 }
 0x118   : > { %v3260_v52 = vadd.f32 %v3259_v16, %v3258_v32  ;;  %v3305_v53 = vpop.f32.mrf.mxu1 }
 0x119   : > { %v3306_v15 = vadd.f32 %v3305_v53, %v3304_v3  ;;  %v3261_v35 = vpop.f32.mrf.mxu0 }
 0x11a   : > { %v1195_v36 = vadd.f32 %v3260_v52, %v4656_v12  ;;  %v3307_v34 = vpop.f32.mrf.mxu1 }
 0x11b   : > { %v3262_v42 = vpop.f32.mrf.mxu0 }
 0x11c   : > { %v4677_v8 = vadd.f32 %v3306_v15, %v1195_v36  ;;  %v3263_v26 = vadd.f32 %v3262_v42, %v3261_v35  ;;  %v3308_v19 = vpop.f32.mrf.mxu1 }
 0x11d   : > { %v3309_v49 = vadd.f32 %v3308_v19, %v3307_v34  ;;  %v3264_v14 = vpop.f32.mrf.mxu0 }
 0x11e   : > { %v1198_v27 = vadd.f32 %v3263_v26, %v4658_v0  ;;  %v3310_v57 = vpop.f32.mrf.mxu1 }
 0x11f   : > { %v3265_v41 = vpop.f32.mrf.mxu0 }
 0x120   : > { %v4680_v30 = vadd.f32 %v3309_v49, %v1198_v27  ;;  %v3266_v24 = vadd.f32 %v3265_v41, %v3264_v14  ;;  %v3311_v37 = vpop.f32.mrf.mxu1 }
 0x121   : > { %v3312_v46 = vadd.f32 %v3311_v37, %v3310_v57  ;;  %v3267_v44 = vpop.f32.mrf.mxu0 }
 0x122   : > { %v1203_v12 = vadd.f32 %v3266_v24, %v4660_v39  ;;  %v3313_v21 = vpop.f32.mrf.mxu1 }
 0x123   : > { %v3268_v4 = vpop.f32.mrf.mxu0 }
 0x124   : > { %v4683_v5 = vadd.f32 %v3312_v46, %v1203_v12  ;;  %v3269_v33 = vadd.f32 %v3268_v4, %v3267_v44  ;;  %v3314_v17 = vpop.f32.mrf.mxu1 }
 0x125   : > { %v3315_v63 = vadd.f32 %v3314_v17, %v3313_v21  ;;  %v3270_v1 = vpop.f32.mrf.mxu0 }
 0x126   : > { %v1206_v0 = vadd.f32 %v3269_v33, %v4662_v48  ;;  %v3316_v45 = vpop.f32.mrf.mxu1 }
 0x127   : > { %v3271_v2 = vpop.f32.mrf.mxu0 }
 0x128   : > { %v4686_v29 = vadd.f32 %v3315_v63, %v1206_v0  ;;  %v3272_v62 = vadd.f32 %v3271_v2, %v3270_v1  ;;  %v3317_v25 = vpop.f32.mrf.mxu1 }
 0x129   : > { %v3318_v54 = vadd.f32 %v3317_v25, %v3316_v45  ;;  %v3273_v31 = vpop.f32.mrf.mxu0 }
 0x12a   : > { %v1211_v39 = vadd.f32 %v3272_v62, %v4664_v9  ;;  %v3319_v60 = vpop.f32.mrf.mxu1 }
 0x12b   : > { %v3274_v11 = vpop.f32.mrf.mxu0 }
 0x12c   : > { %v4689_v47 = vadd.f32 %v3318_v54, %v1211_v39  ;;  %v3275_v13 = vadd.f32 %v3274_v11, %v3273_v31  ;;  %v3320_v43 = vpop.f32.mrf.mxu1 }
 0x12d   : > { %v3321_v20 = vadd.f32 %v3320_v43, %v3319_v60  ;;  %v3276_v51 = vpop.f32.mrf.mxu0 }
 0x12e   : > { %v1214_v48 = vadd.f32 %v3275_v13, %v4666_v7  ;;  %v3322_v40 = vpop.f32.mrf.mxu1 }
 0x12f   : > { %v3277_v38 = vpop.f32.mrf.mxu0 }
 0x130   : > { %v4692_v10 = vadd.f32 %v3321_v20, %v1214_v48  ;;  %v3278_v28 = vadd.f32 %v3277_v38, %v3276_v51  ;;  %v3323_v23 = vpop.f32.mrf.mxu1 }
 0x131   : > { %v3324_v50 = vadd.f32 %v3323_v23, %v3322_v40  ;;  %v3279_v18 = vpop.f32.mrf.mxu0 }
 0x132   : > { %v1219_v9 = vadd.f32 %v3278_v28, %v4668_v55  ;;  %v3325_v58 = vpop.f32.mrf.mxu1 }
 0x133   : > { %v3280_v61 = vpop.f32.mrf.mxu0 }
 0x134   : > { %v4695_v22 = vadd.f32 %v3324_v50, %v1219_v9  ;;  %v3281_v32 = vadd.f32 %v3280_v61, %v3279_v18  ;;  %v3326_v3 = vpop.f32.mrf.mxu1 }
 0x135   : > { %v3327_v16 = vadd.f32 %v3326_v3, %v3325_v58  ;;  %v3282_v52 = vpop.f32.mrf.mxu0 }
 0x136   : > { %v1222_v7 = vadd.f32 %v3281_v32, %v4670_v56  ;;  %v3328_v53 = vpop.f32.mrf.mxu1 }
 0x137   : > { %v3283_v15 = vpop.f32.mrf.mxu0 }
 0x138   : > { %v4698_v35 = vadd.f32 %v3327_v16, %v1222_v7  ;;  %v3284_v36 = vadd.f32 %v3283_v15, %v3282_v52  ;;  %v3329_v34 = vpop.f32.mrf.mxu1 }
 0x139   : > { %v3330_v42 = vadd.f32 %v3329_v34, %v3328_v53  ;;  %v3285_v26 = vpop.f32.mrf.mxu0 }
 0x13a   : > { %v1227_v55 = vadd.f32 %v3284_v36, %v4672_v59  ;;  %v3331_v19 = vpop.f32.mrf.mxu1 }
 0x13b   : > { %v3286_v49 = vpop.f32.mrf.mxu0 }
 0x13c   : > { %v4701_v14 = vadd.f32 %v3330_v42, %v1227_v55  ;;  %v3287_v27 = vadd.f32 %v3286_v49, %v3285_v26  ;;  %v3332_v57 = vpop.f32.mrf.mxu1 }
 0x13d   : > { %v3333_v41 = vadd.f32 %v3332_v57, %v3331_v19  ;;  %v3350_v24 = vpop.f32.mrf.mxu0 }
 0x13e   : > { %4847 = vst [vmem:[#allocation2_spill] sm:$0xff] %v4701_v14  ;;  %v1230_v56 = vadd.f32 %v3287_v27, %v4674_v6  ;;  %v3396_v37 = vpop.f32.mrf.mxu1 }
 0x13f   : > { %v3351_v46 = vpop.f32.mrf.mxu0 }
 0x140   : > { %v4704_v44 = vadd.f32 %v3333_v41, %v1230_v56  ;;  %v3397_v12 = vpop.f32.mrf.mxu1  ;;  %v3352_v16 = vadd.f32 %v3351_v46, %v3350_v24 }
 0x141   : > { %v3353_v21 = vpop.f32.mrf.mxu0  ;;  %v3398_v52 = vadd.f32 %v3397_v12, %v3396_v37  ;;  %v4754_v12 = vld [vmem:[%s4845_s2] ss:$0 sm:$0xff] }
 0x142   : > { %4848 = vst [vmem:[#allocation3_spill] sm:$0xff] %v4704_v44  ;;  %v3399_v4 = vpop.f32.mrf.mxu1 }
 0x143   : > { %v3354_v33 = vpop.f32.mrf.mxu0  ;;  %v1979_v26 = vadd.f32 %v3398_v52, %v3352_v16 }
 0x144   : > { %v3400_v17 = vpop.f32.mrf.mxu1  ;;  %v3355_v36 = vadd.f32 %v3354_v33, %v3353_v21 }
 0x145   : > { %v3356_v59 = vpop.f32.mrf.mxu0  ;;  %v3401_v34 = vadd.f32 %v3400_v17, %v3399_v4  ;;  %v2017_v24 = vadd.f32 %v1979_v26, %v4677_v8 }
 0x146   : > { %v3402_v63 = vpop.f32.mrf.mxu1 }
 0x147   : > { %v3357_v1 = vpop.f32.mrf.mxu0  ;;  %v1982_v41 = vadd.f32 %v3401_v34, %v3355_v36 }
 0x148   : > { %v3403_v0 = vpop.f32.mrf.mxu1  ;;  %v3358_v56 = vadd.f32 %v3357_v1, %v3356_v59 }
 0x149   : > { %v3359_v45 = vpop.f32.mrf.mxu0  ;;  %v3404_v44 = vadd.f32 %v3403_v0, %v3402_v63  ;;  %v2018_v52 = vadd.f32 %v1982_v41, %v4680_v30 }
 0x14a   : > { %v3405_v2 = vpop.f32.mrf.mxu1 }
 0x14b   : > { %v3360_v62 = vpop.f32.mrf.mxu0 }
 0x14c   : > { %v3406_v25 = vpop.f32.mrf.mxu1  ;;  %v3361_v63 = vadd.f32 %v3360_v62, %v3359_v45 }
 0x14d   : > { %v4706_v54 = vpop.f32.mrf.mxu0  ;;  %v3407_v1 = vadd.f32 %v3406_v25, %v3405_v2 }
 0x14e   : > { %v4708_v6 = vpop.f32.mrf.mxu1 }
 0x14f   : > { %v3363_v31 = vpop.f32.mrf.mxu0  ;;  %v1990_v2 = vadd.f32 %v3407_v1, %v3361_v63 }
 0x150   : > { %v3409_v39 = vpop.f32.mrf.mxu1  ;;  %v3364_v30 = vadd.f32 %v3363_v31, %v4706_v54 }
 0x151   : > { %v4710_v60 = vpop.f32.mrf.mxu0 }
 0x152   : > { %v4712_v11 = vpop.f32.mrf.mxu1 }
 0x153   : > { %v4714_v13 = vpop.f32.mrf.mxu0 }
 0x154   : > { %v4716_v43 = vpop.f32.mrf.mxu1  ;;  %v3367_v54 = vadd.f32 %v4714_v13, %v4710_v60 }
 0x155   : > { %v4718_v20 = vpop.f32.mrf.mxu0 }
 0x156   : > { %v4720_v51 = vpop.f32.mrf.mxu1 }
 0x157   : > { %v4722_v48 = vpop.f32.mrf.mxu0 }
 0x158   : > { %v4724_v40 = vpop.f32.mrf.mxu1 }
 0x159   : > { %v4726_v38 = vpop.f32.mrf.mxu0 }
 0x15a   : > { %v4728_v28 = vpop.f32.mrf.mxu1 }
 0x15b   : > { %v4730_v23 = vpop.f32.mrf.mxu0 }
 0x15c   : > { %v4732_v50 = vpop.f32.mrf.mxu1 }
 0x15d   : > { %v4734_v18 = vpop.f32.mrf.mxu0 }
 0x15e   : > { %v4736_v9 = vpop.f32.mrf.mxu1 }
 0x15f   : > { %v4738_v58 = vpop.f32.mrf.mxu0 }
 0x160   : > { %v4740_v61 = vpop.f32.mrf.mxu1 }
 0x161   : > { %v4742_v32 = vpop.f32.mrf.mxu0 }
 0x162   : > { %v4744_v3 = vpop.f32.mrf.mxu1 }
 0x163   : > { %v4746_v7 = vpop.f32.mrf.mxu0 }
 0x164   : > { %v4748_v53 = vpop.f32.mrf.mxu1 }
 0x165   : > { %v3442_v15 = vpop.f32.mrf.mxu0 }
 0x166   : > { %v3488_v42 = vpop.f32.mrf.mxu1 }
 0x167   : > { %v3443_v55 = vpop.f32.mrf.mxu0 }
 0x168   : > { %v3444_v19 = vadd.f32 %v3443_v55, %v3442_v15  ;;  %v3489_v49 = vpop.f32.mrf.mxu1  ;;  %v1987_v15 = vadd.f32 %v3404_v44, %v3358_v56  ;;  %v3410_v44 = vadd.f32 %v3409_v39, %v4708_v6  ;;  %v3413_v6 = vadd.f32 %v4716_v43, %v4712_v11 }
 0x169   : > { %v3490_v27 = vadd.f32 %v3489_v49, %v3488_v42  ;;  %v3445_v57 = vpop.f32.mrf.mxu0  ;;  %v2020_v39 = vadd.f32 %v1990_v2, %v4686_v29  ;;  %v3370_v11 = vadd.f32 %v4722_v48, %v4718_v20  ;;  %v3416_v43 = vadd.f32 %v4724_v40, %v4720_v51 }
 0x16a   : > { %v3491_v14 = vpop.f32.mrf.mxu1  ;;  %v1998_v13 = vadd.f32 %v3413_v6, %v3367_v54  ;;  %v3373_v20 = vadd.f32 %v4730_v23, %v4726_v38  ;;  %v3419_v51 = vadd.f32 %v4732_v50, %v4728_v28  ;;  %v3376_v28 = vadd.f32 %v4738_v58, %v4734_v18 }
 0x16b   : > { %v2469_v37 = vadd.f32 %v3490_v27, %v3444_v19  ;;  %v3446_v46 = vpop.f32.mrf.mxu0  ;;  %v2003_v40 = vadd.f32 %v3416_v43, %v3370_v11  ;;  %v3422_v50 = vadd.f32 %v4740_v61, %v4736_v9 }
 0x16c   : > { %v3447_v21 = vadd.f32 %v3446_v46, %v3445_v57  ;;  %v3492_v4 = vpop.f32.mrf.mxu1  ;;  %v2006_v23 = vadd.f32 %v3419_v51, %v3373_v20 }
 0x16d   : > { %v2507_v33 = vadd.f32 %v2469_v37, %v2017_v24  ;;  %v3493_v17 = vadd.f32 %v3492_v4, %v3491_v14  ;;  %v3448_v16 = vpop.f32.mrf.mxu0  ;;  %v2019_v14 = vadd.f32 %v1987_v15, %v4683_v5  ;;  %v1995_v5 = vadd.f32 %v3410_v44, %v3364_v30 }
 0x16e   : > { %v3494_v59 = vpop.f32.mrf.mxu1  ;;  %v2024_v9 = vadd.f32 %v2006_v23, %v4698_v35  ;;  %v2011_v61 = vadd.f32 %v3422_v50, %v3376_v28 }
 0x16f   : > { %v4758_v8 = vadd.f32 %v4754_v12, %v2507_v33  ;;  %v2472_v0 = vadd.f32 %v3493_v17, %v3447_v21  ;;  %v3449_v36 = vpop.f32.mrf.mxu0  ;;  %v2021_v60 = vadd.f32 %v1995_v5, %v4689_v47 }
 0x170   : > { %v3450_v34 = vadd.f32 %v3449_v36, %v3448_v16  ;;  %v3495_v42 = vpop.f32.mrf.mxu1 }
 0x171   : > { %v3089_v26 = vmul.f32 -1.442695, %v4758_v8  ;;  %v2508_v55 = vadd.f32 %v2472_v0, %v2018_v52  ;;  %v3496_v19 = vadd.f32 %v3495_v42, %v3494_v59  ;;  %v3451_v49 = vpop.f32.mrf.mxu0 }
 0x172   : > { %v3497_v45 = vpop.f32.mrf.mxu1 }
 0x173   : > { %3708 = vpow2.f32 %v3089_v26  ;;  %v4765_v62 = vadd.f32 %v4754_v12, %v2508_v55  ;;  %v2477_v25 = vadd.f32 %v3496_v19, %v3450_v34  ;;  %v3452_v27 = vpop.f32.mrf.mxu0 }
 0x174   : > { %v3453_v57 = vadd.f32 %v3452_v27, %v3451_v49  ;;  %v3498_v41 = vpop.f32.mrf.mxu1  ;;  %v2022_v49 = vadd.f32 %v1998_v13, %v4692_v10 }
 0x175   : > { %v3090_v56 = vmul.f32 -1.442695, %v4765_v62  ;;  %v2509_v24 = vadd.f32 %v2477_v25, %v2019_v14  ;;  %v3499_v37 = vadd.f32 %v3498_v41, %v3497_v45  ;;  %v3454_v46 = vpop.f32.mrf.mxu0 }
 0x176   : > { %v3500_v31 = vpop.f32.mrf.mxu1 }
 0x177   : > { %3710 = vpow2.f32 %v3090_v56  ;;  %v4774_v21 = vadd.f32 %v4754_v12, %v2509_v24  ;;  %v2480_v4 = vadd.f32 %v3499_v37, %v3453_v57  ;;  %v3455_v33 = vpop.f32.mrf.mxu0  ;;  %v2023_v24 = vadd.f32 %v2003_v40, %v4695_v22 }
 0x178   : > { %v3456_v17 = vadd.f32 %v3455_v33, %v3454_v46  ;;  %v3501_v16 = vpop.f32.mrf.mxu1  ;;  %v3379_v22 = vadd.f32 %v4746_v7, %v4742_v32  ;;  %v4849_v7 = vld [vmem:[#allocation2_spill] sm:$0xff] }
 0x179   : > { %v3091_v52 = vmul.f32 -1.442695, %v4774_v21  ;;  %v2510_v15 = vadd.f32 %v2480_v4, %v2020_v39  ;;  %v3502_v59 = vadd.f32 %v3501_v16, %v3500_v31  ;;  %v3457_v63 = vpop.f32.mrf.mxu0  ;;  %v3425_v16 = vadd.f32 %v4748_v53, %v4744_v3 }
 0x17a   : > { %v3503_v29 = vpop.f32.mrf.mxu1 }
 0x17b   : > { %3712 = vpow2.f32 %v3091_v52  ;;  %v4783_v1 = vadd.f32 %v4754_v12, %v2510_v15  ;;  %v2485_v0 = vadd.f32 %v3502_v59, %v3456_v17  ;;  %v3458_v36 = vpop.f32.mrf.mxu0  ;;  %v2014_v3 = vadd.f32 %v3425_v16, %v3379_v22 }
 0x17c   : > { %v3459_v34 = vadd.f32 %v3458_v36, %v3457_v63  ;;  %v3504_v42 = vpop.f32.mrf.mxu1 }
 0x17d   : > { %v3092_v26 = vmul.f32 -1.442695, %v4783_v1  ;;  %v2511_v55 = vadd.f32 %v2485_v0, %v2021_v60  ;;  %v3505_v47 = vadd.f32 %v3504_v42, %v3503_v29  ;;  %v3460_v19 = vpop.f32.mrf.mxu0  ;;  %v2025_v0 = vadd.f32 %v2011_v61, %v4849_v7 }
 0x17e   : > { %v3506_v48 = vpop.f32.mrf.mxu1 }
 0x17f   : > { %3714 = vpow2.f32 %v3092_v26  ;;  %v4792_v14 = vadd.f32 %v4754_v12, %v2511_v55  ;;  %v2488_v30 = vadd.f32 %v3505_v47, %v3459_v34  ;;  %v3461_v44 = vpop.f32.mrf.mxu0 }
 0x180   : > { %v3709_v45 = vpop.eup %3708  ;;  %v3462_v2 = vadd.f32 %v3461_v44, %v3460_v19  ;;  %v3507_v25 = vpop.f32.mrf.mxu1 }
 0x181   : > { %v2564_v27 = vadd.f32 1.0, %v3709_v45  ;;  %v3093_v10 = vmul.f32 -1.442695, %v4792_v14  ;;  %v2512_v57 = vadd.f32 %v2488_v30, %v2022_v49  ;;  %v3508_v41 = vadd.f32 %v3507_v25, %v3506_v48  ;;  %v3463_v38 = vpop.f32.mrf.mxu0  ;;  %v4850_v48 = vld [vmem:[#allocation3_spill] sm:$0xff] }
 0x182   : > { %v3509_v56 = vpop.f32.mrf.mxu1  ;;  %v2026_v40 = vadd.f32 %v2014_v3, %v4850_v48 }
 0x183   : > { %3716 = vrcp.f32 %v2564_v27  ;;  %v4801_v37 = vadd.f32 %v4754_v12, %v2512_v57  ;;  %v2493_v46 = vadd.f32 %v3508_v41, %v3462_v2  ;;  %v3464_v5 = vpop.f32.mrf.mxu0 }
 0x184   : > { %v3711_v54 = vpop.eup %3710  ;;  %3718 = vpow2.f32 %v3093_v10  ;;  %v3465_v6 = vadd.f32 %v3464_v5, %v3463_v38  ;;  %v3510_v31 = vpop.f32.mrf.mxu1 }
 0x185   : > { %v2565_v39 = vadd.f32 1.0, %v3711_v54  ;;  %v3094_v4 = vmul.f32 -1.442695, %v4801_v37  ;;  %v2513_v18 = vadd.f32 %v2493_v46, %v2023_v24  ;;  %v3511_v58 = vadd.f32 %v3510_v31, %v3509_v56  ;;  %v3466_v33 = vpop.f32.mrf.mxu0 }
 0x186   : > { %v3512_v17 = vpop.f32.mrf.mxu1 }
 0x187   : > { %3720 = vrcp.f32 %v2565_v39  ;;  %v4810_v52 = vadd.f32 %v4754_v12, %v2513_v18  ;;  %v2496_v15 = vadd.f32 %v3511_v58, %v3465_v6  ;;  %v3467_v59 = vpop.f32.mrf.mxu0 }
 0x188   : > { %v3713_v63 = vpop.eup %3712  ;;  %3722 = vpow2.f32 %v3094_v4  ;;  %v3468_v60 = vadd.f32 %v3467_v59, %v3466_v33  ;;  %v3513_v13 = vpop.f32.mrf.mxu1 }
 0x189   : > { %v2566_v11 = vadd.f32 1.0, %v3713_v63  ;;  %v3095_v35 = vmul.f32 -1.442695, %v4810_v52  ;;  %v2514_v29 = vadd.f32 %v2496_v15, %v2024_v9  ;;  %v3514_v43 = vadd.f32 %v3513_v13, %v3512_v17  ;;  %v3469_v32 = vpop.f32.mrf.mxu0 }
 0x18a   : > { %v3515_v36 = vpop.f32.mrf.mxu1 }
 0x18b   : > { %3724 = vrcp.f32 %v2566_v11  ;;  %v4815_v53 = vadd.f32 %v4754_v12, %v2514_v29  ;;  %v2501_v34 = vadd.f32 %v3514_v43, %v3468_v60  ;;  %v3470_v42 = vpop.f32.mrf.mxu0 }
 0x18c   : > { %v3715_v26 = vpop.eup %3714  ;;  %3726 = vpow2.f32 %v3095_v35  ;;  %v3471_v55 = vadd.f32 %v3470_v42, %v3469_v32  ;;  %v3516_v47 = vpop.f32.mrf.mxu1 }
 0x18d   : > { %v2567_v19 = vadd.f32 1.0, %v3715_v26  ;;  %v3096_v49 = vmul.f32 -1.442695, %v4815_v53  ;;  %v2515_v20 = vadd.f32 %v2501_v34, %v2025_v0  ;;  %v3517_v51 = vadd.f32 %v3516_v47, %v3515_v36 }
 0x18f   : > { %3728 = vrcp.f32 %v2567_v19  ;;  %v2532_v30 = vadd.f32 %v4754_v12, %v2515_v20  ;;  %v2504_v44 = vadd.f32 %v3517_v51, %v3471_v55 }
 0x190   : > { %v3717_v45 = vpop.eup %3716  ;;  %3730 = vpow2.f32 %v3096_v49 }
 0x191   : > { %v3719_v2 = vpop.eup %3718  ;;  %v3097_v25 = vmul.f32 -1.442695, %v2532_v30  ;;  %v2516_v27 = vadd.f32 %v2504_v44, %v2026_v40  ;;  %v2594_v23 = vmul.f32 %v3717_v45, %v4758_v8 }
 0x192   : > { %v2568_v10 = vadd.f32 1.0, %v3719_v2 }
 0x193   : > { %3732 = vpow2.f32 %v3097_v25  ;;  %v2533_v57 = vadd.f32 %v4754_v12, %v2516_v27 }
 0x194   : > { %v3721_v41 = vpop.eup %3720  ;;  %3734 = vrcp.f32 %v2568_v10 }
 0x195   : > { %v3723_v38 = vpop.eup %3722  ;;  %v2595_v28 = vmul.f32 %v3721_v41, %v4765_v62  ;;  %v3098_v50 = vmul.f32 -1.442695, %v2533_v57 }
 0x196   : > { %v2569_v56 = vadd.f32 1.0, %v3723_v38 }
 0x197   : > { %v3124_v24 = vpack.c.bf16 %v2595_v28, %v2594_v23  ;;  %3736 = vpow2.f32 %v3098_v50 }
 0x198   : > { %v3725_v46 = vpop.eup %3724  ;;  %3738 = vrcp.f32 %v2569_v56 }
 0x199   : > { %v3727_v12 = vpop.eup %3726  ;;  %3125 = vst [vmem:[%s4827_s9] sm:$0xff] %v3124_v24   ;;  %v2596_v62 = vmul.f32 %v3725_v46, %v4774_v21 }
 0x19a   : > { %v2570_v5 = vadd.f32 1.0, %v3727_v12 }
 0x19c   : > { %v3729_v8 = vpop.eup %3728  ;;  %3740 = vrcp.f32 %v2570_v5 }
 0x19d   : > { %v3731_v54 = vpop.eup %3730  ;;  %v2597_v6 = vmul.f32 %v3729_v8, %v4783_v1 }
 0x19e   : > { %v2571_v31 = vadd.f32 1.0, %v3731_v54 }
 0x19f   : > { %v3129_v39 = vpack.c.bf16 %v2597_v6, %v2596_v62 }
 0x1a0   : > { %v3733_v4 = vpop.eup %3732  ;;  %3742 = vrcp.f32 %v2571_v31 }
 0x1a1   : > { %3146 = vst [vmem:[%s4827_s9 + $0x8] sm:$0xff] %v3129_v39   ;;  %v2572_v18 = vadd.f32 1.0, %v3733_v4  ;;  %v3735_v58 = vpop.eup %3734 }
 0x1a2   : > { %v2598_v22 = vmul.f32 %v3735_v58, %v4792_v14 }
 0x1a3   : > { %3744 = vrcp.f32 %v2572_v18 }
 0x1a4   : > { %v3737_v33 = vpop.eup %3736 }
 0x1a5   : > { %v3739_v9 = vpop.eup %3738  ;;  %v2573_v61 = vadd.f32 1.0, %v3737_v33 }
 0x1a6   : > { %v2599_v21 = vmul.f32 %v3739_v9, %v4801_v37 }
 0x1a7   : > { %3746 = vrcp.f32 %v2573_v61 }
 0x1a8   : > { %v3134_v1 = vpack.c.bf16 %v2599_v21, %v2598_v22 }
 0x1a9   : > { %v3741_v17 = vpop.eup %3740 }
 0x1aa   : > { %3147 = vst [vmem:[%s4827_s9 + $0x10] sm:$0xff] %v3134_v1   ;;  %v2600_v15 = vmul.f32 %v3741_v17, %v4810_v52 }
 0x1ad   : > { %v3743_v16 = vpop.eup %3742 }
 0x1ae   : > { %v2601_v59 = vmul.f32 %v3743_v16, %v4815_v53 }
 0x1b0   : > { %v3139_v63 = vpack.c.bf16 %v2601_v59, %v2600_v15  ;;  %v3745_v60 = vpop.eup %3744 }
 0x1b1   : > { %v2602_v11 = vmul.f32 %v3745_v60, %v2532_v30 }
 0x1b2   : > { %3148 = vst [vmem:[%s4827_s9 + $0x18] sm:$0xff] %v3139_v63  }
 0x1b4   : > { %v3747_v13 = vpop.eup %3746 }
 0x1b5   : > { %v2603_v35 = vmul.f32 %v3747_v13, %v2533_v57 }
 0x1b7   : > { %v3144_v29 = vpack.c.bf16 %v2603_v35, %v2602_v11 }
 0x1b9   : > { %3149 = vst [vmem:[%s4827_s9 + $0x20] sm:$0xff] %v3144_v29  }
 0x1ba PF: > { %s13_s12 = sadd.s32 1, %s3756_s12  }
 0x1bb   : > { %p10_p4 = scmp.ge.s32.totalorder %s13_s12, 4  }
 0x1bd   :  { %12 = sbr.rel (!%p10_p4) target bundleno = 1 (0x1), region = 65 }

// kernel: yolo_block4_forward.6
= control target key start
LH: loop header
LB: loop body
LE: loop exit
PB: predicated region body
PF: predicated region fallthrough
CT: control target
= control target key end

     0   :  { %s2419_s24 = smov 0   ;;  %s2790_s0 = inlined_call_operand.vmem [shape: bf16[512,128], index: 0, kind: input, shape index: {}]   ;;  %s2791_s1 = inlined_call_operand.vmem [shape: bf16[128,128], index: 1, kind: input, shape index: {}]   ;;  %s2792_s2 = inlined_call_operand.vmem [shape: f32[1,128], index: 2, kind: input, shape index: {}]   ;;  %s2793_s3 = inlined_call_operand.vmem [shape: bf16[256,128], index: 3, kind: input, shape index: {}]   ;;  %s2794_s4 = inlined_call_operand.vmem [shape: bf16[128,128], index: 4, kind: input, shape index: {}]   ;;  %s2795_s5 = inlined_call_operand.vmem [shape: f32[1,128], index: 5, kind: input, shape index: {}]   ;;  %s2796_s6 = inlined_call_operand.vmem [shape: bf16[512,128], index: 6, kind: output, shape index: {0}]   ;;  %s2797_s7 = inlined_call_operand.vmem [shape: bf16[512,128], index: 7, kind: output, shape index: {1}]  }
   0x1 LB: > { %s1621_s25 = sadd.s32 4294967295, %s2377_s24   ;;  %p1625_p0 = scmp.ge.s32.totalorder %s2377_s24, 1  ;;  %s2377_s24 = sphi %s2419_s24, %s18_s24  }
   0x2   : > { %p252_p1 = scmp.lt.s32.totalorder %s2377_s24, 3 }
   0x4   : > { %p253_p2 = pnand %p1625_p0, %p252_p1 }
   0x5   : > { %s1626_s28 = sshll.u32 (!%p253_p2), %s1621_s25, 5  ;;  %s1628_s22 = sshll.u32 (!%p253_p2), %s1621_s25, 4 }
   0x6   : > { %256 = sbr.rel (%p253_p2) target bundleno = 547 (0x223), region = 44  ;;  %p295_p3 = scmp.lt.s32.totalorder (!%p253_p2), %s1626_s28, 63 }
   0x7   : > { %p301_p4 = scmp.lt.s32.totalorder (!%p253_p2), %s1628_s22, 31 }
   0xb   : > { %v2211_v0 = vld [vmem:[%s2791_s1 + $0x38] sm:$0xff]   ;;  %v2212_v1 = vld [vmem:[%s2791_s1 + $0x30] sm:$0xff]   ;;  %s2799_s28 = smov (!%p295_p3, %s1626_s28), 63  ;;  %v2213_v2 = vld [vmem:[%s2791_s1 + $0x28] sm:$0xff]   ;;  %s2801_s22 = smov (!%p301_p4, %s1628_s22), 31 }
   0xc   : > { %2107 = vmatprep.subr.bf16.mxu0 %v2211_v0  ;;  %s2438_s10 = sshll.u32 %s2799_s28, 2  ;;  %v2214_v3 = vld [vmem:[%s2791_s1 + $0x20] sm:$0xff]   ;;  %v2215_v5 = vld [vmem:[%s2791_s1 + $0x18] sm:$0xff]   ;;  %v2216_v6 = vld [vmem:[%s2791_s1 + $0x10] sm:$0xff]   ;;  %s1629_s25 = sshll.u32 %s2801_s22, 2 }
   0xd   : > { %2108 = vmatpush3.bf16.msra.mxu0 %v2211_v0  ;;  %s2444_s13 = scalar_lea.vmem %s2790_s0, %s2438_s10  ;;  %v2217_v7 = vld [vmem:[%s2791_s1 + $0x8] sm:$0xff]   ;;  %v2218_v8 = vld [vmem:[%s2791_s1] sm:$0xff]   ;;  %v2235_v24 = vld [vmem:[%s2794_s4 + $0x38] sm:$0xff]   ;;  %s2571_s27 = scalar_lea.vmem %s2793_s3, %s1629_s25 }
   0xe   : > { %2109 = vmatprep.subr.bf16.mxu0 %v2212_v1  ;;  %v2219_v4 = vld [vmem:[%s2444_s13] sm:$0xff]   ;;  %v2220_v9 = vld [vmem:[%s2444_s13 + $0x8] sm:$0xff]   ;;  %v2221_v10 = vld [vmem:[%s2444_s13 + $0x10] sm:$0xff]   ;;  %2155 = vmatprep.subr.bf16.mxu1 %v2235_v24  ;;  %s2614_s30 = scalar_lea.vmem %s2796_s6, %s2438_s10 }
   0xf   : > { %2123 = vmatprep.mubr.bf16.mxu0 %v2219_v4  ;;  %v2222_v11 = vld [vmem:[%s2444_s13 + $0x18] sm:$0xff]   ;;  %v2223_v12 = vld [vmem:[%s2444_s13 + $0x20] sm:$0xff]   ;;  %v2224_v13 = vld [vmem:[%s2444_s13 + $0x28] sm:$0xff]   ;;  %2156 = vmatpush3.bf16.msra.mxu1 %v2235_v24 }
  0x10   : > { %v2225_v14 = vld [vmem:[%s2444_s13 + $0x30] sm:$0xff]   ;;  %v2226_v15 = vld [vmem:[%s2444_s13 + $0x38] sm:$0xff]   ;;  %v2227_v16 = vld [vmem:[%s2444_s13 + $0x40] sm:$0xff]  }
  0x11   : > { %2110 = vmatpush3.bf16.msra.mxu0 %v2212_v1  ;;  %v2228_v17 = vld [vmem:[%s2444_s13 + $0x48] sm:$0xff]   ;;  %v2229_v18 = vld [vmem:[%s2444_s13 + $0x50] sm:$0xff]   ;;  %v2230_v19 = vld [vmem:[%s2444_s13 + $0x58] sm:$0xff]  }
  0x12   : > { %2111 = vmatprep.subr.bf16.mxu0 %v2213_v2  ;;  %v2231_v20 = vld [vmem:[%s2444_s13 + $0x60] sm:$0xff]   ;;  %v2232_v21 = vld [vmem:[%s2444_s13 + $0x68] sm:$0xff]   ;;  %v2233_v22 = vld [vmem:[%s2444_s13 + $0x70] sm:$0xff]  }
  0x13   : > { %v2234_v23 = vld [vmem:[%s2444_s13 + $0x78] sm:$0xff]   ;;  %v2236_v25 = vld [vmem:[%s2794_s4 + $0x30] sm:$0xff]   ;;  %v2237_v26 = vld [vmem:[%s2794_s4 + $0x28] sm:$0xff]   ;;  %s2739_s13 = scalar_lea.vmem %s2797_s7, %s2438_s10 }
  0x14   : > { %2157 = vmatprep.subr.bf16.mxu1 %v2236_v25  ;;  %v2238_v27 = vld [vmem:[%s2794_s4 + $0x20] sm:$0xff]   ;;  %v2239_v28 = vld [vmem:[%s2794_s4 + $0x18] sm:$0xff]   ;;  %v2240_v29 = vld [vmem:[%s2794_s4 + $0x10] sm:$0xff]  }
  0x15   : > { %2112 = vmatpush3.bf16.msra.mxu0 %v2213_v2  ;;  %2158 = vmatpush3.bf16.msra.mxu1 %v2236_v25  ;;  %v2241_v30 = vld [vmem:[%s2794_s4 + $0x8] sm:$0xff]   ;;  %v2242_v31 = vld [vmem:[%s2794_s4] sm:$0xff]  }
  0x16   : > { %2113 = vmatprep.subr.bf16.mxu0 %v2214_v3  ;;  %2159 = vmatprep.subr.bf16.mxu1 %v2237_v26  ;;  %v2504_v32 = vld [vmem:[%s2792_s2] ss:$0 sm:$0xff] }
  0x19   : > { %2114 = vmatpush3.bf16.msra.mxu0 %v2214_v3  ;;  %2160 = vmatpush3.bf16.msra.mxu1 %v2237_v26 }
  0x1a   : > { %2115 = vmatprep.subr.bf16.mxu0 %v2215_v5  ;;  %2161 = vmatprep.subr.bf16.mxu1 %v2238_v27 }
  0x1d   : > { %2116 = vmatpush3.bf16.msra.mxu0 %v2215_v5  ;;  %2162 = vmatpush3.bf16.msra.mxu1 %v2238_v27 }
  0x1e   : > { %2117 = vmatprep.subr.bf16.mxu0 %v2216_v6  ;;  %2163 = vmatprep.subr.bf16.mxu1 %v2239_v28 }
  0x21   : > { %2118 = vmatpush3.bf16.msra.mxu0 %v2216_v6  ;;  %2164 = vmatpush3.bf16.msra.mxu1 %v2239_v28 }
  0x22   : > { %2119 = vmatprep.subr.bf16.mxu0 %v2217_v7  ;;  %2165 = vmatprep.subr.bf16.mxu1 %v2240_v29 }
  0x25   : > { %2120 = vmatpush3.bf16.msra.mxu0 %v2217_v7  ;;  %2166 = vmatpush3.bf16.msra.mxu1 %v2240_v29 }
  0x26   : > { %2121 = vmatprep.subr.bf16.mxu0 %v2218_v8  ;;  %2167 = vmatprep.subr.bf16.mxu1 %v2241_v30 }
  0x29   : > { %2122 = vmatpush3.bf16.msra.mxu0 %v2218_v8  ;;  %2168 = vmatpush3.bf16.msra.mxu1 %v2241_v30 }
  0x2a   : > { %2169 = vmatprep.subr.bf16.mxu1 %v2242_v31 }
  0x2c   : > { %2124 = vmatmul.mubr.bf16.vlgmr.msra.gmra.mxu0 %v2220_v9 }
  0x2d   : > { %2127 = vmatprep.mubr.bf16.mxu0 %v2221_v10  ;;  %2170 = vmatpush3.bf16.msra.mxu1 %v2242_v31 }
  0x34   : > { %2128 = vmatmul.mubr.bf16.gmra.mxu0 %v2222_v11 }
  0x35   : > { %2131 = vmatprep.mubr.bf16.mxu0 %v2223_v12 }
  0x3c   : > { %2132 = vmatmul.mubr.bf16.gmra.mxu0 %v2224_v13 }
  0x3d   : > { %2135 = vmatprep.mubr.bf16.mxu0 %v2225_v14 }
  0x44   : > { %2136 = vmatmul.mubr.bf16.gmra.mxu0 %v2226_v15 }
  0x45   : > { %2139 = vmatprep.mubr.bf16.mxu0 %v2227_v16 }
  0x4c   : > { %2140 = vmatmul.mubr.bf16.gmra.mxu0 %v2228_v17 }
  0x4d   : > { %2143 = vmatprep.mubr.bf16.mxu0 %v2229_v18 }
  0x54   : > { %2144 = vmatmul.mubr.bf16.gmra.mxu0 %v2230_v19 }
  0x55   : > { %2147 = vmatprep.mubr.bf16.mxu0 %v2231_v20 }
  0x5c   : > { %2148 = vmatmul.mubr.bf16.gmra.mxu0 %v2232_v21 }
  0x5d   : > { %2151 = vmatprep.mubr.bf16.mxu0 %v2233_v22 }
  0x64   : > { %2152 = vmatmul.mubr.bf16.gmra.mxu0 %v2234_v23 }
  0xec   : > { %v2125_v33 = vpop.f32.mrf.mxu0 }
  0xed   : > { %v2507_v34 = vadd.f32 %v2125_v33, %v2504_v32 }
  0xee   : > { %v552_v35 = vpop.f32.mrf.mxu0 }
  0xef   : > { %v1661_v36 = vmul.f32 -1.442695, %v2507_v34  ;;  %v2511_v37 = vadd.f32 %v2504_v32, %v552_v35 }
  0xf0   : > { %v2126_v38 = vpop.f32.mrf.mxu0 }
  0xf1   : > { %2243 = vpow2.f32 %v1661_v36  ;;  %v1659_v39 = vmul.f32 -1.442695, %v2511_v37  ;;  %v2515_v40 = vadd.f32 %v2126_v38, %v2504_v32 }
  0xf2   : > { %v555_v41 = vpop.f32.mrf.mxu0 }
  0xf3   : > { %2245 = vpow2.f32 %v1659_v39  ;;  %v1662_v42 = vmul.f32 -1.442695, %v2515_v40  ;;  %v2519_v43 = vadd.f32 %v2504_v32, %v555_v41  ;;  %v1831_v39 = vld [vmem:[%s2571_s27] sm:$0xff]  }
  0xf4   : > { %v2129_v44 = vpop.f32.mrf.mxu0 }
  0xf5   : > { %2247 = vpow2.f32 %v1662_v42  ;;  %v1660_v45 = vmul.f32 -1.442695, %v2519_v43  ;;  %v2523_v46 = vadd.f32 %v2129_v44, %v2504_v32 }
  0xf6   : > { %v568_v47 = vpop.f32.mrf.mxu0 }
  0xf7   : > { %2249 = vpow2.f32 %v1660_v45  ;;  %v1665_v48 = vmul.f32 -1.442695, %v2523_v46  ;;  %v2527_v49 = vadd.f32 %v2504_v32, %v568_v47 }
  0xf8   : > { %v2130_v50 = vpop.f32.mrf.mxu0 }
  0xf9   : > { %2251 = vpow2.f32 %v1665_v48  ;;  %v1663_v51 = vmul.f32 -1.442695, %v2527_v49  ;;  %v2531_v52 = vadd.f32 %v2130_v50, %v2504_v32 }
  0xfa   : > { %v571_v53 = vpop.f32.mrf.mxu0 }
  0xfb   : > { %2253 = vpow2.f32 %v1663_v51  ;;  %v1666_v54 = vmul.f32 -1.442695, %v2531_v52  ;;  %v2535_v55 = vadd.f32 %v2504_v32, %v571_v53  ;;  %v1832_v53 = vunpack.c.l.bf16 %v1831_v39 }
  0xfc   : > { %v2133_v56 = vpop.f32.mrf.mxu0 }
  0xfd   : > { %2255 = vpow2.f32 %v1666_v54  ;;  %v1664_v57 = vmul.f32 -1.442695, %v2535_v55  ;;  %v2541_v58 = vadd.f32 %v2133_v56, %v2504_v32  ;;  %v1833_v54 = vunpack.c.h.bf16 %v1831_v39 }
  0xfe   : > { %v2244_v59 = vpop.eup %2243  ;;  %v584_v60 = vpop.f32.mrf.mxu0 }
  0xff   : > { %v777_v61 = vadd.f32 1.0, %v2244_v59  ;;  %2257 = vpow2.f32 %v1664_v57  ;;  %v1669_v62 = vmul.f32 -1.442695, %v2541_v58  ;;  %v2545_v63 = vadd.f32 %v2504_v32, %v584_v60 }
 0x100   : > { %v2246_v0 = vpop.eup %2245  ;;  %v2134_v1 = vpop.f32.mrf.mxu0 }
 0x101   : > { %2259 = vrcp.f32 %v777_v61  ;;  %v775_v2 = vadd.f32 1.0, %v2246_v0  ;;  %v1667_v3 = vmul.f32 -1.442695, %v2545_v63  ;;  %v2549_v4 = vadd.f32 %v2134_v1, %v2504_v32 }
 0x102   : > { %v2248_v5 = vpop.eup %2247  ;;  %2261 = vpow2.f32 %v1669_v62  ;;  %v587_v6 = vpop.f32.mrf.mxu0 }
 0x103   : > { %2263 = vrcp.f32 %v775_v2  ;;  %v778_v7 = vadd.f32 1.0, %v2248_v5  ;;  %v1670_v8 = vmul.f32 -1.442695, %v2549_v4  ;;  %v2553_v9 = vadd.f32 %v2504_v32, %v587_v6 }
 0x104   : > { %v2250_v10 = vpop.eup %2249  ;;  %2265 = vpow2.f32 %v1667_v3  ;;  %v2137_v11 = vpop.f32.mrf.mxu0  ;;  %v2594_v3 = vld [vmem:[%s2571_s27 + $0x8] sm:$0xff]  }
 0x105   : > { %2267 = vrcp.f32 %v778_v7  ;;  %v776_v12 = vadd.f32 1.0, %v2250_v10  ;;  %v1668_v13 = vmul.f32 -1.442695, %v2553_v9  ;;  %v2558_v14 = vadd.f32 %v2137_v11, %v2504_v32 }
 0x106   : > { %v2252_v15 = vpop.eup %2251  ;;  %2269 = vpow2.f32 %v1670_v8  ;;  %v600_v16 = vpop.f32.mrf.mxu0 }
 0x107   : > { %2271 = vrcp.f32 %v776_v12  ;;  %v781_v17 = vadd.f32 1.0, %v2252_v15  ;;  %v1673_v18 = vmul.f32 -1.442695, %v2558_v14  ;;  %v2562_v19 = vadd.f32 %v2504_v32, %v600_v16 }
 0x108   : > { %v2254_v20 = vpop.eup %2253  ;;  %2273 = vpow2.f32 %v1668_v13  ;;  %v2138_v21 = vpop.f32.mrf.mxu0  ;;  %v1836_v16 = vunpack.c.l.bf16 %v2594_v3 }
 0x109   : > { %2275 = vrcp.f32 %v781_v17  ;;  %v779_v22 = vadd.f32 1.0, %v2254_v20  ;;  %v1671_v23 = vmul.f32 -1.442695, %v2562_v19  ;;  %v2566_v24 = vadd.f32 %v2138_v21, %v2504_v32 }
 0x10a   : > { %v2256_v25 = vpop.eup %2255  ;;  %2277 = vpow2.f32 %v1673_v18  ;;  %v603_v26 = vpop.f32.mrf.mxu0 }
 0x10b   : > { %2279 = vrcp.f32 %v779_v22  ;;  %v782_v27 = vadd.f32 1.0, %v2256_v25  ;;  %v1674_v28 = vmul.f32 -1.442695, %v2566_v24  ;;  %v2575_v29 = vadd.f32 %v2504_v32, %v603_v26  ;;  %v2617_v25 = vld [vmem:[%s2571_s27 + $0x10] sm:$0xff]  }
 0x10c   : > { %v2258_v30 = vpop.eup %2257  ;;  %2281 = vpow2.f32 %v1671_v23  ;;  %v2141_v31 = vpop.f32.mrf.mxu0 }
 0x10d   : > { %2283 = vrcp.f32 %v782_v27  ;;  %v780_v33 = vadd.f32 1.0, %v2258_v30  ;;  %v1672_v35 = vmul.f32 -1.442695, %v2575_v29  ;;  %v2579_v36 = vadd.f32 %v2141_v31, %v2504_v32 }
 0x10e   : > { %v2260_v38 = vpop.eup %2259  ;;  %2285 = vpow2.f32 %v1674_v28  ;;  %v616_v41 = vpop.f32.mrf.mxu0 }
 0x10f   : > { %v2262_v42 = vpop.eup %2261  ;;  %2287 = vrcp.f32 %v780_v33  ;;  %v1677_v44 = vmul.f32 -1.442695, %v2579_v36  ;;  %v2584_v45 = vadd.f32 %v2504_v32, %v616_v41  ;;  %v873_v59 = vmul.f32 %v2260_v38, %v2507_v34 }
 0x110   : > { %v2264_v47 = vpop.eup %2263  ;;  %v785_v48 = vadd.f32 1.0, %v2262_v42  ;;  %2289 = vpow2.f32 %v1672_v35  ;;  %v2142_v50 = vpop.f32.mrf.mxu0  ;;  %v1837_v35 = vunpack.c.h.bf16 %v2594_v3 }
 0x111   : > { %v2266_v51 = vpop.eup %2265  ;;  %2291 = vpow2.f32 %v1677_v44  ;;  %v1675_v56 = vmul.f32 -1.442695, %v2584_v45  ;;  %v2589_v61 = vadd.f32 %v2142_v50, %v2504_v32  ;;  %v871_v1 = vmul.f32 %v2264_v47, %v2511_v37 }
 0x112   : > { %v2268_v57 = vpop.eup %2267  ;;  %2293 = vrcp.f32 %v785_v48  ;;  %v783_v60 = vadd.f32 1.0, %v2266_v51  ;;  %v619_v62 = vpop.f32.mrf.mxu0  ;;  %v937_v15 = vadd.f32 %v1832_v53, %v873_v59 }
 0x113   : > { %v2270_v0 = vpop.eup %2269  ;;  %v874_v2 = vmul.f32 %v2268_v57, %v2515_v40  ;;  %2295 = vpow2.f32 %v1675_v56  ;;  %v2597_v5 = vadd.f32 %v2504_v32, %v619_v62  ;;  %v1678_v7 = vmul.f32 -1.442695, %v2589_v61 }
 0x114   : > { %v2272_v6 = vpop.eup %2271  ;;  %2297 = vrcp.f32 %v783_v60  ;;  %v786_v34 = vadd.f32 1.0, %v2270_v0  ;;  %v2145_v8 = vpop.f32.mrf.mxu0 }
 0x115   : > { %v2274_v10 = vpop.eup %2273  ;;  %v938_v11 = vadd.f32 %v1833_v54, %v874_v2  ;;  %v872_v12 = vmul.f32 %v2272_v6, %v2519_v43  ;;  %v1676_v37 = vmul.f32 -1.442695, %v2597_v5  ;;  %v2603_v40 = vadd.f32 %v2145_v8, %v2504_v32 }
 0x116   : > { %v2276_v13 = vpop.eup %2275  ;;  %2299 = vrcp.f32 %v786_v34  ;;  %v784_v17 = vadd.f32 1.0, %v2274_v10  ;;  %v632_v18 = vpop.f32.mrf.mxu0  ;;  %v935_v43 = vadd.f32 %v1832_v53, %v871_v1 }
 0x117   : > { %v2278_v20 = vpop.eup %2277  ;;  %2301 = vpow2.f32 %v1678_v7  ;;  %v1681_v21 = vmul.f32 -1.442695, %v2603_v40  ;;  %v2608_v22 = vadd.f32 %v2504_v32, %v632_v18  ;;  %v936_v28 = vadd.f32 %v1833_v54, %v872_v12  ;;  %v2643_v12 = vld [vmem:[%s2571_s27 + $0x18] sm:$0xff]  }
 0x118   : > { %v2280_v23 = vpop.eup %2279  ;;  %2303 = vrcp.f32 %v784_v17  ;;  %v789_v26 = vadd.f32 1.0, %v2278_v20  ;;  %v2146_v27 = vpop.f32.mrf.mxu0  ;;  %v968_v30 = vpack.c.bf16 %v938_v11, %v937_v15  ;;  %v877_v33 = vmul.f32 %v2276_v13, %v2523_v46 }
 0x119   : > { %v2282_v31 = vpop.eup %2281  ;;  %2305 = vpow2.f32 %v1676_v37  ;;  %v1679_v38 = vmul.f32 -1.442695, %v2608_v22  ;;  %v2623_v42 = vadd.f32 %v2146_v27, %v2504_v32  ;;  %v967_v47 = vpack.c.bf16 %v936_v28, %v935_v43 }
 0x11a   : > { %v2284_v39 = vpop.eup %2283  ;;  %2307 = vrcp.f32 %v789_v26  ;;  %v787_v41 = vadd.f32 1.0, %v2282_v31  ;;  %v635_v44 = vpop.f32.mrf.mxu0  ;;  %2029 = vst [vmem:[%s2614_s30 + $0x8] sm:$0xff] %v968_v30   ;;  %v1840_v46 = vunpack.c.l.bf16 %v2617_v25  ;;  %v875_v54 = vmul.f32 %v2280_v23, %v2527_v49 }
 0x11b   : > { %v2286_v48 = vpop.eup %2285  ;;  %v878_v50 = vmul.f32 %v2284_v39, %v2531_v52  ;;  %2309 = vpow2.f32 %v1681_v21  ;;  %v2629_v51 = vadd.f32 %v2504_v32, %v635_v44  ;;  %v1682_v57 = vmul.f32 -1.442695, %v2623_v42  ;;  %1866 = vst [vmem:[%s2614_s30] sm:$0xff] %v967_v47   ;;  %2171 = vmatprep.mubr.bf16.mxu1 %v967_v47 }
 0x11c   : > { %v2288_v53 = vpop.eup %2287  ;;  %2311 = vrcp.f32 %v787_v41  ;;  %v790_v56 = vadd.f32 1.0, %v2286_v48  ;;  %v2149_v59 = vpop.f32.mrf.mxu0  ;;  %v941_v62 = vadd.f32 %v1836_v16, %v877_v33  ;;  %2172 = vmatmul.mubr.bf16.vlgmr.msra.gmra.mxu1 %v968_v30  ;;  %v939_v11 = vadd.f32 %v1836_v16, %v875_v54 }
 0x11d   : > { %v2290_v60 = vpop.eup %2289  ;;  %v942_v0 = vadd.f32 %v1837_v35, %v878_v50  ;;  %v876_v52 = vmul.f32 %v2288_v53, %v2535_v55  ;;  %2313 = vpow2.f32 %v1679_v38  ;;  %v1680_v49 = vmul.f32 -1.442695, %v2629_v51 }
 0x11e   : > { %v2292_v1 = vpop.eup %2291  ;;  %2315 = vrcp.f32 %v790_v56  ;;  %v788_v2 = vadd.f32 1.0, %v2290_v60  ;;  %v2637_v3 = vadd.f32 %v2149_v59, %v2504_v32  ;;  %v648_v6 = vpop.f32.mrf.mxu0  ;;  %v1841_v16 = vunpack.c.h.bf16 %v2617_v25 }
 0x11f   : > { %v2294_v34 = vpop.eup %2293  ;;  %v940_v7 = vadd.f32 %v1837_v35, %v876_v52  ;;  %v793_v8 = vadd.f32 1.0, %v2292_v1  ;;  %2317 = vpow2.f32 %v1682_v57  ;;  %v2640_v10 = vadd.f32 %v2504_v32, %v648_v6 }
 0x120   : > { %v2296_v55 = vpop.eup %2295  ;;  %2319 = vrcp.f32 %v788_v2  ;;  %v1685_v37 = vmul.f32 -1.442695, %v2637_v3  ;;  %v2150_v13 = vpop.f32.mrf.mxu0  ;;  %v970_v15 = vpack.c.bf16 %v942_v0, %v941_v62  ;;  %v881_v43 = vmul.f32 %v2294_v34, %v2541_v58 }
 0x121   : > { %v2298_v17 = vpop.eup %2297  ;;  %2321 = vrcp.f32 %v793_v8  ;;  %v791_v18 = vadd.f32 1.0, %v2296_v55  ;;  %v1683_v20 = vmul.f32 -1.442695, %v2640_v10  ;;  %v2648_v21 = vadd.f32 %v2150_v13, %v2504_v32 }
 0x122   : > { %2323 = vpow2.f32 %v1680_v49  ;;  %v651_v23 = vpop.f32.mrf.mxu0  ;;  %v969_v26 = vpack.c.bf16 %v940_v7, %v939_v11  ;;  %2031 = vst [vmem:[%s2614_s30 + $0x18] sm:$0xff] %v970_v15   ;;  %v1844_v28 = vunpack.c.l.bf16 %v2643_v12  ;;  %v879_v35 = vmul.f32 %v2298_v17, %v2545_v63 }
 0x123   : > { %v2300_v27 = vpop.eup %2299  ;;  %2325 = vrcp.f32 %v791_v18  ;;  %v1686_v30 = vmul.f32 -1.442695, %v2648_v21  ;;  %v2656_v31 = vadd.f32 %v2504_v32, %v651_v23  ;;  %v1845_v38 = vunpack.c.h.bf16 %v2643_v12 }
 0x124   : > { %v2302_v33 = vpop.eup %2301  ;;  %v882_v58 = vmul.f32 %v2300_v27, %v2549_v4  ;;  %2327 = vpow2.f32 %v1685_v37  ;;  %2030 = vst [vmem:[%s2614_s30 + $0x10] sm:$0xff] %v969_v26   ;;  %2175 = vmatprep.mubr.bf16.mxu1 %v969_v26  ;;  %v2153_v39 = vpop.f32.mrf.mxu0  ;;  %v945_v63 = vadd.f32 %v1840_v46, %v881_v43  ;;  %v943_v0 = vadd.f32 %v1840_v46, %v879_v35 }
 0x125   : > { %v2304_v41 = vpop.eup %2303  ;;  %v794_v44 = vadd.f32 1.0, %v2302_v33  ;;  %2329 = vpow2.f32 %v1683_v20  ;;  %v1684_v47 = vmul.f32 -1.442695, %v2656_v31  ;;  %v2664_v48 = vadd.f32 %v2153_v39, %v2504_v32  ;;  %2176 = vmatmul.mubr.bf16.gmra.mxu1 %v970_v15  ;;  %v2025_v33 = vld [vmem:[%s2571_s27 + $0x20] sm:$0xff]  }
 0x126   : > { %v2306_v50 = vpop.eup %2305  ;;  %v946_v4 = vadd.f32 %v1841_v16, %v882_v58  ;;  %v880_v53 = vmul.f32 %v2304_v41, %v2553_v9  ;;  %2331 = vpow2.f32 %v1686_v30  ;;  %v664_v54 = vpop.f32.mrf.mxu0 }
 0x127   : > { %v2308_v56 = vpop.eup %2307  ;;  %2333 = vrcp.f32 %v794_v44  ;;  %v792_v57 = vadd.f32 1.0, %v2306_v50  ;;  %v1689_v59 = vmul.f32 -1.442695, %v2664_v48  ;;  %v2671_v60 = vadd.f32 %v2504_v32, %v664_v54 }
 0x128   : > { %v2310_v62 = vpop.eup %2309  ;;  %v944_v52 = vadd.f32 %v1841_v16, %v880_v53  ;;  %2335 = vpow2.f32 %v1684_v47  ;;  %v2154_v1 = vpop.f32.mrf.mxu0  ;;  %v972_v2 = vpack.c.bf16 %v946_v4, %v945_v63  ;;  %v885_v8 = vmul.f32 %v2308_v56, %v2558_v14 }
 0x129   : > { %v2312_v9 = vpop.eup %2311  ;;  %2337 = vrcp.f32 %v792_v57  ;;  %v797_v49 = vadd.f32 1.0, %v2310_v62  ;;  %v1687_v6 = vmul.f32 -1.442695, %v2671_v60  ;;  %v2677_v34 = vadd.f32 %v2154_v1, %v2504_v32 }
 0x12a   : > { %v2314_v7 = vpop.eup %2313  ;;  %v883_v25 = vmul.f32 %v2312_v9, %v2562_v19  ;;  %2339 = vpow2.f32 %v1689_v59  ;;  %v667_v46 = vpop.f32.mrf.mxu0  ;;  %v971_v55 = vpack.c.bf16 %v944_v52, %v943_v0  ;;  %2033 = vst [vmem:[%s2614_s30 + $0x28] sm:$0xff] %v972_v2   ;;  %v949_v16 = vadd.f32 %v1844_v28, %v885_v8 }
 0x12b   : > { %v2316_v11 = vpop.eup %2315  ;;  %2341 = vrcp.f32 %v797_v49  ;;  %v795_v37 = vadd.f32 1.0, %v2314_v7  ;;  %v1690_v13 = vmul.f32 -1.442695, %v2677_v34  ;;  %v2684_v15 = vadd.f32 %v2504_v32, %v667_v46 }
 0x12c   : > { %v2318_v17 = vpop.eup %2317  ;;  %v886_v18 = vmul.f32 %v2316_v11, %v2566_v24  ;;  %2343 = vpow2.f32 %v1687_v6  ;;  %2032 = vst [vmem:[%s2614_s30 + $0x20] sm:$0xff] %v971_v55   ;;  %2179 = vmatprep.mubr.bf16.mxu1 %v971_v55  ;;  %v947_v26 = vadd.f32 %v1844_v28, %v883_v25  ;;  %v1848_v28 = vunpack.c.l.bf16 %v2025_v33 }
 0x12d   : > { %v2320_v14 = vpop.eup %2319  ;;  %2345 = vrcp.f32 %v795_v37  ;;  %v798_v19 = vadd.f32 1.0, %v2318_v17  ;;  %v1688_v20 = vmul.f32 -1.442695, %v2684_v15  ;;  %2180 = vmatmul.mubr.bf16.gmra.mxu1 %v972_v2  ;;  %v1849_v63 = vunpack.c.h.bf16 %v2025_v33  ;;  %v2026_v2 = vld [vmem:[%s2571_s27 + $0x28] sm:$0xff]  }
 0x12e   : > { %v2322_v43 = vpop.eup %2321  ;;  %v950_v32 = vadd.f32 %v1845_v38, %v886_v18  ;;  %v884_v23 = vmul.f32 %v2320_v14, %v2575_v29  ;;  %2347 = vpow2.f32 %v1690_v13  ;;  %v1852_v55 = vunpack.c.l.bf16 %v2026_v2 }
 0x12f   : > { %v2324_v24 = vpop.eup %2323  ;;  %2349 = vrcp.f32 %v798_v19  ;;  %v889_v50 = vmul.f32 %v2322_v43, %v2579_v36  ;;  %v1853_v11 = vunpack.c.h.bf16 %v2026_v2  ;;  %v2027_v19 = vld [vmem:[%s2571_s27 + $0x30] sm:$0xff]  }
 0x130   : > { %v2326_v27 = vpop.eup %2325  ;;  %v948_v30 = vadd.f32 %v1845_v38, %v884_v23  ;;  %v796_v35 = vadd.f32 1.0, %v2324_v24  ;;  %2351 = vpow2.f32 %v1688_v20  ;;  %v974_v58 = vpack.c.bf16 %v950_v32, %v949_v16 }
 0x131   : > { %v2328_v39 = vpop.eup %2327  ;;  %v887_v54 = vmul.f32 %v2326_v27, %v2584_v45  ;;  %v953_v62 = vadd.f32 %v1848_v28, %v889_v50  ;;  %v1856_v24 = vunpack.c.l.bf16 %v2027_v19  ;;  %v1857_v33 = vunpack.c.h.bf16 %v2027_v19 }
 0x132   : > { %v2330_v41 = vpop.eup %2329  ;;  %2353 = vrcp.f32 %v796_v35  ;;  %v801_v29 = vadd.f32 1.0, %v2328_v39  ;;  %v973_v44 = vpack.c.bf16 %v948_v30, %v947_v26  ;;  %2035 = vst [vmem:[%s2614_s30 + $0x38] sm:$0xff] %v974_v58  }
 0x133   : > { %v2332_v47 = vpop.eup %2331  ;;  %v799_v4 = vadd.f32 1.0, %v2330_v41  ;;  %v951_v6 = vadd.f32 %v1848_v28, %v887_v54  ;;  %v2028_v28 = vld [vmem:[%s2571_s27 + $0x38] sm:$0xff]  }
 0x134   : > { %v2334_v53 = vpop.eup %2333  ;;  %2355 = vrcp.f32 %v801_v29  ;;  %v802_v12 = vadd.f32 1.0, %v2332_v47  ;;  %2034 = vst [vmem:[%s2614_s30 + $0x30] sm:$0xff] %v973_v44   ;;  %2183 = vmatprep.mubr.bf16.mxu1 %v973_v44 }
 0x135   : > { %v2336_v38 = vpop.eup %2335  ;;  %v890_v56 = vmul.f32 %v2334_v53, %v2589_v61  ;;  %2357 = vrcp.f32 %v799_v4  ;;  %2184 = vmatmul.mubr.bf16.gmra.mxu1 %v974_v58 }
 0x136   : > { %v2338_v57 = vpop.eup %2337  ;;  %2359 = vrcp.f32 %v802_v12  ;;  %v800_v59 = vadd.f32 1.0, %v2336_v38  ;;  %v1861_v12 = vunpack.c.h.bf16 %v2028_v28 }
 0x137   : > { %v2340_v36 = vpop.eup %2339  ;;  %v954_v0 = vadd.f32 %v1849_v63, %v890_v56  ;;  %v888_v52 = vmul.f32 %v2338_v57, %v2597_v5 }
 0x138   : > { %v2342_v1 = vpop.eup %2341  ;;  %2361 = vrcp.f32 %v800_v59  ;;  %v805_v9 = vadd.f32 1.0, %v2340_v36 }
 0x139   : > { %v2344_v49 = vpop.eup %2343  ;;  %v952_v45 = vadd.f32 %v1849_v63, %v888_v52  ;;  %v976_v61 = vpack.c.bf16 %v954_v0, %v953_v62  ;;  %v893_v46 = vmul.f32 %v2342_v1, %v2603_v40 }
 0x13a   : > { %v2346_v7 = vpop.eup %2345  ;;  %2363 = vrcp.f32 %v805_v9  ;;  %v803_v8 = vadd.f32 1.0, %v2344_v49 }
 0x13b   : > { %v2348_v25 = vpop.eup %2347  ;;  %v975_v5 = vpack.c.bf16 %v952_v45, %v951_v6  ;;  %2037 = vst [vmem:[%s2614_s30 + $0x48] sm:$0xff] %v976_v61   ;;  %v891_v14 = vmul.f32 %v2346_v7, %v2608_v22  ;;  %v957_v43 = vadd.f32 %v1852_v55, %v893_v46 }
 0x13c   : > { %v2350_v37 = vpop.eup %2349  ;;  %2365 = vrcp.f32 %v803_v8  ;;  %v806_v13 = vadd.f32 1.0, %v2348_v25 }
 0x13d   : > { %v2352_v17 = vpop.eup %2351  ;;  %v894_v18 = vmul.f32 %v2350_v37, %v2623_v42  ;;  %2036 = vst [vmem:[%s2614_s30 + $0x40] sm:$0xff] %v975_v5   ;;  %2187 = vmatprep.mubr.bf16.mxu1 %v975_v5  ;;  %v955_v27 = vadd.f32 %v1852_v55, %v891_v14 }
 0x13e   : > { %2367 = vrcp.f32 %v806_v13  ;;  %v804_v20 = vadd.f32 1.0, %v2352_v17  ;;  %2188 = vmatmul.mubr.bf16.gmra.mxu1 %v976_v61 }
 0x13f   : > { %v2354_v40 = vpop.eup %2353  ;;  %v958_v16 = vadd.f32 %v1853_v11, %v894_v18 }
 0x140   : > { %v892_v32 = vmul.f32 %v2354_v40, %v2629_v51  ;;  %2369 = vrcp.f32 %v804_v20 }
 0x141   : > { %v2356_v23 = vpop.eup %2355  ;;  %v978_v26 = vpack.c.bf16 %v958_v16, %v957_v43 }
 0x142   : > { %v2358_v42 = vpop.eup %2357  ;;  %v956_v30 = vadd.f32 %v1853_v11, %v892_v32  ;;  %v897_v22 = vmul.f32 %v2356_v23, %v2637_v3 }
 0x143   : > { %v2360_v35 = vpop.eup %2359  ;;  %2039 = vst [vmem:[%s2614_s30 + $0x58] sm:$0xff] %v978_v26   ;;  %v895_v58 = vmul.f32 %v2358_v42, %v2640_v10 }
 0x144   : > { %v898_v39 = vmul.f32 %v2360_v35, %v2648_v21  ;;  %v977_v41 = vpack.c.bf16 %v956_v30, %v955_v27  ;;  %v961_v29 = vadd.f32 %v1856_v24, %v897_v22  ;;  %v1860_v21 = vunpack.c.l.bf16 %v2028_v28 }
 0x145   : > { %v2362_v51 = vpop.eup %2361  ;;  %v959_v3 = vadd.f32 %v1856_v24, %v895_v58 }
 0x146   : > { %v962_v44 = vadd.f32 %v1857_v33, %v898_v39  ;;  %v896_v47 = vmul.f32 %v2362_v51, %v2656_v31  ;;  %2038 = vst [vmem:[%s2614_s30 + $0x50] sm:$0xff] %v977_v41   ;;  %2191 = vmatprep.mubr.bf16.mxu1 %v977_v41 }
 0x147   : > { %v2364_v50 = vpop.eup %2363  ;;  %2192 = vmatmul.mubr.bf16.gmra.mxu1 %v978_v26 }
 0x148   : > { %v960_v63 = vadd.f32 %v1857_v33, %v896_v47  ;;  %v980_v4 = vpack.c.bf16 %v962_v44, %v961_v29  ;;  %v901_v10 = vmul.f32 %v2364_v50, %v2664_v48 }
 0x149   : > { %v2366_v53 = vpop.eup %2365 }
 0x14a   : > { %v979_v38 = vpack.c.bf16 %v960_v63, %v959_v3  ;;  %2041 = vst [vmem:[%s2614_s30 + $0x68] sm:$0xff] %v980_v4   ;;  %v899_v31 = vmul.f32 %v2366_v53, %v2671_v60  ;;  %v965_v59 = vadd.f32 %v1860_v21, %v901_v10 }
 0x14b   : > { %v2368_v54 = vpop.eup %2367 }
 0x14c   : > { %v902_v56 = vmul.f32 %v2368_v54, %v2677_v34  ;;  %2040 = vst [vmem:[%s2614_s30 + $0x60] sm:$0xff] %v979_v38   ;;  %2195 = vmatprep.mubr.bf16.mxu1 %v979_v38  ;;  %v963_v48 = vadd.f32 %v1860_v21, %v899_v31  ;;  %v2731_v34 = vld [vmem:[%s2795_s5] ss:$0 sm:$0xff] }
 0x14d   : > { %v2370_v57 = vpop.eup %2369 }
 0x14e   : > { %v966_v36 = vadd.f32 %v1861_v12, %v902_v56  ;;  %v900_v62 = vmul.f32 %v2370_v57, %v2684_v15 }
 0x14f   : > { %2196 = vmatmul.mubr.bf16.gmra.mxu1 %v980_v4 }
 0x150   : > { %v964_v0 = vadd.f32 %v1861_v12, %v900_v62  ;;  %v982_v52 = vpack.c.bf16 %v966_v36, %v965_v59 }
 0x152   : > { %v981_v1 = vpack.c.bf16 %v964_v0, %v963_v48  ;;  %2043 = vst [vmem:[%s2614_s30 + $0x78] sm:$0xff] %v982_v52  }
 0x154   : > { %2042 = vst [vmem:[%s2614_s30 + $0x70] sm:$0xff] %v981_v1   ;;  %2199 = vmatprep.mubr.bf16.mxu1 %v981_v1 }
 0x157   : > { %2200 = vmatmul.mubr.bf16.gmra.mxu1 %v982_v52 }
 0x1dc   : > { %v2173_v60 = vpop.f32.mrf.mxu1 }
 0x1dd   : > { %v1241_v15 = vadd.f32 %v2173_v60, %v2731_v34 }
 0x1de   : > { %v1232_v2 = vpop.f32.mrf.mxu1 }
 0x1df   : > { %v1233_v45 = vadd.f32 %v2731_v34, %v1232_v2 }
 0x1e0   : > { %v2174_v9 = vpop.f32.mrf.mxu1 }
 0x1e1   : > { %v1244_v49 = vadd.f32 %v2174_v9, %v2731_v34 }
 0x1e2   : > { %v1235_v6 = vpop.f32.mrf.mxu1 }
 0x1e3   : > { %v1950_v61 = vpack.c.bf16 %v1244_v49, %v1241_v15  ;;  %v1236_v7 = vadd.f32 %v2731_v34, %v1235_v6 }
 0x1e5   : > { %v2177_v8 = vpop.f32.mrf.mxu1  ;;  %2044 = vst [vmem:[%s2739_s13 + $0x8] sm:$0xff] %v1950_v61   ;;  %v1945_v25 = vpack.c.bf16 %v1236_v7, %v1233_v45 }
 0x1e6   : > { %v1257_v11 = vadd.f32 %v2177_v8, %v2731_v34 }
 0x1e7   : > { %v1248_v46 = vpop.f32.mrf.mxu1  ;;  %1946 = vst [vmem:[%s2739_s13] sm:$0xff] %v1945_v25  }
 0x1e8   : > { %v1249_v13 = vadd.f32 %v2731_v34, %v1248_v46 }
 0x1e9   : > { %v2178_v55 = vpop.f32.mrf.mxu1 }
 0x1ea   : > { %v1260_v5 = vadd.f32 %v2178_v55, %v2731_v34 }
 0x1eb   : > { %v1251_v37 = vpop.f32.mrf.mxu1 }
 0x1ec   : > { %v1960_v17 = vpack.c.bf16 %v1260_v5, %v1257_v11  ;;  %v1252_v18 = vadd.f32 %v2731_v34, %v1251_v37 }
 0x1ed   : > { %v2181_v14 = vpop.f32.mrf.mxu1 }
 0x1ee   : > { %2046 = vst [vmem:[%s2739_s13 + $0x18] sm:$0xff] %v1960_v17   ;;  %v1955_v19 = vpack.c.bf16 %v1252_v18, %v1249_v13  ;;  %v1273_v43 = vadd.f32 %v2181_v14, %v2731_v34 }
 0x1ef   : > { %v1264_v20 = vpop.f32.mrf.mxu1 }
 0x1f0   : > { %2045 = vst [vmem:[%s2739_s13 + $0x10] sm:$0xff] %v1955_v19   ;;  %v1265_v23 = vadd.f32 %v2731_v34, %v1264_v20 }
 0x1f1   : > { %v2182_v40 = vpop.f32.mrf.mxu1 }
 0x1f2   : > { %v1276_v16 = vadd.f32 %v2182_v40, %v2731_v34 }
 0x1f3   : > { %v1267_v32 = vpop.f32.mrf.mxu1 }
 0x1f4   : > { %v1970_v24 = vpack.c.bf16 %v1276_v16, %v1273_v43  ;;  %v1268_v26 = vadd.f32 %v2731_v34, %v1267_v32 }
 0x1f5   : > { %v2185_v42 = vpop.f32.mrf.mxu1 }
 0x1f6   : > { %2048 = vst [vmem:[%s2739_s13 + $0x28] sm:$0xff] %v1970_v24   ;;  %v1965_v27 = vpack.c.bf16 %v1268_v26, %v1265_v23  ;;  %v1289_v33 = vadd.f32 %v2185_v42, %v2731_v34 }
 0x1f7   : > { %v1280_v30 = vpop.f32.mrf.mxu1 }
 0x1f8   : > { %2047 = vst [vmem:[%s2739_s13 + $0x20] sm:$0xff] %v1965_v27   ;;  %v1281_v39 = vadd.f32 %v2731_v34, %v1280_v30 }
 0x1f9   : > { %v2186_v22 = vpop.f32.mrf.mxu1 }
 0x1fa   : > { %v1292_v35 = vadd.f32 %v2186_v22, %v2731_v34 }
 0x1fb   : > { %v1283_v58 = vpop.f32.mrf.mxu1 }
 0x1fc   : > { %v1980_v41 = vpack.c.bf16 %v1292_v35, %v1289_v33  ;;  %v1284_v51 = vadd.f32 %v2731_v34, %v1283_v58 }
 0x1fe   : > { %2050 = vst [vmem:[%s2739_s13 + $0x38] sm:$0xff] %v1980_v41   ;;  %v1975_v29 = vpack.c.bf16 %v1284_v51, %v1281_v39  ;;  %v2189_v44 = vpop.f32.mrf.mxu1 }
 0x1ff   : > { %v1305_v28 = vadd.f32 %v2189_v44, %v2731_v34 }
 0x200   : > { %2049 = vst [vmem:[%s2739_s13 + $0x30] sm:$0xff] %v1975_v29   ;;  %v1296_v47 = vpop.f32.mrf.mxu1 }
 0x201   : > { %v1297_v4 = vadd.f32 %v2731_v34, %v1296_v47 }
 0x202   : > { %v2190_v50 = vpop.f32.mrf.mxu1 }
 0x203   : > { %v1308_v3 = vadd.f32 %v2190_v50, %v2731_v34 }
 0x204   : > { %v1299_v63 = vpop.f32.mrf.mxu1 }
 0x205   : > { %v1990_v53 = vpack.c.bf16 %v1308_v3, %v1305_v28  ;;  %v1300_v10 = vadd.f32 %v2731_v34, %v1299_v63 }
 0x207   : > { %2052 = vst [vmem:[%s2739_s13 + $0x48] sm:$0xff] %v1990_v53   ;;  %v1985_v21 = vpack.c.bf16 %v1300_v10, %v1297_v4  ;;  %v2193_v12 = vpop.f32.mrf.mxu1 }
 0x208   : > { %v1321_v31 = vadd.f32 %v2193_v12, %v2731_v34 }
 0x209   : > { %2051 = vst [vmem:[%s2739_s13 + $0x40] sm:$0xff] %v1985_v21   ;;  %v1312_v38 = vpop.f32.mrf.mxu1 }
 0x20a   : > { %v1313_v59 = vadd.f32 %v2731_v34, %v1312_v38 }
 0x20b   : > { %v2194_v54 = vpop.f32.mrf.mxu1 }
 0x20c   : > { %v1324_v56 = vadd.f32 %v2194_v54, %v2731_v34 }
 0x20d   : > { %v1315_v57 = vpop.f32.mrf.mxu1 }
 0x20e   : > { %v2000_v36 = vpack.c.bf16 %v1324_v56, %v1321_v31  ;;  %v1316_v62 = vadd.f32 %v2731_v34, %v1315_v57 }
 0x20f   : > { %v2197_v48 = vpop.f32.mrf.mxu1 }
 0x210   : > { %2054 = vst [vmem:[%s2739_s13 + $0x58] sm:$0xff] %v2000_v36   ;;  %v1995_v0 = vpack.c.bf16 %v1316_v62, %v1313_v59  ;;  %v1337_v60 = vadd.f32 %v2197_v48, %v2731_v34 }
 0x211   : > { %v1328_v52 = vpop.f32.mrf.mxu1 }
 0x212   : > { %2053 = vst [vmem:[%s2739_s13 + $0x50] sm:$0xff] %v1995_v0   ;;  %v1329_v15 = vadd.f32 %v2731_v34, %v1328_v52 }
 0x213   : > { %v2198_v1 = vpop.f32.mrf.mxu1 }
 0x214   : > { %v1340_v2 = vadd.f32 %v2198_v1, %v2731_v34 }
 0x215   : > { %v1331_v9 = vpop.f32.mrf.mxu1 }
 0x216   : > { %v2010_v49 = vpack.c.bf16 %v1340_v2, %v1337_v60  ;;  %v1332_v6 = vadd.f32 %v2731_v34, %v1331_v9 }
 0x217   : > { %v2201_v45 = vpop.f32.mrf.mxu1 }
 0x218   : > { %2056 = vst [vmem:[%s2739_s13 + $0x68] sm:$0xff] %v2010_v49   ;;  %v2005_v61 = vpack.c.bf16 %v1332_v6, %v1329_v15  ;;  %v1353_v25 = vadd.f32 %v2201_v45, %v2731_v34 }
 0x219   : > { %v1344_v7 = vpop.f32.mrf.mxu1 }
 0x21a   : > { %2055 = vst [vmem:[%s2739_s13 + $0x60] sm:$0xff] %v2005_v61   ;;  %v1345_v11 = vadd.f32 %v2731_v34, %v1344_v7 }
 0x21b   : > { %v2202_v8 = vpop.f32.mrf.mxu1 }
 0x21c   : > { %v1356_v46 = vadd.f32 %v2202_v8, %v2731_v34 }
 0x21d   : > { %v1347_v55 = vpop.f32.mrf.mxu1 }
 0x21e   : > { %v2020_v5 = vpack.c.bf16 %v1356_v46, %v1353_v25  ;;  %v1348_v37 = vadd.f32 %v2731_v34, %v1347_v55 }
 0x220   : > { %2058 = vst [vmem:[%s2739_s13 + $0x78] sm:$0xff] %v2020_v5   ;;  %v2015_v13 = vpack.c.bf16 %v1348_v37, %v1345_v11 }
 0x222   : > { %2057 = vst [vmem:[%s2739_s13 + $0x70] sm:$0xff] %v2015_v13  }
 0x223 PF: > { %s18_s24 = sadd.s32 1, %s2377_s24  }
 0x224   : > { %p15_p5 = scmp.ge.s32.totalorder %s18_s24, 4  }
 0x226   :  { %17 = sbr.rel (!%p15_p5) target bundleno = 1 (0x1), region = 89 }

// kernel: yolo_block4_forward.7
= control target key start
LH: loop header
LB: loop body
LE: loop exit
PB: predicated region body
PF: predicated region fallthrough
CT: control target
= control target key end

     0   :  { %s6045_s21 = smov 0   ;;  %s7452_s0 = inlined_call_operand.vmem [shape: bf16[2048,128], index: 0, kind: input, shape index: {}]   ;;  %s7453_s1 = inlined_call_operand.vmem [shape: bf16[128,128], index: 1, kind: input, shape index: {}]   ;;  %s7454_s2 = inlined_call_operand.vmem [shape: f32[1,128], index: 2, kind: input, shape index: {}]   ;;  %s7455_s3 = inlined_call_operand.vmem [shape: bf16[1024,128], index: 3, kind: input, shape index: {}]   ;;  %s7456_s4 = inlined_call_operand.vmem [shape: bf16[128,128], index: 4, kind: input, shape index: {}]   ;;  %s7457_s5 = inlined_call_operand.vmem [shape: f32[1,128], index: 5, kind: input, shape index: {}]   ;;  %s7458_s6 = inlined_call_operand.vmem [shape: bf16[2048,128], index: 6, kind: output, shape index: {}]  }
   0x1 LB: > { %s3946_s22 = sadd.s32 4294967295, %s6008_s21   ;;  %p3950_p0 = scmp.ge.s32.totalorder %s6008_s21, 1  ;;  %s6008_s21 = sphi %s6045_s21, %s16_s21  }
   0x2   : > { %p224_p1 = scmp.lt.s32.totalorder %s6008_s21, 3 }
   0x4   : > { %p225_p2 = pnand %p3950_p0, %p224_p1 }
   0x5   : > { %s3951_s25 = sshll.u32 (!%p225_p2), %s3946_s22, 7  ;;  %s3953_s19 = sshll.u32 (!%p225_p2), %s3946_s22, 6 }
   0x6   : > { %228 = sbr.rel (%p225_p2) target bundleno = 743 (0x2e7), region = 44  ;;  %p260_p3 = scmp.lt.s32.totalorder (!%p225_p2), %s3951_s25, 255 }
   0x7   : > { %p266_p4 = scmp.lt.s32.totalorder (!%p225_p2), %s3953_s19, 127 }
   0xb   : > { %v5407_v0 = vld [vmem:[%s7453_s1 + $0x38] sm:$0xff]   ;;  %v5408_v1 = vld [vmem:[%s7453_s1 + $0x30] sm:$0xff]   ;;  %s7460_s25 = smov (!%p260_p3, %s3951_s25), 255  ;;  %v5409_v2 = vld [vmem:[%s7453_s1 + $0x28] sm:$0xff]   ;;  %s7462_s19 = smov (!%p266_p4, %s3953_s19), 127 }
   0xc   : > { %5111 = vmatprep.subr.bf16.mxu0 %v5407_v0  ;;  %s3952_s30 = sshll.u32 %s7460_s25, 2  ;;  %v5410_v3 = vld [vmem:[%s7453_s1 + $0x20] sm:$0xff]   ;;  %v5411_v5 = vld [vmem:[%s7453_s1 + $0x18] sm:$0xff]   ;;  %v5412_v6 = vld [vmem:[%s7453_s1 + $0x10] sm:$0xff]   ;;  %s3954_s22 = sshll.u32 %s7462_s19, 2 }
   0xd   : > { %5112 = vmatpush3.bf16.msra.mxu0 %v5407_v0  ;;  %s6072_s9 = scalar_lea.vmem %s7452_s0, %s3952_s30  ;;  %v5413_v7 = vld [vmem:[%s7453_s1 + $0x8] sm:$0xff]   ;;  %v5414_v8 = vld [vmem:[%s7453_s1] sm:$0xff]   ;;  %v5469_v31 = vld [vmem:[%s7456_s4 + $0x38] sm:$0xff]   ;;  %s6245_s24 = scalar_lea.vmem %s7455_s3, %s3954_s22 }
   0xe   : > { %5113 = vmatprep.subr.bf16.mxu0 %v5408_v1  ;;  %v5415_v4 = vld [vmem:[%s6072_s9] sm:$0xff]   ;;  %v5416_v9 = vld [vmem:[%s6072_s9 + $0x8] sm:$0xff]   ;;  %v5417_v10 = vld [vmem:[%s6072_s9 + $0x10] sm:$0xff]   ;;  %5255 = vmatprep.subr.bf16.mxu1 %v5469_v31  ;;  %s7160_s11 = scalar_lea.vmem %s7458_s6, %s3952_s30 }
   0xf   : > { %5127 = vmatprep.mubr.bf16.mxu0 %v5415_v4  ;;  %v5418_v11 = vld [vmem:[%s6072_s9 + $0x18] sm:$0xff]   ;;  %v5419_v12 = vld [vmem:[%s6072_s9 + $0x20] sm:$0xff]   ;;  %v5420_v13 = vld [vmem:[%s6072_s9 + $0x28] sm:$0xff]   ;;  %5256 = vmatpush3.bf16.msra.mxu1 %v5469_v31 }
  0x10   : > { %v5421_v14 = vld [vmem:[%s6072_s9 + $0x30] sm:$0xff]   ;;  %v5422_v15 = vld [vmem:[%s6072_s9 + $0x38] sm:$0xff]   ;;  %v5423_v16 = vld [vmem:[%s6072_s9 + $0x40] sm:$0xff]  }
  0x11   : > { %5114 = vmatpush3.bf16.msra.mxu0 %v5408_v1  ;;  %v5424_v17 = vld [vmem:[%s6072_s9 + $0x48] sm:$0xff]   ;;  %v5425_v18 = vld [vmem:[%s6072_s9 + $0x50] sm:$0xff]   ;;  %v5426_v19 = vld [vmem:[%s6072_s9 + $0x58] sm:$0xff]  }
  0x12   : > { %5115 = vmatprep.subr.bf16.mxu0 %v5409_v2  ;;  %v5427_v20 = vld [vmem:[%s6072_s9 + $0x60] sm:$0xff]   ;;  %v5428_v21 = vld [vmem:[%s6072_s9 + $0x68] sm:$0xff]   ;;  %v5429_v22 = vld [vmem:[%s6072_s9 + $0x70] sm:$0xff]  }
  0x13   : > { %v5430_v23 = vld [vmem:[%s6072_s9 + $0x78] sm:$0xff]   ;;  %v5431_v24 = vld [vmem:[%s6072_s9 + $0x80] sm:$0xff]   ;;  %v5432_v25 = vld [vmem:[%s6072_s9 + $0x88] sm:$0xff]  }
  0x14   : > { %v5433_v26 = vld [vmem:[%s6072_s9 + $0x90] sm:$0xff]   ;;  %v5434_v27 = vld [vmem:[%s6072_s9 + $0x98] sm:$0xff]   ;;  %v5435_v28 = vld [vmem:[%s6072_s9 + $0xa0] sm:$0xff]  }
  0x15   : > { %5116 = vmatpush3.bf16.msra.mxu0 %v5409_v2  ;;  %v5436_v29 = vld [vmem:[%s6072_s9 + $0xa8] sm:$0xff]   ;;  %v5437_v30 = vld [vmem:[%s6072_s9 + $0xb0] sm:$0xff]   ;;  %v5438_v33 = vld [vmem:[%s6072_s9 + $0xb8] sm:$0xff]  }
  0x16   : > { %5117 = vmatprep.subr.bf16.mxu0 %v5410_v3  ;;  %v5470_v32 = vld [vmem:[%s7456_s4 + $0x30] sm:$0xff]   ;;  %v5439_v34 = vld [vmem:[%s6072_s9 + $0xc0] sm:$0xff]   ;;  %v5473_v35 = vld [vmem:[%s7456_s4 + $0x28] sm:$0xff]  }
  0x17   : > { %5257 = vmatprep.subr.bf16.mxu1 %v5470_v32  ;;  %v5474_v36 = vld [vmem:[%s7456_s4 + $0x20] sm:$0xff]   ;;  %v5440_v37 = vld [vmem:[%s6072_s9 + $0xc8] sm:$0xff]   ;;  %v5441_v38 = vld [vmem:[%s6072_s9 + $0xd0] sm:$0xff]  }
  0x18   : > { %5258 = vmatpush3.bf16.msra.mxu1 %v5470_v32  ;;  %v5477_v39 = vld [vmem:[%s7456_s4 + $0x18] sm:$0xff]   ;;  %v5478_v41 = vld [vmem:[%s7456_s4 + $0x10] sm:$0xff]   ;;  %v5443_v42 = vld [vmem:[%s6072_s9 + $0xe0] sm:$0xff]  }
  0x19   : > { %5118 = vmatpush3.bf16.msra.mxu0 %v5410_v3  ;;  %5259 = vmatprep.subr.bf16.mxu1 %v5473_v35  ;;  %v5442_v40 = vld [vmem:[%s6072_s9 + $0xd8] sm:$0xff]   ;;  %v5481_v43 = vld [vmem:[%s7456_s4 + $0x8] sm:$0xff]   ;;  %v5482_v45 = vld [vmem:[%s7456_s4] sm:$0xff]  }
  0x1a   : > { %5119 = vmatprep.subr.bf16.mxu0 %v5411_v5  ;;  %v5444_v44 = vld [vmem:[%s6072_s9 + $0xe8] sm:$0xff]   ;;  %v5445_v46 = vld [vmem:[%s6072_s9 + $0xf0] sm:$0xff]   ;;  %v5446_v47 = vld [vmem:[%s6072_s9 + $0xf8] sm:$0xff]  }
  0x1b   : > { %v5447_v48 = vld [vmem:[%s6072_s9 + $0x100] sm:$0xff]   ;;  %v5448_v49 = vld [vmem:[%s6072_s9 + $0x108] sm:$0xff]   ;;  %v5449_v50 = vld [vmem:[%s6072_s9 + $0x110] sm:$0xff]  }
  0x1c   : > { %5260 = vmatpush3.bf16.msra.mxu1 %v5473_v35  ;;  %v5450_v51 = vld [vmem:[%s6072_s9 + $0x118] sm:$0xff]   ;;  %v5451_v52 = vld [vmem:[%s6072_s9 + $0x120] sm:$0xff]   ;;  %v5452_v53 = vld [vmem:[%s6072_s9 + $0x128] sm:$0xff]  }
  0x1d   : > { %5120 = vmatpush3.bf16.msra.mxu0 %v5411_v5  ;;  %5261 = vmatprep.subr.bf16.mxu1 %v5474_v36  ;;  %v5453_v54 = vld [vmem:[%s6072_s9 + $0x130] sm:$0xff]   ;;  %v5454_v55 = vld [vmem:[%s6072_s9 + $0x138] sm:$0xff]   ;;  %v5455_v56 = vld [vmem:[%s6072_s9 + $0x140] sm:$0xff]  }
  0x1e   : > { %5121 = vmatprep.subr.bf16.mxu0 %v5412_v6  ;;  %v5456_v57 = vld [vmem:[%s6072_s9 + $0x148] sm:$0xff]   ;;  %v5457_v58 = vld [vmem:[%s6072_s9 + $0x150] sm:$0xff]   ;;  %v5458_v59 = vld [vmem:[%s6072_s9 + $0x158] sm:$0xff]  }
  0x1f   : > { %v5459_v60 = vld [vmem:[%s6072_s9 + $0x160] sm:$0xff]   ;;  %v5460_v61 = vld [vmem:[%s6072_s9 + $0x168] sm:$0xff]   ;;  %v5461_v62 = vld [vmem:[%s6072_s9 + $0x170] sm:$0xff]  }
  0x20   : > { %5262 = vmatpush3.bf16.msra.mxu1 %v5474_v36  ;;  %v5462_v63 = vld [vmem:[%s6072_s9 + $0x178] sm:$0xff]   ;;  %v5463_v0 = vld [vmem:[%s6072_s9 + $0x180] sm:$0xff]   ;;  %v5464_v1 = vld [vmem:[%s6072_s9 + $0x188] sm:$0xff]  }
  0x21   : > { %5122 = vmatpush3.bf16.msra.mxu0 %v5412_v6  ;;  %5263 = vmatprep.subr.bf16.mxu1 %v5477_v39  ;;  %v5465_v2 = vld [vmem:[%s6072_s9 + $0x190] sm:$0xff]   ;;  %v6167_v3 = vld [vmem:[%s7454_s2] ss:$0 sm:$0xff] }
  0x22   : > { %5123 = vmatprep.subr.bf16.mxu0 %v5413_v7 }
  0x24   : > { %5264 = vmatpush3.bf16.msra.mxu1 %v5477_v39 }
  0x25   : > { %5124 = vmatpush3.bf16.msra.mxu0 %v5413_v7  ;;  %5265 = vmatprep.subr.bf16.mxu1 %v5478_v41 }
  0x26   : > { %5125 = vmatprep.subr.bf16.mxu0 %v5414_v8 }
  0x28   : > { %5266 = vmatpush3.bf16.msra.mxu1 %v5478_v41  ;;  %v5472_v41 = vld [vmem:[%s6072_s9 + $0x1b8] sm:$0xff]  }
  0x29   : > { %5126 = vmatpush3.bf16.msra.mxu0 %v5414_v8  ;;  %5267 = vmatprep.subr.bf16.mxu1 %v5481_v43 }
  0x2c   : > { %5128 = vmatmul.mubr.bf16.vlgmr.msra.gmra.mxu0 %v5416_v9  ;;  %5268 = vmatpush3.bf16.msra.mxu1 %v5481_v43 }
  0x2d   : > { %5131 = vmatprep.mubr.bf16.mxu0 %v5417_v10  ;;  %5269 = vmatprep.subr.bf16.mxu1 %v5482_v45  ;;  %v5466_v10 = vld [vmem:[%s6072_s9 + $0x198] sm:$0xff]  }
  0x30   : > { %5270 = vmatpush3.bf16.msra.mxu1 %v5482_v45  ;;  %v5475_v45 = vld [vmem:[%s6072_s9 + $0x1c0] sm:$0xff]  }
  0x34   : > { %5132 = vmatmul.mubr.bf16.gmra.mxu0 %v5418_v11 }
  0x35   : > { %5135 = vmatprep.mubr.bf16.mxu0 %v5419_v12 }
  0x3c   : > { %5136 = vmatmul.mubr.bf16.gmra.mxu0 %v5420_v13  ;;  %v5467_v13 = vld [vmem:[%s6072_s9 + $0x1a0] sm:$0xff]  }
  0x3d   : > { %5139 = vmatprep.mubr.bf16.mxu0 %v5421_v14 }
  0x44   : > { %5140 = vmatmul.mubr.bf16.gmra.mxu0 %v5422_v15 }
  0x45   : > { %5143 = vmatprep.mubr.bf16.mxu0 %v5423_v16 }
  0x4c   : > { %5144 = vmatmul.mubr.bf16.gmra.mxu0 %v5424_v17 }
  0x4d   : > { %5147 = vmatprep.mubr.bf16.mxu0 %v5425_v18 }
  0x54   : > { %5148 = vmatmul.mubr.bf16.gmra.mxu0 %v5426_v19 }
  0x55   : > { %5151 = vmatprep.mubr.bf16.mxu0 %v5427_v20 }
  0x5c   : > { %5152 = vmatmul.mubr.bf16.gmra.mxu0 %v5428_v21 }
  0x5d   : > { %5155 = vmatprep.mubr.bf16.mxu0 %v5429_v22 }
  0x64   : > { %5156 = vmatmul.mubr.bf16.gmra.mxu0 %v5430_v23 }
  0x65   : > { %5159 = vmatprep.mubr.bf16.mxu0 %v5431_v24  ;;  %v5468_v24 = vld [vmem:[%s6072_s9 + $0x1a8] sm:$0xff]  }
  0x6c   : > { %5160 = vmatmul.mubr.bf16.gmra.mxu0 %v5432_v25 }
  0x6d   : > { %5163 = vmatprep.mubr.bf16.mxu0 %v5433_v26 }
  0x74   : > { %5164 = vmatmul.mubr.bf16.gmra.mxu0 %v5434_v27  ;;  %v5471_v27 = vld [vmem:[%s6072_s9 + $0x1b0] sm:$0xff]  }
  0x75   : > { %5167 = vmatprep.mubr.bf16.mxu0 %v5435_v28 }
  0x7c   : > { %5168 = vmatmul.mubr.bf16.gmra.mxu0 %v5436_v29 }
  0x7d   : > { %5171 = vmatprep.mubr.bf16.mxu0 %v5437_v30 }
  0x84   : > { %5172 = vmatmul.mubr.bf16.gmra.mxu0 %v5438_v33 }
  0x85   : > { %5175 = vmatprep.mubr.bf16.mxu0 %v5439_v34 }
  0x8c   : > { %5176 = vmatmul.mubr.bf16.gmra.mxu0 %v5440_v37 }
  0x8d   : > { %5179 = vmatprep.mubr.bf16.mxu0 %v5441_v38 }
  0x94   : > { %5180 = vmatmul.mubr.bf16.gmra.mxu0 %v5442_v40 }
  0x95   : > { %5183 = vmatprep.mubr.bf16.mxu0 %v5443_v42 }
  0x9c   : > { %5184 = vmatmul.mubr.bf16.gmra.mxu0 %v5444_v44 }
  0x9d   : > { %5187 = vmatprep.mubr.bf16.mxu0 %v5445_v46 }
  0xa4   : > { %5188 = vmatmul.mubr.bf16.gmra.mxu0 %v5446_v47 }
  0xa5   : > { %5191 = vmatprep.mubr.bf16.mxu0 %v5447_v48 }
  0xac   : > { %5192 = vmatmul.mubr.bf16.gmra.mxu0 %v5448_v49 }
  0xad   : > { %5195 = vmatprep.mubr.bf16.mxu0 %v5449_v50 }
  0xb4   : > { %5196 = vmatmul.mubr.bf16.gmra.mxu0 %v5450_v51 }
  0xb5   : > { %5199 = vmatprep.mubr.bf16.mxu0 %v5451_v52 }
  0xbc   : > { %5200 = vmatmul.mubr.bf16.gmra.mxu0 %v5452_v53 }
  0xbd   : > { %5203 = vmatprep.mubr.bf16.mxu0 %v5453_v54 }
  0xc4   : > { %5204 = vmatmul.mubr.bf16.gmra.mxu0 %v5454_v55 }
  0xc5   : > { %5207 = vmatprep.mubr.bf16.mxu0 %v5455_v56 }
  0xcc   : > { %5208 = vmatmul.mubr.bf16.gmra.mxu0 %v5456_v57 }
  0xcd   : > { %5211 = vmatprep.mubr.bf16.mxu0 %v5457_v58 }
  0xd4   : > { %5212 = vmatmul.mubr.bf16.gmra.mxu0 %v5458_v59 }
  0xd5   : > { %5215 = vmatprep.mubr.bf16.mxu0 %v5459_v60 }
  0xdc   : > { %5216 = vmatmul.mubr.bf16.gmra.mxu0 %v5460_v61 }
  0xdd   : > { %5219 = vmatprep.mubr.bf16.mxu0 %v5461_v62 }
  0xe4   : > { %5220 = vmatmul.mubr.bf16.gmra.mxu0 %v5462_v63  ;;  %v5476_v63 = vld [vmem:[%s6072_s9 + $0x1c8] sm:$0xff]  }
  0xe5   : > { %5223 = vmatprep.mubr.bf16.mxu0 %v5463_v0 }
  0xec   : > { %v5129_v4 = vpop.f32.mrf.mxu0  ;;  %5224 = vmatmul.mubr.bf16.gmra.mxu0 %v5464_v1 }
  0xed   : > { %v6170_v5 = vadd.f32 %v5129_v4, %v6167_v3  ;;  %5227 = vmatprep.mubr.bf16.mxu0 %v5465_v2  ;;  %v5479_v4 = vld [vmem:[%s6072_s9 + $0x1d0] sm:$0xff]  }
  0xee   : > { %v895_v6 = vpop.f32.mrf.mxu0 }
  0xef   : > { %v4032_v7 = vmul.f32 -1.442695, %v6170_v5  ;;  %v6174_v8 = vadd.f32 %v6167_v3, %v895_v6 }
  0xf0   : > { %v5130_v9 = vpop.f32.mrf.mxu0 }
  0xf1   : > { %5487 = vpow2.f32 %v4032_v7  ;;  %v4030_v11 = vmul.f32 -1.442695, %v6174_v8  ;;  %v6179_v12 = vadd.f32 %v5130_v9, %v6167_v3 }
  0xf2   : > { %v898_v14 = vpop.f32.mrf.mxu0 }
  0xf3   : > { %5489 = vpow2.f32 %v4030_v11  ;;  %v4033_v15 = vmul.f32 -1.442695, %v6179_v12  ;;  %v6184_v16 = vadd.f32 %v6167_v3, %v898_v14 }
  0xf4   : > { %v5133_v17 = vpop.f32.mrf.mxu0  ;;  %5228 = vmatmul.mubr.bf16.gmra.mxu0 %v5466_v10 }
  0xf5   : > { %5491 = vpow2.f32 %v4033_v15  ;;  %v4031_v18 = vmul.f32 -1.442695, %v6184_v16  ;;  %v6188_v19 = vadd.f32 %v5133_v17, %v6167_v3  ;;  %5231 = vmatprep.mubr.bf16.mxu0 %v5467_v13 }
  0xf6   : > { %v911_v20 = vpop.f32.mrf.mxu0 }
  0xf7   : > { %5493 = vpow2.f32 %v4031_v18  ;;  %v4036_v21 = vmul.f32 -1.442695, %v6188_v19  ;;  %v6192_v22 = vadd.f32 %v6167_v3, %v911_v20 }
  0xf8   : > { %v5134_v23 = vpop.f32.mrf.mxu0 }
  0xf9   : > { %5495 = vpow2.f32 %v4036_v21  ;;  %v4034_v25 = vmul.f32 -1.442695, %v6192_v22  ;;  %v6197_v26 = vadd.f32 %v5134_v23, %v6167_v3  ;;  %v6256_v21 = vld [vmem:[%s6245_s24 + $0x8] sm:$0xff]  }
  0xfa   : > { %v914_v28 = vpop.f32.mrf.mxu0 }
  0xfb   : > { %5497 = vpow2.f32 %v4034_v25  ;;  %v4037_v29 = vmul.f32 -1.442695, %v6197_v26  ;;  %v6202_v30 = vadd.f32 %v6167_v3, %v914_v28  ;;  %v6263_v28 = vld [vmem:[%s6245_s24] sm:$0xff]  }
  0xfc   : > { %v5137_v31 = vpop.f32.mrf.mxu0  ;;  %5232 = vmatmul.mubr.bf16.gmra.mxu0 %v5468_v24 }
  0xfd   : > { %5499 = vpow2.f32 %v4037_v29  ;;  %v4035_v32 = vmul.f32 -1.442695, %v6202_v30  ;;  %v6208_v33 = vadd.f32 %v5137_v31, %v6167_v3  ;;  %5235 = vmatprep.mubr.bf16.mxu0 %v5471_v27 }
  0xfe   : > { %v5488_v34 = vpop.eup %5487  ;;  %v927_v35 = vpop.f32.mrf.mxu0 }
  0xff   : > { %v1792_v36 = vadd.f32 1.0, %v5488_v34  ;;  %5501 = vpow2.f32 %v4035_v32  ;;  %v4040_v37 = vmul.f32 -1.442695, %v6208_v33  ;;  %v6212_v38 = vadd.f32 %v6167_v3, %v927_v35  ;;  %v5480_v34 = vld [vmem:[%s6072_s9 + $0x1d8] sm:$0xff]  }
 0x100   : > { %v5490_v39 = vpop.eup %5489  ;;  %v5138_v40 = vpop.f32.mrf.mxu0 }
 0x101   : > { %5503 = vrcp.f32 %v1792_v36  ;;  %v1790_v42 = vadd.f32 1.0, %v5490_v39  ;;  %v4038_v43 = vmul.f32 -1.442695, %v6212_v38  ;;  %v6217_v44 = vadd.f32 %v5138_v40, %v6167_v3  ;;  %v5483_v40 = vld [vmem:[%s6072_s9 + $0x1e0] sm:$0xff]  }
 0x102   : > { %v5492_v46 = vpop.eup %5491  ;;  %5505 = vpow2.f32 %v4040_v37  ;;  %v930_v47 = vpop.f32.mrf.mxu0  ;;  %v4431_v36 = vunpack.c.l.bf16 %v6256_v21  ;;  %v4432_v37 = vunpack.c.h.bf16 %v6256_v21 }
 0x103   : > { %5507 = vrcp.f32 %v1790_v42  ;;  %v1793_v48 = vadd.f32 1.0, %v5492_v46  ;;  %v4041_v49 = vmul.f32 -1.442695, %v6217_v44  ;;  %v6222_v50 = vadd.f32 %v6167_v3, %v930_v47 }
 0x104   : > { %v5494_v51 = vpop.eup %5493  ;;  %5509 = vpow2.f32 %v4038_v43  ;;  %v5141_v52 = vpop.f32.mrf.mxu0  ;;  %5236 = vmatmul.mubr.bf16.gmra.mxu0 %v5472_v41  ;;  %v4427_v46 = vunpack.c.l.bf16 %v6263_v28 }
 0x105   : > { %5511 = vrcp.f32 %v1793_v48  ;;  %v1791_v53 = vadd.f32 1.0, %v5494_v51  ;;  %v4039_v54 = vmul.f32 -1.442695, %v6222_v50  ;;  %v6229_v55 = vadd.f32 %v5141_v52, %v6167_v3  ;;  %5239 = vmatprep.mubr.bf16.mxu0 %v5475_v45 }
 0x106   : > { %v5496_v56 = vpop.eup %5495  ;;  %5513 = vpow2.f32 %v4041_v49  ;;  %v943_v57 = vpop.f32.mrf.mxu0  ;;  %v6276_v49 = vld [vmem:[%s6245_s24 + $0x18] sm:$0xff]   ;;  %v4428_v52 = vunpack.c.h.bf16 %v6263_v28 }
 0x107   : > { %5515 = vrcp.f32 %v1791_v53  ;;  %v1796_v58 = vadd.f32 1.0, %v5496_v56  ;;  %v4044_v59 = vmul.f32 -1.442695, %v6229_v55  ;;  %v6233_v60 = vadd.f32 %v6167_v3, %v943_v57 }
 0x108   : > { %v5498_v61 = vpop.eup %5497  ;;  %5517 = vpow2.f32 %v4039_v54  ;;  %v5142_v62 = vpop.f32.mrf.mxu0 }
 0x109   : > { %5519 = vrcp.f32 %v1796_v58  ;;  %v1794_v0 = vadd.f32 1.0, %v5498_v61  ;;  %v4042_v1 = vmul.f32 -1.442695, %v6233_v60  ;;  %v6239_v2 = vadd.f32 %v5142_v62, %v6167_v3 }
 0x10a   : > { %v5500_v6 = vpop.eup %5499  ;;  %5521 = vpow2.f32 %v4044_v59  ;;  %v946_v7 = vpop.f32.mrf.mxu0 }
 0x10b   : > { %5523 = vrcp.f32 %v1794_v0  ;;  %v1797_v9 = vadd.f32 1.0, %v5500_v6  ;;  %v4045_v10 = vmul.f32 -1.442695, %v6239_v2  ;;  %v6249_v11 = vadd.f32 %v6167_v3, %v946_v7 }
 0x10c   : > { %v5502_v13 = vpop.eup %5501  ;;  %5525 = vpow2.f32 %v4042_v1  ;;  %v5145_v14 = vpop.f32.mrf.mxu0  ;;  %5240 = vmatmul.mubr.bf16.gmra.mxu0 %v5476_v63 }
 0x10d   : > { %5527 = vrcp.f32 %v1797_v9  ;;  %v1795_v15 = vadd.f32 1.0, %v5502_v13  ;;  %v4043_v17 = vmul.f32 -1.442695, %v6249_v11  ;;  %v6253_v18 = vadd.f32 %v5145_v14, %v6167_v3  ;;  %5243 = vmatprep.mubr.bf16.mxu0 %v5479_v4 }
 0x10e   : > { %v5504_v20 = vpop.eup %5503  ;;  %5529 = vpow2.f32 %v4045_v10  ;;  %v959_v23 = vpop.f32.mrf.mxu0 }
 0x10f   : > { %v5506_v24 = vpop.eup %5505  ;;  %5531 = vrcp.f32 %v1795_v15  ;;  %v4048_v25 = vmul.f32 -1.442695, %v6253_v18  ;;  %v6260_v27 = vadd.f32 %v6167_v3, %v959_v23 }
 0x110   : > { %v5508_v29 = vpop.eup %5507  ;;  %v1800_v31 = vadd.f32 1.0, %v5506_v24  ;;  %5533 = vpow2.f32 %v4043_v17  ;;  %v5146_v32 = vpop.f32.mrf.mxu0  ;;  %v5484_v17 = vld [vmem:[%s6072_s9 + $0x1e8] sm:$0xff]  }
 0x111   : > { %v5510_v35 = vpop.eup %5509  ;;  %5535 = vpow2.f32 %v4048_v25  ;;  %v4046_v39 = vmul.f32 -1.442695, %v6260_v27  ;;  %v6271_v43 = vadd.f32 %v5146_v32, %v6167_v3  ;;  %v2174_v54 = vmul.f32 %v5508_v29, %v6174_v8  ;;  %v5485_v29 = vld [vmem:[%s6072_s9 + $0x1f0] sm:$0xff]  }
 0x112   : > { %v5512_v41 = vpop.eup %5511  ;;  %5537 = vrcp.f32 %v1800_v31  ;;  %v1798_v42 = vadd.f32 1.0, %v5510_v35  ;;  %v962_v45 = vpop.f32.mrf.mxu0  ;;  %v4439_v8 = vunpack.c.l.bf16 %v6276_v49  ;;  %v6308_v32 = vld [vmem:[%s6245_s24 + $0x10] sm:$0xff]  }
 0x113   : > { %v5514_v47 = vpop.eup %5513  ;;  %v2177_v48 = vmul.f32 %v5512_v41, %v6179_v12  ;;  %5539 = vpow2.f32 %v4046_v39  ;;  %v6279_v51 = vadd.f32 %v6167_v3, %v962_v45  ;;  %v4049_v57 = vmul.f32 -1.442695, %v6271_v43 }
 0x114   : > { %v5516_v53 = vpop.eup %5515  ;;  %5541 = vrcp.f32 %v1798_v42  ;;  %v1801_v56 = vadd.f32 1.0, %v5514_v47  ;;  %v5149_v58 = vpop.f32.mrf.mxu0  ;;  %5244 = vmatmul.mubr.bf16.gmra.mxu0 %v5480_v34  ;;  %v2176_v12 = vmul.f32 %v5504_v20, %v6170_v5  ;;  %v2430_v14 = vadd.f32 %v4427_v46, %v2174_v54 }
 0x115   : > { %v5518_v59 = vpop.eup %5517  ;;  %v2175_v61 = vmul.f32 %v5516_v53, %v6184_v16  ;;  %v4047_v62 = vmul.f32 -1.442695, %v6279_v51  ;;  %v6288_v63 = vadd.f32 %v5149_v58, %v6167_v3  ;;  %5247 = vmatprep.mubr.bf16.mxu0 %v5483_v40  ;;  %v2433_v7 = vadd.f32 %v4432_v37, %v2177_v48 }
 0x116   : > { %v5520_v0 = vpop.eup %5519  ;;  %5543 = vrcp.f32 %v1801_v56  ;;  %v1799_v1 = vadd.f32 1.0, %v5518_v59  ;;  %v975_v4 = vpop.f32.mrf.mxu0  ;;  %v2432_v23 = vadd.f32 %v4431_v36, %v2176_v12  ;;  %v4435_v59 = vunpack.c.l.bf16 %v6308_v32 }
 0x117   : > { %v5522_v6 = vpop.eup %5521  ;;  %5545 = vpow2.f32 %v4049_v57  ;;  %v4052_v5 = vmul.f32 -1.442695, %v6288_v63  ;;  %v6295_v16 = vadd.f32 %v6167_v3, %v975_v4  ;;  %v2431_v15 = vadd.f32 %v4428_v52, %v2175_v61 }
 0x118   : > { %v5524_v9 = vpop.eup %5523  ;;  %5547 = vrcp.f32 %v1799_v1  ;;  %v1804_v10 = vadd.f32 1.0, %v5522_v6  ;;  %v5150_v13 = vpop.f32.mrf.mxu0  ;;  %v2180_v24 = vmul.f32 %v5520_v0, %v6188_v19  ;;  %v2559_v45 = vpack.c.bf16 %v2433_v7, %v2432_v23 }
 0x119   : > { %v5526_v20 = vpop.eup %5525  ;;  %5549 = vpow2.f32 %v4047_v62  ;;  %v4050_v25 = vmul.f32 -1.442695, %v6295_v16  ;;  %v6311_v35 = vadd.f32 %v5150_v13, %v6167_v3  ;;  %v2558_v40 = vpack.c.bf16 %v2431_v15, %v2430_v14  ;;  %v5486_v13 = vld [vmem:[%s6072_s9 + $0x1f8] sm:$0xff]  }
 0x11a   : > { %v5528_v31 = vpop.eup %5527  ;;  %5551 = vrcp.f32 %v1804_v10  ;;  %v1802_v34 = vadd.f32 1.0, %v5526_v20  ;;  %v978_v39 = vpop.f32.mrf.mxu0  ;;  %v2178_v48 = vmul.f32 %v5524_v9, %v6192_v22  ;;  %v2436_v7 = vadd.f32 %v4431_v36, %v2180_v24 }
 0x11b   : > { %v5530_v41 = vpop.eup %5529  ;;  %v2181_v42 = vmul.f32 %v5528_v31, %v6197_v26  ;;  %5553 = vpow2.f32 %v4052_v5  ;;  %v6315_v19 = vadd.f32 %v6167_v3, %v978_v39  ;;  %v4053_v54 = vmul.f32 -1.442695, %v6311_v35  ;;  %5271 = vmatprep.mubr.bf16.mxu1 %v2558_v40 }
 0x11c   : > { %v5532_v47 = vpop.eup %5531  ;;  %5555 = vrcp.f32 %v1802_v34  ;;  %v1805_v53 = vadd.f32 1.0, %v5530_v41  ;;  %v5153_v56 = vpop.f32.mrf.mxu0  ;;  %5248 = vmatmul.mubr.bf16.gmra.mxu0 %v5484_v17  ;;  %5272 = vmatmul.mubr.bf16.vlgmr.msra.gmra.mxu1 %v2559_v45  ;;  %v2434_v10 = vadd.f32 %v4427_v46, %v2178_v48  ;;  %v4436_v21 = vunpack.c.h.bf16 %v6308_v32 }
 0x11d   : > { %v5534_v57 = vpop.eup %5533  ;;  %v2437_v58 = vadd.f32 %v4432_v37, %v2181_v42  ;;  %v2179_v26 = vmul.f32 %v5532_v47, %v6202_v30  ;;  %5557 = vpow2.f32 %v4050_v25  ;;  %5251 = vmatprep.mubr.bf16.mxu0 %v5485_v29  ;;  %v4051_v61 = vmul.f32 -1.442695, %v6315_v19 }
 0x11e   : > { %v5536_v12 = vpop.eup %5535  ;;  %5559 = vrcp.f32 %v1805_v53  ;;  %v1803_v22 = vadd.f32 1.0, %v5534_v57  ;;  %v6325_v62 = vadd.f32 %v5153_v56, %v6167_v3  ;;  %v991_v0 = vpop.f32.mrf.mxu0 }
 0x11f   : > { %v5538_v1 = vpop.eup %5537  ;;  %v1808_v4 = vadd.f32 1.0, %v5536_v12  ;;  %5561 = vpow2.f32 %v4053_v54  ;;  %v6328_v30 = vadd.f32 %v6167_v3, %v991_v0  ;;  %v2435_v37 = vadd.f32 %v4428_v52, %v2179_v26 }
 0x120   : > { %v5540_v6 = vpop.eup %5539  ;;  %5563 = vrcp.f32 %v1803_v22  ;;  %v4056_v5 = vmul.f32 -1.442695, %v6325_v62  ;;  %v5154_v9 = vpop.f32.mrf.mxu0  ;;  %v4440_v52 = vunpack.c.h.bf16 %v6276_v49  ;;  %v2561_v25 = vpack.c.bf16 %v2437_v58, %v2436_v7 }
 0x121   : > { %v5542_v14 = vpop.eup %5541  ;;  %5565 = vrcp.f32 %v1808_v4  ;;  %v1806_v15 = vadd.f32 1.0, %v5540_v6  ;;  %v4054_v17 = vmul.f32 -1.442695, %v6328_v30  ;;  %v6340_v20 = vadd.f32 %v5154_v9, %v6167_v3 }
 0x122   : > { %5567 = vpow2.f32 %v4051_v61  ;;  %v994_v36 = vpop.f32.mrf.mxu0  ;;  %v2560_v23 = vpack.c.bf16 %v2435_v37, %v2434_v10  ;;  %v2184_v31 = vmul.f32 %v5538_v1, %v6208_v33  ;;  %v2182_v34 = vmul.f32 %v5542_v14, %v6212_v38  ;;  %v6373_v10 = vld [vmem:[%s6245_s24 + $0x28] sm:$0xff]  }
 0x123   : > { %v5544_v24 = vpop.eup %5543  ;;  %5569 = vrcp.f32 %v1806_v15  ;;  %v4057_v28 = vmul.f32 -1.442695, %v6340_v20  ;;  %v6346_v46 = vadd.f32 %v6167_v3, %v994_v36 }
 0x124   : > { %v5546_v29 = vpop.eup %5545  ;;  %v2185_v39 = vmul.f32 %v5544_v24, %v6217_v44  ;;  %5571 = vpow2.f32 %v4056_v5  ;;  %5275 = vmatprep.mubr.bf16.mxu1 %v2560_v23  ;;  %v5157_v40 = vpop.f32.mrf.mxu0  ;;  %5252 = vmatmul.mubr.bf16.gmra.mxu0 %v5486_v13  ;;  %v2440_v26 = vadd.f32 %v4439_v8, %v2184_v31  ;;  %v2438_v12 = vadd.f32 %v4435_v59, %v2182_v34  ;;  %v6376_v13 = vld [vmem:[%s6245_s24 + $0x20] sm:$0xff]  }
 0x125   : > { %v5548_v41 = vpop.eup %5547  ;;  %v1809_v42 = vadd.f32 1.0, %v5546_v29  ;;  %5573 = vpow2.f32 %v4054_v17  ;;  %v4055_v45 = vmul.f32 -1.442695, %v6346_v46  ;;  %v6353_v47 = vadd.f32 %v5157_v40, %v6167_v3  ;;  %5276 = vmatmul.mubr.bf16.gmra.mxu1 %v2561_v25 }
 0x126   : > { %v5550_v48 = vpop.eup %5549  ;;  %v2441_v33 = vadd.f32 %v4440_v52, %v2185_v39  ;;  %v2183_v38 = vmul.f32 %v5548_v41, %v6222_v50  ;;  %5575 = vpow2.f32 %v4057_v28  ;;  %v1007_v44 = vpop.f32.mrf.mxu0 }
 0x127   : > { %v5552_v53 = vpop.eup %5551  ;;  %5577 = vrcp.f32 %v1809_v42  ;;  %v1807_v54 = vadd.f32 1.0, %v5550_v48  ;;  %v4060_v56 = vmul.f32 -1.442695, %v6353_v47  ;;  %v6360_v57 = vadd.f32 %v6167_v3, %v1007_v44 }
 0x128   : > { %v5554_v58 = vpop.eup %5553  ;;  %v2439_v50 = vadd.f32 %v4436_v21, %v2183_v38  ;;  %5579 = vpow2.f32 %v4055_v45  ;;  %v5158_v22 = vpop.f32.mrf.mxu0  ;;  %v2563_v5 = vpack.c.bf16 %v2441_v33, %v2440_v26  ;;  %v2188_v23 = vmul.f32 %v5552_v53, %v6229_v55 }
 0x129   : > { %v5556_v61 = vpop.eup %5555  ;;  %5581 = vrcp.f32 %v1807_v54  ;;  %v1812_v0 = vadd.f32 1.0, %v5554_v58  ;;  %v4058_v1 = vmul.f32 -1.442695, %v6360_v57  ;;  %v6370_v4 = vadd.f32 %v5158_v22, %v6167_v3 }
 0x12a   : > { %v5558_v37 = vpop.eup %5557  ;;  %5583 = vpow2.f32 %v4060_v56  ;;  %v1010_v6 = vpop.f32.mrf.mxu0  ;;  %v2562_v7 = vpack.c.bf16 %v2439_v50, %v2438_v12  ;;  %v2186_v24 = vmul.f32 %v5556_v61, %v6233_v60  ;;  %v4447_v55 = vunpack.c.l.bf16 %v6373_v10  ;;  %v6410_v61 = vld [vmem:[%s6245_s24 + $0x38] sm:$0xff]  }
 0x12b   : > { %v5560_v9 = vpop.eup %5559  ;;  %5585 = vrcp.f32 %v1812_v0  ;;  %v1810_v14 = vadd.f32 1.0, %v5558_v37  ;;  %v4061_v15 = vmul.f32 -1.442695, %v6370_v4  ;;  %v6380_v17 = vadd.f32 %v6167_v3, %v1010_v6 }
 0x12c   : > { %v5562_v36 = vpop.eup %5561  ;;  %v2189_v28 = vmul.f32 %v5560_v9, %v6239_v2  ;;  %5587 = vpow2.f32 %v4058_v1  ;;  %5279 = vmatprep.mubr.bf16.mxu1 %v2562_v7  ;;  %v5161_v25 = vpop.f32.mrf.mxu0  ;;  %v4443_v60 = vunpack.c.l.bf16 %v6376_v13  ;;  %v4448_v58 = vunpack.c.h.bf16 %v6373_v10 }
 0x12d   : > { %v5564_v29 = vpop.eup %5563  ;;  %5589 = vrcp.f32 %v1810_v14  ;;  %v1813_v31 = vadd.f32 1.0, %v5562_v36  ;;  %v4059_v34 = vmul.f32 -1.442695, %v6380_v17  ;;  %v6387_v39 = vadd.f32 %v5161_v25, %v6167_v3  ;;  %5280 = vmatmul.mubr.bf16.gmra.mxu1 %v2563_v5 }
 0x12e   : > { %v5566_v40 = vpop.eup %5565  ;;  %v2187_v41 = vmul.f32 %v5564_v29, %v6249_v11  ;;  %5591 = vpow2.f32 %v4061_v15  ;;  %v1023_v2 = vpop.f32.mrf.mxu0  ;;  %v2445_v45 = vadd.f32 %v4440_v52, %v2189_v28  ;;  %v2442_v11 = vadd.f32 %v4435_v59, %v2186_v24  ;;  %v6419_v15 = vld [vmem:[%s6245_s24 + $0x30] sm:$0xff]  }
 0x12f   : > { %v5568_v42 = vpop.eup %5567  ;;  %5593 = vrcp.f32 %v1813_v31  ;;  %v4064_v48 = vmul.f32 -1.442695, %v6387_v39  ;;  %v6396_v33 = vadd.f32 %v6167_v3, %v1023_v2  ;;  %v2444_v52 = vadd.f32 %v4439_v8, %v2188_v23 }
 0x130   : > { %v5570_v38 = vpop.eup %5569  ;;  %v2443_v44 = vadd.f32 %v4436_v21, %v2187_v41  ;;  %v1811_v53 = vadd.f32 1.0, %v5568_v42  ;;  %5595 = vpow2.f32 %v4059_v34  ;;  %v5162_v54 = vpop.f32.mrf.mxu0  ;;  %v4444_v37 = vunpack.c.h.bf16 %v6376_v13 }
 0x131   : > { %v5572_v56 = vpop.eup %5571  ;;  %5597 = vpow2.f32 %v4064_v48  ;;  %v4062_v26 = vmul.f32 -1.442695, %v6396_v33  ;;  %v6407_v59 = vadd.f32 %v5162_v54, %v6167_v3  ;;  %v2565_v8 = vpack.c.bf16 %v2445_v45, %v2444_v52 }
 0x132   : > { %v5574_v12 = vpop.eup %5573  ;;  %5599 = vrcp.f32 %v1811_v53  ;;  %v1816_v50 = vadd.f32 1.0, %v5572_v56  ;;  %v1026_v32 = vpop.f32.mrf.mxu0  ;;  %v2564_v21 = vpack.c.bf16 %v2443_v44, %v2442_v11  ;;  %v2190_v28 = vmul.f32 %v5570_v38, %v6260_v27 }
 0x133   : > { %v5576_v22 = vpop.eup %5575  ;;  %v1814_v0 = vadd.f32 1.0, %v5574_v12  ;;  %5601 = vpow2.f32 %v4062_v26  ;;  %v6413_v49 = vadd.f32 %v6167_v3, %v1026_v32  ;;  %v4065_v7 = vmul.f32 -1.442695, %v6407_v59 }
 0x134   : > { %v5578_v1 = vpop.eup %5577  ;;  %5603 = vrcp.f32 %v1816_v50  ;;  %v1817_v6 = vadd.f32 1.0, %v5576_v22  ;;  %5283 = vmatprep.mubr.bf16.mxu1 %v2564_v21  ;;  %v5165_v5 = vpop.f32.mrf.mxu0  ;;  %v4455_v25 = vunpack.c.l.bf16 %v6410_v61  ;;  %v4451_v45 = vunpack.c.l.bf16 %v6419_v15 }
 0x135   : > { %v5580_v9 = vpop.eup %5579  ;;  %v2193_v14 = vmul.f32 %v5578_v1, %v6271_v43  ;;  %5605 = vrcp.f32 %v1814_v0  ;;  %v4063_v36 = vmul.f32 -1.442695, %v6413_v49  ;;  %v6423_v23 = vadd.f32 %v5165_v5, %v6167_v3  ;;  %5284 = vmatmul.mubr.bf16.gmra.mxu1 %v2565_v8 }
 0x136   : > { %v5582_v24 = vpop.eup %5581  ;;  %5607 = vrcp.f32 %v1817_v6  ;;  %v1815_v29 = vadd.f32 1.0, %v5580_v9  ;;  %v1039_v31 = vpop.f32.mrf.mxu0  ;;  %v2192_v43 = vmul.f32 %v5566_v40, %v6253_v18  ;;  %v2446_v53 = vadd.f32 %v4443_v60, %v2190_v28 }
 0x137   : > { %v5584_v34 = vpop.eup %5583  ;;  %v2191_v41 = vmul.f32 %v5582_v24, %v6279_v51  ;;  %5609 = vpow2.f32 %v4065_v7  ;;  %v4068_v2 = vmul.f32 -1.442695, %v6423_v23  ;;  %v6432_v27 = vadd.f32 %v6167_v3, %v1039_v31 }
 0x138   : > { %v5586_v42 = vpop.eup %5585  ;;  %5611 = vrcp.f32 %v1815_v29  ;;  %v1820_v48 = vadd.f32 1.0, %v5584_v34  ;;  %v5166_v38 = vpop.f32.mrf.mxu0  ;;  %v2449_v44 = vadd.f32 %v4448_v58, %v2193_v14  ;;  %v2448_v12 = vadd.f32 %v4447_v55, %v2192_v43 }
 0x139   : > { %v5588_v11 = vpop.eup %5587  ;;  %v2447_v18 = vadd.f32 %v4444_v37, %v2191_v41  ;;  %5613 = vpow2.f32 %v4063_v36  ;;  %v6439_v51 = vadd.f32 %v5166_v38, %v6167_v3  ;;  %v4066_v56 = vmul.f32 -1.442695, %v6432_v27 }
 0x13a   : > { %v5590_v40 = vpop.eup %5589  ;;  %5615 = vrcp.f32 %v1820_v48  ;;  %v1818_v54 = vadd.f32 1.0, %v5588_v11  ;;  %v1042_v52 = vpop.f32.mrf.mxu0  ;;  %v2196_v50 = vmul.f32 %v5586_v42, %v6288_v63  ;;  %v2567_v9 = vpack.c.bf16 %v2449_v44, %v2448_v12 }
 0x13b   : > { %v5592_v26 = vpop.eup %5591  ;;  %5617 = vpow2.f32 %v4068_v2  ;;  %v4069_v32 = vmul.f32 -1.442695, %v6439_v51  ;;  %v6449_v0 = vadd.f32 %v6167_v3, %v1042_v52  ;;  %v2566_v8 = vpack.c.bf16 %v2447_v18, %v2446_v53 }
 0x13c   : > { %v5594_v21 = vpop.eup %5593  ;;  %5619 = vrcp.f32 %v1818_v54  ;;  %v1821_v22 = vadd.f32 1.0, %v5592_v26  ;;  %v5169_v1 = vpop.f32.mrf.mxu0  ;;  %v2194_v14 = vmul.f32 %v5590_v40, %v6295_v16  ;;  %v2452_v31 = vadd.f32 %v4447_v55, %v2196_v50 }
 0x13d   : > { %v5596_v6 = vpop.eup %5595  ;;  %v2197_v7 = vmul.f32 %v5594_v21, %v6311_v35  ;;  %5621 = vpow2.f32 %v4066_v56  ;;  %v6453_v5 = vadd.f32 %v5169_v1, %v6167_v3  ;;  %v4067_v24 = vmul.f32 -1.442695, %v6449_v0  ;;  %5287 = vmatprep.mubr.bf16.mxu1 %v2566_v8 }
 0x13e   : > { %v5598_v63 = vpop.eup %5597  ;;  %5623 = vrcp.f32 %v1821_v22  ;;  %v1819_v36 = vadd.f32 1.0, %v5596_v6  ;;  %v1055_v28 = vpop.f32.mrf.mxu0  ;;  %v4456_v35 = vunpack.c.h.bf16 %v6410_v61  ;;  %5288 = vmatmul.mubr.bf16.gmra.mxu1 %v2567_v9 }
 0x13f   : > { %v5600_v29 = vpop.eup %5599  ;;  %v1824_v34 = vadd.f32 1.0, %v5598_v63  ;;  %5625 = vpow2.f32 %v4069_v32  ;;  %v4072_v16 = vmul.f32 -1.442695, %v6453_v5  ;;  %v6463_v2 = vadd.f32 %v6167_v3, %v1055_v28 }
 0x140   : > { %v5602_v43 = vpop.eup %5601  ;;  %v2195_v41 = vmul.f32 %v5600_v29, %v6315_v19  ;;  %5627 = vrcp.f32 %v1819_v36  ;;  %v5170_v42 = vpop.f32.mrf.mxu0  ;;  %v2453_v38 = vadd.f32 %v4448_v58, %v2197_v7  ;;  %v2450_v19 = vadd.f32 %v4443_v60, %v2194_v14 }
 0x141   : > { %v5604_v48 = vpop.eup %5603  ;;  %5629 = vrcp.f32 %v1824_v34  ;;  %v1822_v55 = vadd.f32 1.0, %v5602_v43  ;;  %v6468_v11 = vadd.f32 %v5170_v42, %v6167_v3  ;;  %v4070_v40 = vmul.f32 -1.442695, %v6463_v2 }
 0x142   : > { %v5606_v44 = vpop.eup %5605  ;;  %v2451_v18 = vadd.f32 %v4444_v37, %v2195_v41  ;;  %5631 = vpow2.f32 %v4067_v24  ;;  %v1058_v53 = vpop.f32.mrf.mxu0  ;;  %v4452_v60 = vunpack.c.h.bf16 %v6419_v15  ;;  %v2200_v22 = vmul.f32 %v5604_v48, %v6325_v62  ;;  %v6541_v15 = vld [vmem:[%s7454_s2] ss:$0 sm:$0xff] }
 0x143   : > { %v5608_v54 = vpop.eup %5607  ;;  %v2198_v10 = vmul.f32 %v5606_v44, %v6328_v30  ;;  %5633 = vrcp.f32 %v1822_v55  ;;  %v4073_v58 = vmul.f32 -1.442695, %v6468_v11  ;;  %v6478_v56 = vadd.f32 %v6167_v3, %v1058_v53  ;;  %v6506_v55 = vld [vmem:[%s6245_s24 + $0x48] sm:$0xff]   ;;  %v6509_v44 = vld [vmem:[%s6245_s24 + $0x40] sm:$0xff]  }
 0x144   : > { %v5610_v52 = vpop.eup %5609  ;;  %v2201_v26 = vmul.f32 %v5608_v54, %v6340_v20  ;;  %5635 = vpow2.f32 %v4072_v16  ;;  %v2568_v13 = vpack.c.bf16 %v2451_v18, %v2450_v19  ;;  %v5173_v37 = vpop.f32.mrf.mxu0  ;;  %v2569_v30 = vpack.c.bf16 %v2453_v38, %v2452_v31 }
 0x145   : > { %v5612_v12 = vpop.eup %5611  ;;  %v1825_v50 = vadd.f32 1.0, %v5610_v52  ;;  %5637 = vpow2.f32 %v4070_v40  ;;  %v4071_v32 = vmul.f32 -1.442695, %v6478_v56  ;;  %v6486_v20 = vadd.f32 %v5173_v37, %v6167_v3 }
 0x146   : > { %v5614_v21 = vpop.eup %5613  ;;  %v2199_v8 = vmul.f32 %v5612_v12, %v6346_v46  ;;  %5639 = vpow2.f32 %v4073_v58  ;;  %5291 = vmatprep.mubr.bf16.mxu1 %v2568_v13  ;;  %v1071_v1 = vpop.f32.mrf.mxu0  ;;  %v2454_v7 = vadd.f32 %v4451_v45, %v2198_v10  ;;  %v2457_v62 = vadd.f32 %v4456_v35, %v2201_v26 }
 0x147   : > { %v5616_v6 = vpop.eup %5615  ;;  %5641 = vrcp.f32 %v1825_v50  ;;  %v1823_v9 = vadd.f32 1.0, %v5614_v21  ;;  %5292 = vmatmul.mubr.bf16.gmra.mxu1 %v2569_v30  ;;  %v6491_v63 = vadd.f32 %v6167_v3, %v1071_v1  ;;  %v4076_v36 = vmul.f32 -1.442695, %v6486_v20 }
 0x148   : > { %v5618_v14 = vpop.eup %5617  ;;  %v2455_v46 = vadd.f32 %v4452_v60, %v2199_v8  ;;  %5643 = vpow2.f32 %v4071_v32  ;;  %v5174_v24 = vpop.f32.mrf.mxu0  ;;  %v2456_v41 = vadd.f32 %v4455_v25, %v2200_v22  ;;  %v2204_v54 = vmul.f32 %v5616_v6, %v6353_v47 }
 0x149   : > { %v5620_v28 = vpop.eup %5619  ;;  %5645 = vrcp.f32 %v1823_v9  ;;  %v1828_v29 = vadd.f32 1.0, %v5618_v14  ;;  %v4074_v31 = vmul.f32 -1.442695, %v6491_v63  ;;  %v6500_v34 = vadd.f32 %v5174_v24, %v6167_v3 }
 0x14a   : > { %v5622_v43 = vpop.eup %5621  ;;  %v2202_v16 = vmul.f32 %v5620_v28, %v6360_v57  ;;  %5647 = vpow2.f32 %v4076_v36  ;;  %v1074_v42 = vpop.f32.mrf.mxu0  ;;  %v2570_v48 = vpack.c.bf16 %v2455_v46, %v2454_v7  ;;  %v2571_v58 = vpack.c.bf16 %v2457_v62, %v2456_v41  ;;  %v6548_v28 = vld [vmem:[%s6245_s24 + $0x58] sm:$0xff]  }
 0x14b   : > { %v5624_v38 = vpop.eup %5623  ;;  %5649 = vrcp.f32 %v1828_v29  ;;  %v1826_v19 = vadd.f32 1.0, %v5622_v43  ;;  %v4077_v18 = vmul.f32 -1.442695, %v6500_v34  ;;  %v6513_v40 = vadd.f32 %v6167_v3, %v1074_v42 }
 0x14c   : > { %v5626_v53 = vpop.eup %5625  ;;  %v2205_v57 = vmul.f32 %v5624_v38, %v6370_v4  ;;  %5651 = vpow2.f32 %v4074_v31  ;;  %5295 = vmatprep.mubr.bf16.mxu1 %v2570_v48  ;;  %v5177_v10 = vpop.f32.mrf.mxu0  ;;  %v4463_v32 = vunpack.c.l.bf16 %v6506_v55  ;;  %v4459_v47 = vunpack.c.l.bf16 %v6509_v44 }
 0x14d   : > { %v5628_v52 = vpop.eup %5627  ;;  %5653 = vrcp.f32 %v1826_v19  ;;  %v1829_v26 = vadd.f32 1.0, %v5626_v53  ;;  %v4075_v13 = vmul.f32 -1.442695, %v6513_v40  ;;  %v6519_v37 = vadd.f32 %v5177_v10, %v6167_v3 }
 0x14e   : > { %v5630_v12 = vpop.eup %5629  ;;  %v2203_v50 = vmul.f32 %v5628_v52, %v6380_v17  ;;  %5655 = vpow2.f32 %v4077_v18  ;;  %v1087_v4 = vpop.f32.mrf.mxu0  ;;  %v2458_v21 = vadd.f32 %v4451_v45, %v2202_v16  ;;  %v2461_v17 = vadd.f32 %v4456_v35, %v2205_v57  ;;  %v6556_v18 = vld [vmem:[%s6245_s24 + $0x50] sm:$0xff]  }
 0x14f   : > { %v5632_v30 = vpop.eup %5631  ;;  %5657 = vrcp.f32 %v1829_v26  ;;  %v4080_v22 = vmul.f32 -1.442695, %v6519_v37  ;;  %5296 = vmatmul.mubr.bf16.gmra.mxu1 %v2571_v58  ;;  %v6528_v8 = vadd.f32 %v6167_v3, %v1087_v4  ;;  %v2460_v45 = vadd.f32 %v4455_v25, %v2204_v54 }
 0x150   : > { %v5634_v1 = vpop.eup %5633  ;;  %v2459_v6 = vadd.f32 %v4452_v60, %v2203_v50  ;;  %v1827_v7 = vadd.f32 1.0, %v5632_v30  ;;  %5659 = vpow2.f32 %v4075_v13  ;;  %v5178_v9 = vpop.f32.mrf.mxu0  ;;  %v4464_v62 = vunpack.c.h.bf16 %v6506_v55 }
 0x151   : > { %v5636_v14 = vpop.eup %5635  ;;  %5661 = vpow2.f32 %v4080_v22  ;;  %v4078_v3 = vmul.f32 -1.442695, %v6528_v8  ;;  %v6544_v35 = vadd.f32 %v6541_v15, %v5178_v9  ;;  %v4460_v25 = vunpack.c.h.bf16 %v6509_v44 }
 0x152   : > { %v5638_v46 = vpop.eup %5637  ;;  %5663 = vrcp.f32 %v1827_v7  ;;  %v1832_v36 = vadd.f32 1.0, %v5636_v14  ;;  %v1090_v60 = vpop.f32.mrf.mxu0  ;;  %v2572_v24 = vpack.c.bf16 %v2459_v6, %v2458_v21  ;;  %v2573_v48 = vpack.c.bf16 %v2461_v17, %v2460_v45 }
 0x153   : > { %v5640_v61 = vpop.eup %5639  ;;  %v1830_v29 = vadd.f32 1.0, %v5638_v46  ;;  %5665 = vpow2.f32 %v4078_v3  ;;  %v6551_v31 = vadd.f32 %v6541_v15, %v1090_v60  ;;  %v4081_v16 = vmul.f32 -1.442695, %v6544_v35 }
 0x154   : > { %v5642_v43 = vpop.eup %5641  ;;  %5667 = vrcp.f32 %v1832_v36  ;;  %v1833_v41 = vadd.f32 1.0, %v5640_v61  ;;  %5299 = vmatprep.mubr.bf16.mxu1 %v2572_v24  ;;  %v5181_v42 = vpop.f32.mrf.mxu0  ;;  %v2206_v10 = vmul.f32 %v5634_v1, %v6396_v33  ;;  %v4471_v58 = vunpack.c.l.bf16 %v6548_v28 }
 0x155   : > { %v5644_v38 = vpop.eup %5643  ;;  %v2209_v19 = vmul.f32 %v5642_v43, %v6407_v59  ;;  %5669 = vrcp.f32 %v1830_v29  ;;  %v4079_v53 = vmul.f32 -1.442695, %v6551_v31  ;;  %v6560_v54 = vadd.f32 %v6541_v15, %v5181_v42 }
 0x156   : > { %v5646_v57 = vpop.eup %5645  ;;  %5671 = vrcp.f32 %v1833_v41  ;;  %v1831_v52 = vadd.f32 1.0, %v5644_v38  ;;  %v1103_v26 = vpop.f32.mrf.mxu0  ;;  %v2208_v50 = vmul.f32 %v5630_v12, %v6387_v39  ;;  %v4467_v21 = vunpack.c.l.bf16 %v6556_v18 }
 0x157   : > { %v5648_v13 = vpop.eup %5647  ;;  %v2207_v59 = vmul.f32 %v5646_v57, %v6413_v49  ;;  %5673 = vpow2.f32 %v4081_v16  ;;  %v4084_v4 = vmul.f32 -1.442695, %v6560_v54  ;;  %5300 = vmatmul.mubr.bf16.gmra.mxu1 %v2573_v48  ;;  %v6569_v33 = vadd.f32 %v6541_v15, %v1103_v26 }
 0x158   : > { %v5650_v30 = vpop.eup %5649  ;;  %5675 = vrcp.f32 %v1831_v52  ;;  %v1836_v22 = vadd.f32 1.0, %v5648_v13  ;;  %v5182_v1 = vpop.f32.mrf.mxu0  ;;  %v2465_v6 = vadd.f32 %v4464_v62, %v2209_v19  ;;  %v2462_v7 = vadd.f32 %v4459_v47, %v2206_v10 }
 0x159   : > { %v5652_v17 = vpop.eup %5651  ;;  %v2463_v39 = vadd.f32 %v4460_v25, %v2207_v59  ;;  %5677 = vpow2.f32 %v4079_v53  ;;  %v6576_v49 = vadd.f32 %v6541_v15, %v5182_v1  ;;  %v4082_v14 = vmul.f32 -1.442695, %v6569_v33 }
 0x15a   : > { %v5654_v12 = vpop.eup %5653  ;;  %5679 = vrcp.f32 %v1836_v22  ;;  %v1834_v9 = vadd.f32 1.0, %v5652_v17  ;;  %v1106_v45 = vpop.f32.mrf.mxu0  ;;  %v2464_v46 = vadd.f32 %v4463_v32, %v2208_v50  ;;  %v2212_v36 = vmul.f32 %v5650_v30, %v6423_v23 }
 0x15b   : > { %v5656_v3 = vpop.eup %5655  ;;  %5681 = vpow2.f32 %v4084_v4  ;;  %v4085_v60 = vmul.f32 -1.442695, %v6576_v49  ;;  %v6586_v29 = vadd.f32 %v6541_v15, %v1106_v45  ;;  %v2574_v43 = vpack.c.bf16 %v2463_v39, %v2462_v7 }
 0x15c   : > { %v5658_v24 = vpop.eup %5657  ;;  %5683 = vrcp.f32 %v1834_v9  ;;  %v1837_v61 = vadd.f32 1.0, %v5656_v3  ;;  %v5185_v41 = vpop.f32.mrf.mxu0  ;;  %v2575_v38 = vpack.c.bf16 %v2465_v6, %v2464_v46  ;;  %v2210_v19 = vmul.f32 %v5654_v12, %v6432_v27 }
 0x15d   : > { %v5660_v16 = vpop.eup %5659  ;;  %v2213_v42 = vmul.f32 %v5658_v24, %v6439_v51  ;;  %5685 = vpow2.f32 %v4082_v14  ;;  %v6590_v48 = vadd.f32 %v6541_v15, %v5185_v41  ;;  %v4083_v57 = vmul.f32 -1.442695, %v6586_v29  ;;  %5303 = vmatprep.mubr.bf16.mxu1 %v2574_v43 }
 0x15e   : > { %v5662_v23 = vpop.eup %5661  ;;  %5687 = vrcp.f32 %v1837_v61  ;;  %v1835_v53 = vadd.f32 1.0, %v5660_v16  ;;  %v1119_v10 = vpop.f32.mrf.mxu0  ;;  %v2468_v26 = vadd.f32 %v4463_v32, %v2212_v36  ;;  %v4472_v51 = vunpack.c.h.bf16 %v6548_v28 }
 0x15f   : > { %v5664_v52 = vpop.eup %5663  ;;  %v1840_v13 = vadd.f32 1.0, %v5662_v23  ;;  %5689 = vpow2.f32 %v4085_v60  ;;  %5304 = vmatmul.mubr.bf16.gmra.mxu1 %v2575_v38  ;;  %v4088_v27 = vmul.f32 -1.442695, %v6590_v48  ;;  %v6600_v4 = vadd.f32 %v6541_v15, %v1119_v10 }
 0x160   : > { %v5666_v50 = vpop.eup %5665  ;;  %v2211_v59 = vmul.f32 %v5664_v52, %v6449_v0  ;;  %5691 = vrcp.f32 %v1835_v53  ;;  %v5186_v30 = vpop.f32.mrf.mxu0  ;;  %v2469_v1 = vadd.f32 %v4464_v62, %v2213_v42  ;;  %v2466_v0 = vadd.f32 %v4459_v47, %v2210_v19 }
 0x161   : > { %v5668_v22 = vpop.eup %5667  ;;  %5693 = vrcp.f32 %v1840_v13  ;;  %v1838_v32 = vadd.f32 1.0, %v5666_v50  ;;  %v6605_v17 = vadd.f32 %v6541_v15, %v5186_v30  ;;  %v4086_v12 = vmul.f32 -1.442695, %v6600_v4 }
 0x162   : > { %v5670_v6 = vpop.eup %5669  ;;  %v2467_v39 = vadd.f32 %v4460_v25, %v2211_v59  ;;  %5695 = vpow2.f32 %v4083_v57  ;;  %v1122_v7 = vpop.f32.mrf.mxu0  ;;  %v4468_v47 = vunpack.c.h.bf16 %v6556_v18  ;;  %v2216_v61 = vmul.f32 %v5668_v22, %v6453_v5 }
 0x163   : > { %v5672_v9 = vpop.eup %5671  ;;  %v2214_v55 = vmul.f32 %v5670_v6, %v6463_v2  ;;  %5697 = vrcp.f32 %v1838_v32  ;;  %v4089_v62 = vmul.f32 -1.442695, %v6605_v17  ;;  %v6615_v14 = vadd.f32 %v6541_v15, %v1122_v7  ;;  %v6643_v32 = vld [vmem:[%s6245_s24 + $0x68] sm:$0xff]   ;;  %v6646_v6 = vld [vmem:[%s6245_s24 + $0x60] sm:$0xff]  }
 0x164   : > { %v5674_v45 = vpop.eup %5673  ;;  %v2217_v3 = vmul.f32 %v5672_v9, %v6468_v11  ;;  %5699 = vpow2.f32 %v4088_v27  ;;  %v2576_v44 = vpack.c.bf16 %v2467_v39, %v2466_v0  ;;  %v5189_v25 = vpop.f32.mrf.mxu0  ;;  %v2577_v2 = vpack.c.bf16 %v2469_v1, %v2468_v26 }
 0x165   : > { %v5676_v46 = vpop.eup %5675  ;;  %v1841_v36 = vadd.f32 1.0, %v5674_v45  ;;  %5701 = vpow2.f32 %v4086_v12  ;;  %v4087_v60 = vmul.f32 -1.442695, %v6615_v14  ;;  %v6623_v11 = vadd.f32 %v6541_v15, %v5189_v25 }
 0x166   : > { %v5678_v24 = vpop.eup %5677  ;;  %v2215_v43 = vmul.f32 %v5676_v46, %v6478_v56  ;;  %5703 = vpow2.f32 %v4089_v62  ;;  %5307 = vmatprep.mubr.bf16.mxu1 %v2576_v44  ;;  %v1135_v41 = vpop.f32.mrf.mxu0  ;;  %v2470_v42 = vadd.f32 %v4467_v21, %v2214_v55  ;;  %v2473_v5 = vadd.f32 %v4472_v51, %v2217_v3 }
 0x167   : > { %v5680_v16 = vpop.eup %5679  ;;  %5705 = vrcp.f32 %v1841_v36  ;;  %v1839_v38 = vadd.f32 1.0, %v5678_v24  ;;  %5308 = vmatmul.mubr.bf16.gmra.mxu1 %v2577_v2  ;;  %v6628_v23 = vadd.f32 %v6541_v15, %v1135_v41  ;;  %v4092_v53 = vmul.f32 -1.442695, %v6623_v11 }
 0x168   : > { %v5682_v19 = vpop.eup %5681  ;;  %v2471_v56 = vadd.f32 %v4468_v47, %v2215_v43  ;;  %5707 = vpow2.f32 %v4087_v60  ;;  %v5190_v57 = vpop.f32.mrf.mxu0  ;;  %v2472_v59 = vadd.f32 %v4471_v58, %v2216_v61  ;;  %v2220_v9 = vmul.f32 %v5680_v16, %v6486_v20 }
 0x169   : > { %v5684_v10 = vpop.eup %5683  ;;  %5709 = vrcp.f32 %v1839_v38  ;;  %v1844_v52 = vadd.f32 1.0, %v5682_v19  ;;  %v4090_v26 = vmul.f32 -1.442695, %v6628_v23  ;;  %v6637_v13 = vadd.f32 %v6541_v15, %v5190_v57 }
 0x16a   : > { %v5686_v50 = vpop.eup %5685  ;;  %v2218_v27 = vmul.f32 %v5684_v10, %v6491_v63  ;;  %5711 = vpow2.f32 %v4092_v53  ;;  %v1138_v30 = vpop.f32.mrf.mxu0  ;;  %v2578_v22 = vpack.c.bf16 %v2471_v56, %v2470_v42  ;;  %v2579_v62 = vpack.c.bf16 %v2473_v5, %v2472_v59 }
 0x16b   : > { %v5688_v1 = vpop.eup %5687  ;;  %5713 = vrcp.f32 %v1844_v52  ;;  %v1842_v0 = vadd.f32 1.0, %v5686_v50  ;;  %v4093_v39 = vmul.f32 -1.442695, %v6637_v13  ;;  %v6650_v12 = vadd.f32 %v6541_v15, %v1138_v30 }
 0x16c   : > { %v5690_v7 = vpop.eup %5689  ;;  %v2221_v63 = vmul.f32 %v5688_v1, %v6500_v34  ;;  %5715 = vpow2.f32 %v4090_v26  ;;  %5311 = vmatprep.mubr.bf16.mxu1 %v2578_v22  ;;  %v5193_v55 = vpop.f32.mrf.mxu0  ;;  %v4479_v60 = vunpack.c.l.bf16 %v6643_v32  ;;  %v4475_v20 = vunpack.c.l.bf16 %v6646_v6  ;;  %v6680_v26 = vld [vmem:[%s6245_s24 + $0x78] sm:$0xff]  }
 0x16d   : > { %v5692_v45 = vpop.eup %5691  ;;  %5717 = vrcp.f32 %v1842_v0  ;;  %v1845_v3 = vadd.f32 1.0, %v5690_v7  ;;  %v4091_v44 = vmul.f32 -1.442695, %v6650_v12  ;;  %v6656_v25 = vadd.f32 %v6541_v15, %v5193_v55 }
 0x16e   : > { %v5694_v46 = vpop.eup %5693  ;;  %v2219_v36 = vmul.f32 %v5692_v45, %v6513_v40  ;;  %5719 = vpow2.f32 %v4093_v39  ;;  %v1151_v34 = vpop.f32.mrf.mxu0  ;;  %v2474_v24 = vadd.f32 %v4467_v21, %v2218_v27  ;;  %v2477_v40 = vadd.f32 %v4472_v51, %v2221_v63  ;;  %v6688_v39 = vld [vmem:[%s6245_s24 + $0x70] sm:$0xff]  }
 0x16f   : > { %v5696_v2 = vpop.eup %5695  ;;  %5721 = vrcp.f32 %v1845_v3  ;;  %v4096_v61 = vmul.f32 -1.442695, %v6656_v25  ;;  %5312 = vmatmul.mubr.bf16.gmra.mxu1 %v2579_v62  ;;  %v6665_v43 = vadd.f32 %v6541_v15, %v1151_v34  ;;  %v2476_v21 = vadd.f32 %v4471_v58, %v2220_v9 }
 0x170   : > { %v5698_v41 = vpop.eup %5697  ;;  %v2475_v16 = vadd.f32 %v4468_v47, %v2219_v36  ;;  %v1843_v42 = vadd.f32 1.0, %v5696_v2  ;;  %5723 = vpow2.f32 %v4091_v44  ;;  %v5194_v38 = vpop.f32.mrf.mxu0  ;;  %v4480_v5 = vunpack.c.h.bf16 %v6643_v32 }
 0x171   : > { %v5700_v19 = vpop.eup %5699  ;;  %5725 = vpow2.f32 %v4096_v61  ;;  %v4094_v56 = vmul.f32 -1.442695, %v6665_v43  ;;  %v6676_v51 = vadd.f32 %v6541_v15, %v5194_v38  ;;  %v4476_v52 = vunpack.c.h.bf16 %v6646_v6 }
 0x172   : > { %v5702_v53 = vpop.eup %5701  ;;  %5727 = vrcp.f32 %v1843_v42  ;;  %v1848_v57 = vadd.f32 1.0, %v5700_v19  ;;  %v1154_v18 = vpop.f32.mrf.mxu0  ;;  %v2580_v47 = vpack.c.bf16 %v2475_v16, %v2474_v24  ;;  %v2581_v22 = vpack.c.bf16 %v2477_v40, %v2476_v21 }
 0x173   : > { %v5704_v10 = vpop.eup %5703  ;;  %v1846_v28 = vadd.f32 1.0, %v5702_v53  ;;  %5729 = vpow2.f32 %v4094_v56  ;;  %v6683_v58 = vadd.f32 %v6541_v15, %v1154_v18  ;;  %v4097_v27 = vmul.f32 -1.442695, %v6676_v51 }
 0x174   : > { %v5706_v50 = vpop.eup %5705  ;;  %5731 = vrcp.f32 %v1848_v57  ;;  %v1849_v59 = vadd.f32 1.0, %v5704_v10  ;;  %5315 = vmatprep.mubr.bf16.mxu1 %v2580_v47  ;;  %v5197_v30 = vpop.f32.mrf.mxu0  ;;  %v2222_v55 = vmul.f32 %v5698_v41, %v6528_v8  ;;  %v4487_v62 = vunpack.c.l.bf16 %v6680_v26 }
 0x175   : > { %v5708_v1 = vpop.eup %5707  ;;  %v2225_v0 = vmul.f32 %v5706_v50, %v6544_v35  ;;  %5733 = vrcp.f32 %v1846_v28  ;;  %v4095_v7 = vmul.f32 -1.442695, %v6683_v58  ;;  %v6692_v9 = vadd.f32 %v6541_v15, %v5197_v30 }
 0x176   : > { %v5710_v63 = vpop.eup %5709  ;;  %5735 = vrcp.f32 %v1849_v59  ;;  %v1847_v45 = vadd.f32 1.0, %v5708_v1  ;;  %v1167_v3 = vpop.f32.mrf.mxu0  ;;  %v2224_v36 = vmul.f32 %v5694_v46, %v6519_v37  ;;  %v4483_v24 = vunpack.c.l.bf16 %v6688_v39 }
 0x177   : > { %v5712_v44 = vpop.eup %5711  ;;  %v2223_v35 = vmul.f32 %v5710_v63, %v6551_v31  ;;  %5737 = vpow2.f32 %v4097_v27  ;;  %v4100_v34 = vmul.f32 -1.442695, %v6692_v9  ;;  %5316 = vmatmul.mubr.bf16.gmra.mxu1 %v2581_v22  ;;  %v6701_v8 = vadd.f32 %v6541_v15, %v1167_v3 }
 0x178   : > { %v5714_v2 = vpop.eup %5713  ;;  %5739 = vrcp.f32 %v1847_v45  ;;  %v1852_v61 = vadd.f32 1.0, %v5712_v44  ;;  %v5198_v41 = vpop.f32.mrf.mxu0  ;;  %v2481_v16 = vadd.f32 %v4480_v5, %v2225_v0  ;;  %v2478_v42 = vadd.f32 %v4475_v20, %v2222_v55 }
 0x179   : > { %v5716_v40 = vpop.eup %5715  ;;  %v2479_v37 = vadd.f32 %v4476_v52, %v2223_v35  ;;  %5741 = vpow2.f32 %v4095_v7  ;;  %v6708_v31 = vadd.f32 %v6541_v15, %v5198_v41  ;;  %v4098_v19 = vmul.f32 -1.442695, %v6701_v8 }
 0x17a   : > { %v5718_v46 = vpop.eup %5717  ;;  %5743 = vrcp.f32 %v1852_v61  ;;  %v1850_v38 = vadd.f32 1.0, %v5716_v40  ;;  %v1170_v21 = vpop.f32.mrf.mxu0  ;;  %v2480_v53 = vadd.f32 %v4479_v60, %v2224_v36  ;;  %v2228_v57 = vmul.f32 %v5714_v2, %v6560_v54 }
 0x17b   : > { %v5720_v56 = vpop.eup %5719  ;;  %5745 = vpow2.f32 %v4100_v34  ;;  %v4101_v18 = vmul.f32 -1.442695, %v6708_v31  ;;  %v6718_v28 = vadd.f32 %v6541_v15, %v1170_v21  ;;  %v2582_v50 = vpack.c.bf16 %v2479_v37, %v2478_v42 }
 0x17c   : > { %v5722_v47 = vpop.eup %5721  ;;  %5747 = vrcp.f32 %v1850_v38  ;;  %v1853_v10 = vadd.f32 1.0, %v5720_v56  ;;  %v5201_v59 = vpop.f32.mrf.mxu0  ;;  %v2583_v1 = vpack.c.bf16 %v2481_v16, %v2480_v53  ;;  %v2226_v0 = vmul.f32 %v5718_v46, %v6569_v33 }
 0x17d   : > { %v5724_v27 = vpop.eup %5723  ;;  %v2229_v30 = vmul.f32 %v5722_v47, %v6576_v49  ;;  %5749 = vpow2.f32 %v4098_v19  ;;  %v6722_v22 = vadd.f32 %v6541_v15, %v5201_v59  ;;  %v4099_v63 = vmul.f32 -1.442695, %v6718_v28  ;;  %5319 = vmatprep.mubr.bf16.mxu1 %v2582_v50 }
 0x17e   : > { %v5726_v54 = vpop.eup %5725  ;;  %5751 = vrcp.f32 %v1853_v10  ;;  %v1851_v7 = vadd.f32 1.0, %v5724_v27  ;;  %v1183_v55 = vpop.f32.mrf.mxu0  ;;  %v2484_v3 = vadd.f32 %v4479_v60, %v2228_v57  ;;  %v4488_v49 = vunpack.c.h.bf16 %v6680_v26 }
 0x17f   : > { %v5728_v45 = vpop.eup %5727  ;;  %v1856_v44 = vadd.f32 1.0, %v5726_v54  ;;  %5753 = vpow2.f32 %v4101_v18  ;;  %5320 = vmatmul.mubr.bf16.gmra.mxu1 %v2583_v1  ;;  %v4104_v33 = vmul.f32 -1.442695, %v6722_v22  ;;  %v6732_v34 = vadd.f32 %v6541_v15, %v1183_v55 }
 0x180   : > { %v5730_v36 = vpop.eup %5729  ;;  %v2227_v35 = vmul.f32 %v5728_v45, %v6586_v29  ;;  %5755 = vrcp.f32 %v1851_v7  ;;  %v5202_v2 = vpop.f32.mrf.mxu0  ;;  %v2485_v41 = vadd.f32 %v4480_v5, %v2229_v30  ;;  %v2482_v29 = vadd.f32 %v4475_v20, %v2226_v0 }
 0x181   : > { %v5732_v61 = vpop.eup %5731  ;;  %5757 = vrcp.f32 %v1856_v44  ;;  %v1854_v60 = vadd.f32 1.0, %v5730_v36  ;;  %v6737_v40 = vadd.f32 %v6541_v15, %v5202_v2  ;;  %v4102_v46 = vmul.f32 -1.442695, %v6732_v34 }
 0x182   : > { %v5734_v16 = vpop.eup %5733  ;;  %v2483_v37 = vadd.f32 %v4476_v52, %v2227_v35  ;;  %5759 = vpow2.f32 %v4099_v63  ;;  %v1186_v42 = vpop.f32.mrf.mxu0  ;;  %v4484_v20 = vunpack.c.h.bf16 %v6688_v39  ;;  %v2232_v10 = vmul.f32 %v5732_v61, %v6590_v48 }
 0x183   : > { %v5736_v38 = vpop.eup %5735  ;;  %v2230_v32 = vmul.f32 %v5734_v16, %v6600_v4  ;;  %5761 = vrcp.f32 %v1854_v60  ;;  %v4105_v5 = vmul.f32 -1.442695, %v6737_v40  ;;  %v6747_v19 = vadd.f32 %v6541_v15, %v1186_v42  ;;  %v6775_v60 = vld [vmem:[%s6245_s24 + $0x88] sm:$0xff]   ;;  %v6778_v16 = vld [vmem:[%s6245_s24 + $0x80] sm:$0xff]  }
 0x184   : > { %v5738_v21 = vpop.eup %5737  ;;  %v2233_v56 = vmul.f32 %v5736_v38, %v6605_v17  ;;  %5763 = vpow2.f32 %v4104_v33  ;;  %v2584_v6 = vpack.c.bf16 %v2483_v37, %v2482_v29  ;;  %v5205_v52 = vpop.f32.mrf.mxu0  ;;  %v2585_v4 = vpack.c.bf16 %v2485_v41, %v2484_v3 }
 0x185   : > { %v5740_v53 = vpop.eup %5739  ;;  %v1857_v57 = vadd.f32 1.0, %v5738_v21  ;;  %5765 = vpow2.f32 %v4102_v46  ;;  %v4103_v18 = vmul.f32 -1.442695, %v6747_v19  ;;  %v6755_v17 = vadd.f32 %v6541_v15, %v5205_v52 }
 0x186   : > { %v5742_v47 = vpop.eup %5741  ;;  %v2231_v50 = vmul.f32 %v5740_v53, %v6615_v14  ;;  %5767 = vpow2.f32 %v4105_v5  ;;  %5323 = vmatprep.mubr.bf16.mxu1 %v2584_v6  ;;  %v1199_v59 = vpop.f32.mrf.mxu0  ;;  %v2486_v30 = vadd.f32 %v4483_v24, %v2230_v32  ;;  %v2489_v48 = vadd.f32 %v4488_v49, %v2233_v56 }
 0x187   : > { %v5744_v27 = vpop.eup %5743  ;;  %5769 = vrcp.f32 %v1857_v57  ;;  %v1855_v1 = vadd.f32 1.0, %v5742_v47  ;;  %5324 = vmatmul.mubr.bf16.gmra.mxu1 %v2585_v4  ;;  %v6760_v54 = vadd.f32 %v6541_v15, %v1199_v59  ;;  %v4108_v7 = vmul.f32 -1.442695, %v6755_v17 }
 0x188   : > { %v5746_v0 = vpop.eup %5745  ;;  %v2487_v14 = vadd.f32 %v4484_v20, %v2231_v50  ;;  %5771 = vpow2.f32 %v4103_v18  ;;  %v5206_v63 = vpop.f32.mrf.mxu0  ;;  %v2488_v35 = vadd.f32 %v4487_v62, %v2232_v10  ;;  %v2236_v38 = vmul.f32 %v5744_v27, %v6623_v11 }
 0x189   : > { %v5748_v55 = vpop.eup %5747  ;;  %5773 = vrcp.f32 %v1855_v1  ;;  %v1860_v45 = vadd.f32 1.0, %v5746_v0  ;;  %v4106_v3 = vmul.f32 -1.442695, %v6760_v54  ;;  %v6769_v44 = vadd.f32 %v6541_v15, %v5206_v63 }
 0x18a   : > { %v5750_v36 = vpop.eup %5749  ;;  %v2234_v33 = vmul.f32 %v5748_v55, %v6628_v23  ;;  %5775 = vpow2.f32 %v4108_v7  ;;  %v1202_v2 = vpop.f32.mrf.mxu0  ;;  %v2586_v61 = vpack.c.bf16 %v2487_v14, %v2486_v30  ;;  %v2587_v5 = vpack.c.bf16 %v2489_v48, %v2488_v35 }
 0x18b   : > { %v5752_v41 = vpop.eup %5751  ;;  %5777 = vrcp.f32 %v1860_v45  ;;  %v1858_v29 = vadd.f32 1.0, %v5750_v36  ;;  %v4109_v37 = vmul.f32 -1.442695, %v6769_v44  ;;  %v6782_v46 = vadd.f32 %v6541_v15, %v1202_v2 }
 0x18c   : > { %v5754_v42 = vpop.eup %5753  ;;  %v2237_v23 = vmul.f32 %v5752_v41, %v6637_v13  ;;  %5779 = vpow2.f32 %v4106_v3  ;;  %5327 = vmatprep.mubr.bf16.mxu1 %v2586_v61  ;;  %v5209_v32 = vpop.f32.mrf.mxu0  ;;  %v4495_v18 = vunpack.c.l.bf16 %v6775_v60  ;;  %v4491_v11 = vunpack.c.l.bf16 %v6778_v16  ;;  %v6812_v3 = vld [vmem:[%s6245_s24 + $0x98] sm:$0xff]  }
 0x18d   : > { %v5756_v21 = vpop.eup %5755  ;;  %5781 = vrcp.f32 %v1858_v29  ;;  %v1861_v56 = vadd.f32 1.0, %v5754_v42  ;;  %v4107_v6 = vmul.f32 -1.442695, %v6782_v46  ;;  %v6788_v52 = vadd.f32 %v6541_v15, %v5209_v32 }
 0x18e   : > { %v5758_v53 = vpop.eup %5757  ;;  %v2235_v57 = vmul.f32 %v5756_v21, %v6650_v12  ;;  %5783 = vpow2.f32 %v4109_v37  ;;  %v1215_v13 = vpop.f32.mrf.mxu0  ;;  %v2490_v47 = vadd.f32 %v4483_v24, %v2234_v33  ;;  %v2493_v12 = vadd.f32 %v4488_v49, %v2237_v23  ;;  %v6820_v37 = vld [vmem:[%s6245_s24 + $0x90] sm:$0xff]  }
 0x18f   : > { %v5760_v4 = vpop.eup %5759  ;;  %5785 = vrcp.f32 %v1861_v56  ;;  %v4112_v10 = vmul.f32 -1.442695, %v6788_v52  ;;  %5328 = vmatmul.mubr.bf16.gmra.mxu1 %v2587_v5  ;;  %v6797_v50 = vadd.f32 %v6541_v15, %v1215_v13  ;;  %v2492_v24 = vadd.f32 %v4487_v62, %v2236_v38 }
 0x190   : > { %v5762_v59 = vpop.eup %5761  ;;  %v2491_v27 = vadd.f32 %v4484_v20, %v2235_v57  ;;  %v1859_v30 = vadd.f32 1.0, %v5760_v4  ;;  %5787 = vpow2.f32 %v4107_v6  ;;  %v5210_v1 = vpop.f32.mrf.mxu0  ;;  %v4496_v48 = vunpack.c.h.bf16 %v6775_v60 }
 0x191   : > { %v5764_v0 = vpop.eup %5763  ;;  %5789 = vpow2.f32 %v4112_v10  ;;  %v4110_v14 = vmul.f32 -1.442695, %v6797_v50  ;;  %v6808_v49 = vadd.f32 %v6541_v15, %v5210_v1  ;;  %v4492_v45 = vunpack.c.h.bf16 %v6778_v16 }
 0x192   : > { %v5766_v7 = vpop.eup %5765  ;;  %5791 = vrcp.f32 %v1859_v30  ;;  %v1864_v63 = vadd.f32 1.0, %v5764_v0  ;;  %v1218_v39 = vpop.f32.mrf.mxu0  ;;  %v2588_v20 = vpack.c.bf16 %v2491_v27, %v2490_v47  ;;  %v2589_v61 = vpack.c.bf16 %v2493_v12, %v2492_v24 }
 0x193   : > { %v5768_v55 = vpop.eup %5767  ;;  %v1862_v26 = vadd.f32 1.0, %v5766_v7  ;;  %5793 = vpow2.f32 %v4110_v14  ;;  %v6815_v62 = vadd.f32 %v6541_v15, %v1218_v39  ;;  %v4113_v33 = vmul.f32 -1.442695, %v6808_v49 }
 0x194   : > { %v5770_v36 = vpop.eup %5769  ;;  %5795 = vrcp.f32 %v1864_v63  ;;  %v1865_v35 = vadd.f32 1.0, %v5768_v55  ;;  %5331 = vmatprep.mubr.bf16.mxu1 %v2588_v20  ;;  %v5213_v2 = vpop.f32.mrf.mxu0  ;;  %v2238_v32 = vmul.f32 %v5762_v59, %v6665_v43  ;;  %v4503_v5 = vunpack.c.l.bf16 %v6812_v3 }
 0x195   : > { %v5772_v41 = vpop.eup %5771  ;;  %v2241_v29 = vmul.f32 %v5770_v36, %v6676_v51  ;;  %5797 = vrcp.f32 %v1862_v26  ;;  %v4111_v42 = vmul.f32 -1.442695, %v6815_v62  ;;  %v6824_v38 = vadd.f32 %v6541_v15, %v5213_v2 }
 0x196   : > { %v5774_v23 = vpop.eup %5773  ;;  %5799 = vrcp.f32 %v1865_v35  ;;  %v1863_v21 = vadd.f32 1.0, %v5772_v41  ;;  %v1231_v56 = vpop.f32.mrf.mxu0  ;;  %v2240_v57 = vmul.f32 %v5758_v53, %v6656_v25  ;;  %v4499_v47 = vunpack.c.l.bf16 %v6820_v37 }
 0x197   : > { %v5776_v6 = vpop.eup %5775  ;;  %v2239_v51 = vmul.f32 %v5774_v23, %v6683_v58  ;;  %5801 = vpow2.f32 %v4113_v33  ;;  %v4116_v13 = vmul.f32 -1.442695, %v6824_v38  ;;  %5332 = vmatmul.mubr.bf16.gmra.mxu1 %v2589_v61  ;;  %v6833_v43 = vadd.f32 %v6541_v15, %v1231_v56 }
 0x198   : > { %v5778_v4 = vpop.eup %5777  ;;  %5803 = vrcp.f32 %v1863_v21  ;;  %v1868_v10 = vadd.f32 1.0, %v5776_v6  ;;  %v5214_v59 = vpop.f32.mrf.mxu0  ;;  %v2497_v27 = vadd.f32 %v4496_v48, %v2241_v29  ;;  %v2494_v30 = vadd.f32 %v4491_v11, %v2238_v32 }
 0x199   : > { %v5780_v12 = vpop.eup %5779  ;;  %v2495_v25 = vadd.f32 %v4492_v45, %v2239_v51  ;;  %5805 = vpow2.f32 %v4111_v42  ;;  %v6840_v58 = vadd.f32 %v6541_v15, %v5214_v59  ;;  %v4114_v0 = vmul.f32 -1.442695, %v6833_v43 }
 0x19a   : > { %v5782_v53 = vpop.eup %5781  ;;  %5807 = vrcp.f32 %v1868_v10  ;;  %v1866_v1 = vadd.f32 1.0, %v5780_v12  ;;  %v1234_v24 = vpop.f32.mrf.mxu0  ;;  %v2496_v7 = vadd.f32 %v4495_v18, %v2240_v57  ;;  %v2244_v63 = vmul.f32 %v5778_v4, %v6692_v9 }
 0x19b   : > { %v5784_v14 = vpop.eup %5783  ;;  %5809 = vpow2.f32 %v4116_v13  ;;  %v4117_v39 = vmul.f32 -1.442695, %v6840_v58  ;;  %v6850_v26 = vadd.f32 %v6541_v15, %v1234_v24  ;;  %v2590_v36 = vpack.c.bf16 %v2495_v25, %v2494_v30 }
 0x19c   : > { %v5786_v20 = vpop.eup %5785  ;;  %5811 = vrcp.f32 %v1866_v1  ;;  %v1869_v55 = vadd.f32 1.0, %v5784_v14  ;;  %v5217_v35 = vpop.f32.mrf.mxu0  ;;  %v2591_v41 = vpack.c.bf16 %v2497_v27, %v2496_v7  ;;  %v2242_v29 = vmul.f32 %v5782_v53, %v6701_v8 }
 0x19d   : > { %v5788_v33 = vpop.eup %5787  ;;  %v2245_v2 = vmul.f32 %v5786_v20, %v6708_v31  ;;  %5813 = vpow2.f32 %v4114_v0  ;;  %v6854_v61 = vadd.f32 %v6541_v15, %v5217_v35  ;;  %v4115_v23 = vmul.f32 -1.442695, %v6850_v26  ;;  %5335 = vmatprep.mubr.bf16.mxu1 %v2590_v36 }
 0x19e   : > { %v5790_v9 = vpop.eup %5789  ;;  %5815 = vrcp.f32 %v1869_v55  ;;  %v1867_v42 = vadd.f32 1.0, %v5788_v33  ;;  %v1247_v32 = vpop.f32.mrf.mxu0  ;;  %v2500_v56 = vadd.f32 %v4495_v18, %v2244_v63  ;;  %v4504_v31 = vunpack.c.h.bf16 %v6812_v3 }
 0x19f   : > { %v5792_v21 = vpop.eup %5791  ;;  %v1872_v6 = vadd.f32 1.0, %v5790_v9  ;;  %5817 = vpow2.f32 %v4117_v39  ;;  %5336 = vmatmul.mubr.bf16.gmra.mxu1 %v2591_v41  ;;  %v4120_v8 = vmul.f32 -1.442695, %v6854_v61  ;;  %v6864_v13 = vadd.f32 %v6541_v15, %v1247_v32 }
 0x1a0   : > { %v5794_v57 = vpop.eup %5793  ;;  %v2243_v51 = vmul.f32 %v5792_v21, %v6718_v28  ;;  %5819 = vrcp.f32 %v1867_v42  ;;  %v5218_v4 = vpop.f32.mrf.mxu0  ;;  %v2501_v59 = vadd.f32 %v4496_v48, %v2245_v2  ;;  %v2498_v28 = vadd.f32 %v4491_v11, %v2242_v29 }
 0x1a1   : > { %v5796_v10 = vpop.eup %5795  ;;  %5821 = vrcp.f32 %v1872_v6  ;;  %v1870_v18 = vadd.f32 1.0, %v5794_v57  ;;  %v6869_v12 = vadd.f32 %v6541_v15, %v5218_v4  ;;  %v4118_v53 = vmul.f32 -1.442695, %v6864_v13 }
 0x1a2   : > { %v5798_v27 = vpop.eup %5797  ;;  %v2499_v25 = vadd.f32 %v4492_v45, %v2243_v51  ;;  %5823 = vpow2.f32 %v4115_v23  ;;  %v1250_v30 = vpop.f32.mrf.mxu0  ;;  %v4500_v11 = vunpack.c.h.bf16 %v6820_v37  ;;  %v2248_v55 = vmul.f32 %v5796_v10, %v6722_v22 }
 0x1a3   : > { %v5800_v1 = vpop.eup %5799  ;;  %v2246_v60 = vmul.f32 %v5798_v27, %v6732_v34  ;;  %5825 = vrcp.f32 %v1870_v18  ;;  %v4121_v48 = vmul.f32 -1.442695, %v6869_v12  ;;  %v6879_v0 = vadd.f32 %v6541_v15, %v1250_v30  ;;  %v6912_v18 = vld [vmem:[%s6245_s24 + $0xa8] sm:$0xff]   ;;  %v6915_v27 = vld [vmem:[%s6245_s24 + $0xa0] sm:$0xff]  }
 0x1a4   : > { %v5802_v24 = vpop.eup %5801  ;;  %v2249_v14 = vmul.f32 %v5800_v1, %v6737_v40  ;;  %5827 = vpow2.f32 %v4120_v8  ;;  %v2592_v16 = vpack.c.bf16 %v2499_v25, %v2498_v28  ;;  %v5221_v45 = vpop.f32.mrf.mxu0  ;;  %v2593_v34 = vpack.c.bf16 %v2501_v59, %v2500_v56 }
 0x1a5   : > { %v5804_v7 = vpop.eup %5803  ;;  %v1873_v63 = vadd.f32 1.0, %v5802_v24  ;;  %5829 = vpow2.f32 %v4118_v53  ;;  %v4119_v39 = vmul.f32 -1.442695, %v6879_v0  ;;  %v6887_v40 = vadd.f32 %v6541_v15, %v5221_v45 }
 0x1a6   : > { %v5806_v20 = vpop.eup %5805  ;;  %v2247_v36 = vmul.f32 %v5804_v7, %v6747_v19  ;;  %5831 = vpow2.f32 %v4121_v48  ;;  %5339 = vmatprep.mubr.bf16.mxu1 %v2592_v16  ;;  %v1263_v35 = vpop.f32.mrf.mxu0  ;;  %v2502_v2 = vadd.f32 %v4499_v47, %v2246_v60  ;;  %v2505_v22 = vadd.f32 %v4504_v31, %v2249_v14 }
 0x1a7   : > { %v5808_v33 = vpop.eup %5807  ;;  %5833 = vrcp.f32 %v1873_v63  ;;  %v1871_v41 = vadd.f32 1.0, %v5806_v20  ;;  %5340 = vmatmul.mubr.bf16.gmra.mxu1 %v2593_v34  ;;  %v6892_v9 = vadd.f32 %v6541_v15, %v1263_v35  ;;  %v4124_v42 = vmul.f32 -1.442695, %v6887_v40  ;;  %v6903_v15 = vld [vmem:[%s7454_s2] ss:$0 sm:$0xff] }
 0x1a8   : > { %v5810_v29 = vpop.eup %5809  ;;  %v2503_v19 = vadd.f32 %v4500_v11, %v2247_v36  ;;  %5835 = vpow2.f32 %v4119_v39  ;;  %v5222_v23 = vpop.f32.mrf.mxu0  ;;  %v2504_v51 = vadd.f32 %v4503_v5, %v2248_v55  ;;  %v2252_v1 = vmul.f32 %v5808_v33, %v6755_v17 }
 0x1a9   : > { %v5812_v32 = vpop.eup %5811  ;;  %5837 = vrcp.f32 %v1871_v41  ;;  %v1876_v21 = vadd.f32 1.0, %v5810_v29  ;;  %v4122_v56 = vmul.f32 -1.442695, %v6892_v9  ;;  %v6906_v6 = vadd.f32 %v6903_v15, %v5222_v23 }
 0x1aa   : > { %v5814_v57 = vpop.eup %5813  ;;  %v2250_v8 = vmul.f32 %v5812_v32, %v6760_v54  ;;  %5839 = vpow2.f32 %v4124_v42  ;;  %v1266_v4 = vpop.f32.mrf.mxu0  ;;  %v2594_v10 = vpack.c.bf16 %v2503_v19, %v2502_v2  ;;  %v2595_v48 = vpack.c.bf16 %v2505_v22, %v2504_v51 }
 0x1ab   : > { %v5816_v59 = vpop.eup %5815  ;;  %5841 = vrcp.f32 %v1876_v21  ;;  %v1874_v28 = vadd.f32 1.0, %v5814_v57  ;;  %v4125_v25 = vmul.f32 -1.442695, %v6906_v6  ;;  %v6919_v53 = vadd.f32 %v6903_v15, %v1266_v4 }
 0x1ac   : > { %v5818_v30 = vpop.eup %5817  ;;  %v2253_v54 = vmul.f32 %v5816_v59, %v6769_v44  ;;  %5843 = vpow2.f32 %v4122_v56  ;;  %5343 = vmatprep.mubr.bf16.mxu1 %v2594_v10  ;;  %v5225_v60 = vpop.f32.mrf.mxu0  ;;  %v4511_v39 = vunpack.c.l.bf16 %v6912_v18  ;;  %v4507_v17 = vunpack.c.l.bf16 %v6915_v27  ;;  %v6949_v56 = vld [vmem:[%s6245_s24 + $0xb8] sm:$0xff]  }
 0x1ad   : > { %v5820_v24 = vpop.eup %5819  ;;  %5845 = vrcp.f32 %v1874_v28  ;;  %v1877_v14 = vadd.f32 1.0, %v5818_v30  ;;  %v4123_v16 = vmul.f32 -1.442695, %v6919_v53  ;;  %v6925_v45 = vadd.f32 %v6903_v15, %v5225_v60 }
 0x1ae   : > { %v5822_v7 = vpop.eup %5821  ;;  %v2251_v63 = vmul.f32 %v5820_v24, %v6782_v46  ;;  %5847 = vpow2.f32 %v4125_v25  ;;  %v1279_v44 = vpop.f32.mrf.mxu0  ;;  %v2506_v20 = vadd.f32 %v4499_v47, %v2250_v8  ;;  %v2509_v46 = vadd.f32 %v4504_v31, %v2253_v54  ;;  %v6957_v25 = vld [vmem:[%s6245_s24 + $0xb0] sm:$0xff]  }
 0x1af   : > { %v5824_v34 = vpop.eup %5823  ;;  %5849 = vrcp.f32 %v1877_v14  ;;  %v4128_v55 = vmul.f32 -1.442695, %v6925_v45  ;;  %5344 = vmatmul.mubr.bf16.gmra.mxu1 %v2595_v48  ;;  %v6934_v36 = vadd.f32 %v6903_v15, %v1279_v44  ;;  %v2508_v47 = vadd.f32 %v4503_v5, %v2252_v1 }
 0x1b0   : > { %v5826_v35 = vpop.eup %5825  ;;  %v2507_v33 = vadd.f32 %v4500_v11, %v2251_v63  ;;  %v1875_v2 = vadd.f32 1.0, %v5824_v34  ;;  %5851 = vpow2.f32 %v4123_v16  ;;  %v5226_v41 = vpop.f32.mrf.mxu0  ;;  %v4512_v22 = vunpack.c.h.bf16 %v6912_v18 }
 0x1b1   : > { %v5828_v29 = vpop.eup %5827  ;;  %5853 = vpow2.f32 %v4128_v55  ;;  %v4126_v19 = vmul.f32 -1.442695, %v6934_v36  ;;  %v6945_v31 = vadd.f32 %v6903_v15, %v5226_v41  ;;  %v4508_v21 = vunpack.c.h.bf16 %v6915_v27 }
 0x1b2   : > { %v5830_v42 = vpop.eup %5829  ;;  %5855 = vrcp.f32 %v1875_v2  ;;  %v1880_v23 = vadd.f32 1.0, %v5828_v29  ;;  %v1282_v37 = vpop.f32.mrf.mxu0  ;;  %v2596_v11 = vpack.c.bf16 %v2507_v33, %v2506_v20  ;;  %v2597_v10 = vpack.c.bf16 %v2509_v46, %v2508_v47 }
 0x1b3   : > { %v5832_v32 = vpop.eup %5831  ;;  %v1878_v3 = vadd.f32 1.0, %v5830_v42  ;;  %5857 = vpow2.f32 %v4126_v19  ;;  %v6952_v5 = vadd.f32 %v6903_v15, %v1282_v37  ;;  %v4129_v8 = vmul.f32 -1.442695, %v6945_v31 }
 0x1b4   : > { %v5834_v57 = vpop.eup %5833  ;;  %5859 = vrcp.f32 %v1880_v23  ;;  %v1881_v51 = vadd.f32 1.0, %v5832_v32  ;;  %5347 = vmatprep.mubr.bf16.mxu1 %v2596_v11  ;;  %v5229_v4 = vpop.f32.mrf.mxu0  ;;  %v2254_v60 = vmul.f32 %v5826_v35, %v6797_v50  ;;  %v4519_v48 = vunpack.c.l.bf16 %v6949_v56 }
 0x1b5   : > { %v5836_v59 = vpop.eup %5835  ;;  %v2257_v28 = vmul.f32 %v5834_v57, %v6808_v49  ;;  %5861 = vrcp.f32 %v1878_v3  ;;  %v4127_v30 = vmul.f32 -1.442695, %v6952_v5  ;;  %v6961_v1 = vadd.f32 %v6903_v15, %v5229_v4 }
 0x1b6   : > { %v5838_v54 = vpop.eup %5837  ;;  %5863 = vrcp.f32 %v1881_v51  ;;  %v1879_v24 = vadd.f32 1.0, %v5836_v59  ;;  %v1295_v14 = vpop.f32.mrf.mxu0  ;;  %v2256_v63 = vmul.f32 %v5822_v7, %v6788_v52  ;;  %v4515_v20 = vunpack.c.l.bf16 %v6957_v25 }
 0x1b7   : > { %v5840_v16 = vpop.eup %5839  ;;  %v2255_v49 = vmul.f32 %v5838_v54, %v6815_v62  ;;  %5865 = vpow2.f32 %v4129_v8  ;;  %v4132_v44 = vmul.f32 -1.442695, %v6961_v1  ;;  %5348 = vmatmul.mubr.bf16.gmra.mxu1 %v2597_v10  ;;  %v6970_v50 = vadd.f32 %v6903_v15, %v1295_v14 }
 0x1b8   : > { %v5842_v34 = vpop.eup %5841  ;;  %5867 = vrcp.f32 %v1879_v24  ;;  %v1884_v55 = vadd.f32 1.0, %v5840_v16  ;;  %v5230_v35 = vpop.f32.mrf.mxu0  ;;  %v2513_v33 = vadd.f32 %v4512_v22, %v2257_v28  ;;  %v2510_v2 = vadd.f32 %v4507_v17, %v2254_v60 }
 0x1b9   : > { %v5844_v46 = vpop.eup %5843  ;;  %v2511_v52 = vadd.f32 %v4508_v21, %v2255_v49  ;;  %5869 = vpow2.f32 %v4127_v30  ;;  %v6977_v62 = vadd.f32 %v6903_v15, %v5230_v35  ;;  %v4130_v29 = vmul.f32 -1.442695, %v6970_v50 }
 0x1ba   : > { %v5846_v7 = vpop.eup %5845  ;;  %5871 = vrcp.f32 %v1884_v55  ;;  %v1882_v41 = vadd.f32 1.0, %v5844_v46  ;;  %v1298_v47 = vpop.f32.mrf.mxu0  ;;  %v2512_v42 = vadd.f32 %v4511_v39, %v2256_v63  ;;  %v2260_v23 = vmul.f32 %v5842_v34, %v6824_v38 }
 0x1bb   : > { %v5848_v19 = vpop.eup %5847  ;;  %5873 = vpow2.f32 %v4132_v44  ;;  %v4133_v37 = vmul.f32 -1.442695, %v6977_v62  ;;  %v6987_v3 = vadd.f32 %v6903_v15, %v1298_v47  ;;  %v2598_v57 = vpack.c.bf16 %v2511_v52, %v2510_v2 }
 0x1bc   : > { %v5850_v11 = vpop.eup %5849  ;;  %5875 = vrcp.f32 %v1882_v41  ;;  %v1885_v32 = vadd.f32 1.0, %v5848_v19  ;;  %v5233_v51 = vpop.f32.mrf.mxu0  ;;  %v2599_v59 = vpack.c.bf16 %v2513_v33, %v2512_v42  ;;  %v2258_v28 = vmul.f32 %v5846_v7, %v6833_v43 }
 0x1bd   : > { %v5852_v8 = vpop.eup %5851  ;;  %v2261_v4 = vmul.f32 %v5850_v11, %v6840_v58  ;;  %5877 = vpow2.f32 %v4130_v29  ;;  %v6991_v10 = vadd.f32 %v6903_v15, %v5233_v51  ;;  %v4131_v54 = vmul.f32 -1.442695, %v6987_v3  ;;  %5351 = vmatprep.mubr.bf16.mxu1 %v2598_v57 }
 0x1be   : > { %v5854_v38 = vpop.eup %5853  ;;  %5879 = vrcp.f32 %v1885_v32  ;;  %v1883_v30 = vadd.f32 1.0, %v5852_v8  ;;  %v1311_v60 = vpop.f32.mrf.mxu0  ;;  %v2516_v14 = vadd.f32 %v4511_v39, %v2260_v23  ;;  %v4520_v58 = vunpack.c.h.bf16 %v6949_v56 }
 0x1bf   : > { %v5856_v24 = vpop.eup %5855  ;;  %v1888_v16 = vadd.f32 1.0, %v5854_v38  ;;  %5881 = vpow2.f32 %v4133_v37  ;;  %5352 = vmatmul.mubr.bf16.gmra.mxu1 %v2599_v59  ;;  %v4136_v43 = vmul.f32 -1.442695, %v6991_v10  ;;  %v7001_v44 = vadd.f32 %v6903_v15, %v1311_v60 }
 0x1c0   : > { %v5858_v63 = vpop.eup %5857  ;;  %v2259_v49 = vmul.f32 %v5856_v24, %v6850_v26  ;;  %5883 = vrcp.f32 %v1883_v30  ;;  %v5234_v34 = vpop.f32.mrf.mxu0  ;;  %v2517_v35 = vadd.f32 %v4512_v22, %v2261_v4  ;;  %v2514_v26 = vadd.f32 %v4507_v17, %v2258_v28 }
 0x1c1   : > { %v5860_v55 = vpop.eup %5859  ;;  %5885 = vrcp.f32 %v1888_v16  ;;  %v1886_v39 = vadd.f32 1.0, %v5858_v63  ;;  %v7006_v46 = vadd.f32 %v6903_v15, %v5234_v34  ;;  %v4134_v7 = vmul.f32 -1.442695, %v7001_v44 }
 0x1c2   : > { %v5862_v33 = vpop.eup %5861  ;;  %v2515_v52 = vadd.f32 %v4508_v21, %v2259_v49  ;;  %5887 = vpow2.f32 %v4131_v54  ;;  %v1314_v2 = vpop.f32.mrf.mxu0  ;;  %v4516_v17 = vunpack.c.h.bf16 %v6957_v25  ;;  %v2264_v32 = vmul.f32 %v5860_v55, %v6854_v61 }
 0x1c3   : > { %v5864_v41 = vpop.eup %5863  ;;  %v2262_v18 = vmul.f32 %v5862_v33, %v6864_v13  ;;  %5889 = vrcp.f32 %v1886_v39  ;;  %v4137_v22 = vmul.f32 -1.442695, %v7006_v46  ;;  %v7016_v29 = vadd.f32 %v6903_v15, %v1314_v2  ;;  %v7044_v39 = vld [vmem:[%s6245_s24 + $0xc8] sm:$0xff]   ;;  %v7047_v33 = vld [vmem:[%s6245_s24 + $0xc0] sm:$0xff]  }
 0x1c4   : > { %v5866_v47 = vpop.eup %5865  ;;  %v2265_v19 = vmul.f32 %v5864_v41, %v6869_v12  ;;  %5891 = vpow2.f32 %v4136_v43  ;;  %v2600_v27 = vpack.c.bf16 %v2515_v52, %v2514_v26  ;;  %v5237_v21 = vpop.f32.mrf.mxu0  ;;  %v2601_v13 = vpack.c.bf16 %v2517_v35, %v2516_v14 }
 0x1c5   : > { %v5868_v42 = vpop.eup %5867  ;;  %v1889_v23 = vadd.f32 1.0, %v5866_v47  ;;  %5893 = vpow2.f32 %v4134_v7  ;;  %v4135_v37 = vmul.f32 -1.442695, %v7016_v29  ;;  %v7024_v12 = vadd.f32 %v6903_v15, %v5237_v21 }
 0x1c6   : > { %v5870_v11 = vpop.eup %5869  ;;  %v2263_v57 = vmul.f32 %v5868_v42, %v6879_v0  ;;  %5895 = vpow2.f32 %v4137_v22  ;;  %5355 = vmatprep.mubr.bf16.mxu1 %v2600_v27  ;;  %v1327_v51 = vpop.f32.mrf.mxu0  ;;  %v2518_v4 = vadd.f32 %v4515_v20, %v2262_v18  ;;  %v2521_v61 = vadd.f32 %v4520_v58, %v2265_v19 }
 0x1c7   : > { %v5872_v8 = vpop.eup %5871  ;;  %5897 = vrcp.f32 %v1889_v23  ;;  %v1887_v59 = vadd.f32 1.0, %v5870_v11  ;;  %5356 = vmatmul.mubr.bf16.gmra.mxu1 %v2601_v13  ;;  %v7029_v38 = vadd.f32 %v6903_v15, %v1327_v51  ;;  %v4140_v30 = vmul.f32 -1.442695, %v7024_v12 }
 0x1c8   : > { %v5874_v28 = vpop.eup %5873  ;;  %v2519_v0 = vadd.f32 %v4516_v17, %v2263_v57  ;;  %5899 = vpow2.f32 %v4135_v37  ;;  %v5238_v54 = vpop.f32.mrf.mxu0  ;;  %v2520_v49 = vadd.f32 %v4519_v48, %v2264_v32  ;;  %v2268_v41 = vmul.f32 %v5872_v8, %v6887_v40 }
 0x1c9   : > { %v5876_v60 = vpop.eup %5875  ;;  %5901 = vrcp.f32 %v1887_v59  ;;  %v1892_v24 = vadd.f32 1.0, %v5874_v28  ;;  %v4138_v14 = vmul.f32 -1.442695, %v7029_v38  ;;  %v7038_v16 = vadd.f32 %v6903_v15, %v5238_v54 }
 0x1ca   : > { %v5878_v63 = vpop.eup %5877  ;;  %v2266_v43 = vmul.f32 %v5876_v60, %v6892_v9  ;;  %5903 = vpow2.f32 %v4140_v30  ;;  %v1330_v34 = vpop.f32.mrf.mxu0  ;;  %v2602_v55 = vpack.c.bf16 %v2519_v0, %v2518_v4  ;;  %v2603_v22 = vpack.c.bf16 %v2521_v61, %v2520_v49 }
 0x1cb   : > { %v5880_v35 = vpop.eup %5879  ;;  %5905 = vrcp.f32 %v1892_v24  ;;  %v1890_v26 = vadd.f32 1.0, %v5878_v63  ;;  %v4141_v52 = vmul.f32 -1.442695, %v7038_v16  ;;  %v7051_v7 = vadd.f32 %v6903_v15, %v1330_v34 }
 0x1cc   : > { %v5882_v2 = vpop.eup %5881  ;;  %v2269_v9 = vmul.f32 %v5880_v35, %v6906_v6  ;;  %5907 = vpow2.f32 %v4138_v14  ;;  %5359 = vmatprep.mubr.bf16.mxu1 %v2602_v55  ;;  %v5241_v18 = vpop.f32.mrf.mxu0  ;;  %v4527_v37 = vunpack.c.l.bf16 %v7044_v39  ;;  %v4523_v40 = vunpack.c.l.bf16 %v7047_v33  ;;  %v7081_v14 = vld [vmem:[%s6245_s24 + $0xd8] sm:$0xff]  }
 0x1cd   : > { %v5884_v47 = vpop.eup %5883  ;;  %5909 = vrcp.f32 %v1890_v26  ;;  %v1893_v19 = vadd.f32 1.0, %v5882_v2  ;;  %v4139_v27 = vmul.f32 -1.442695, %v7051_v7  ;;  %v7057_v21 = vadd.f32 %v6903_v15, %v5241_v18 }
 0x1ce   : > { %v5886_v42 = vpop.eup %5885  ;;  %v2267_v23 = vmul.f32 %v5884_v47, %v6919_v53  ;;  %5911 = vpow2.f32 %v4141_v52  ;;  %v1343_v6 = vpop.f32.mrf.mxu0  ;;  %v2522_v11 = vadd.f32 %v4515_v20, %v2266_v43  ;;  %v2525_v53 = vadd.f32 %v4520_v58, %v2269_v9  ;;  %v7089_v52 = vld [vmem:[%s6245_s24 + $0xd0] sm:$0xff]  }
 0x1cf   : > { %v5888_v13 = vpop.eup %5887  ;;  %5913 = vrcp.f32 %v1893_v19  ;;  %v4144_v32 = vmul.f32 -1.442695, %v7057_v21  ;;  %5360 = vmatmul.mubr.bf16.gmra.mxu1 %v2603_v22  ;;  %v7066_v57 = vadd.f32 %v6903_v15, %v1343_v6  ;;  %v2524_v20 = vadd.f32 %v4519_v48, %v2268_v41 }
 0x1d0   : > { %v5890_v51 = vpop.eup %5889  ;;  %v2523_v8 = vadd.f32 %v4516_v17, %v2267_v23  ;;  %v1891_v4 = vadd.f32 1.0, %v5888_v13  ;;  %5915 = vpow2.f32 %v4139_v27  ;;  %v5242_v59 = vpop.f32.mrf.mxu0  ;;  %v4528_v61 = vunpack.c.h.bf16 %v7044_v39 }
 0x1d1   : > { %v5892_v28 = vpop.eup %5891  ;;  %5917 = vpow2.f32 %v4144_v32  ;;  %v4142_v0 = vmul.f32 -1.442695, %v7066_v57  ;;  %v7077_v58 = vadd.f32 %v6903_v15, %v5242_v59  ;;  %v4524_v24 = vunpack.c.h.bf16 %v7047_v33 }
 0x1d2   : > { %v5894_v30 = vpop.eup %5893  ;;  %5919 = vrcp.f32 %v1891_v4  ;;  %v1896_v54 = vadd.f32 1.0, %v5892_v28  ;;  %v1346_v25 = vpop.f32.mrf.mxu0  ;;  %v2604_v17 = vpack.c.bf16 %v2523_v8, %v2522_v11  ;;  %v2605_v55 = vpack.c.bf16 %v2525_v53, %v2524_v20 }
 0x1d3   : > { %v5896_v60 = vpop.eup %5895  ;;  %v1894_v56 = vadd.f32 1.0, %v5894_v30  ;;  %5921 = vpow2.f32 %v4142_v0  ;;  %v7084_v48 = vadd.f32 %v6903_v15, %v1346_v25  ;;  %v4145_v43 = vmul.f32 -1.442695, %v7077_v58 }
 0x1d4   : > { %v5898_v63 = vpop.eup %5897  ;;  %5923 = vrcp.f32 %v1896_v54  ;;  %v1897_v49 = vadd.f32 1.0, %v5896_v60  ;;  %5363 = vmatprep.mubr.bf16.mxu1 %v2604_v17  ;;  %v5245_v34 = vpop.f32.mrf.mxu0  ;;  %v2270_v18 = vmul.f32 %v5890_v51, %v6934_v36  ;;  %v4535_v22 = vunpack.c.l.bf16 %v7081_v14 }
 0x1d5   : > { %v5900_v35 = vpop.eup %5899  ;;  %v2273_v26 = vmul.f32 %v5898_v63, %v6945_v31  ;;  %5925 = vrcp.f32 %v1894_v56  ;;  %v4143_v2 = vmul.f32 -1.442695, %v7084_v48  ;;  %v7093_v41 = vadd.f32 %v6903_v15, %v5245_v34 }
 0x1d6   : > { %v5902_v9 = vpop.eup %5901  ;;  %5927 = vrcp.f32 %v1897_v49  ;;  %v1895_v47 = vadd.f32 1.0, %v5900_v35  ;;  %v1359_v19 = vpop.f32.mrf.mxu0  ;;  %v2272_v23 = vmul.f32 %v5886_v42, %v6925_v45  ;;  %v4531_v11 = vunpack.c.l.bf16 %v7089_v52 }
 0x1d7   : > { %v5904_v27 = vpop.eup %5903  ;;  %v2271_v31 = vmul.f32 %v5902_v9, %v6952_v5  ;;  %5929 = vpow2.f32 %v4145_v43  ;;  %v4148_v6 = vmul.f32 -1.442695, %v7093_v41  ;;  %5364 = vmatmul.mubr.bf16.gmra.mxu1 %v2605_v55  ;;  %v7102_v36 = vadd.f32 %v6903_v15, %v1359_v19 }
 0x1d8   : > { %v5906_v13 = vpop.eup %5905  ;;  %5931 = vrcp.f32 %v1895_v47  ;;  %v1900_v32 = vadd.f32 1.0, %v5904_v27  ;;  %v5246_v51 = vpop.f32.mrf.mxu0  ;;  %v2529_v8 = vadd.f32 %v4528_v61, %v2273_v26  ;;  %v2526_v4 = vadd.f32 %v4523_v40, %v2270_v18 }
 0x1d9   : > { %v5908_v53 = vpop.eup %5907  ;;  %v2527_v45 = vadd.f32 %v4524_v24, %v2271_v31  ;;  %5933 = vpow2.f32 %v4143_v2  ;;  %v7109_v5 = vadd.f32 %v6903_v15, %v5246_v51  ;;  %v4146_v28 = vmul.f32 -1.442695, %v7102_v36 }
 0x1da   : > { %v5910_v42 = vpop.eup %5909  ;;  %5935 = vrcp.f32 %v1900_v32  ;;  %v1898_v59 = vadd.f32 1.0, %v5908_v53  ;;  %v1362_v20 = vpop.f32.mrf.mxu0  ;;  %v2528_v30 = vadd.f32 %v4527_v37, %v2272_v23  ;;  %v4536_v54 = vunpack.c.h.bf16 %v7081_v14 }
 0x1db   : > { %v5912_v0 = vpop.eup %5911  ;;  %5937 = vpow2.f32 %v4148_v6  ;;  %v4149_v25 = vmul.f32 -1.442695, %v7109_v5  ;;  %v7119_v56 = vadd.f32 %v6903_v15, %v1362_v20  ;;  %v2606_v63 = vpack.c.bf16 %v2527_v45, %v2526_v4  ;;  %v7132_v6 = vld [vmem:[%s7457_s5] ss:$0 sm:$0xff] }
 0x1dc   : > { %v5914_v17 = vpop.eup %5913  ;;  %5939 = vrcp.f32 %v1898_v59  ;;  %v1901_v60 = vadd.f32 1.0, %v5912_v0  ;;  %v5249_v49 = vpop.f32.mrf.mxu0  ;;  %v2276_v34 = vmul.f32 %v5906_v13, %v6961_v1  ;;  %v2607_v26 = vpack.c.bf16 %v2529_v8, %v2528_v30 }
 0x1dd   : > { %v5916_v43 = vpop.eup %5915  ;;  %5941 = vpow2.f32 %v4146_v28  ;;  %v7123_v55 = vadd.f32 %v6903_v15, %v5249_v49  ;;  %v5273_v35 = vpop.f32.mrf.mxu1  ;;  %v2274_v9 = vmul.f32 %v5910_v42, %v6970_v50  ;;  %v4147_v47 = vmul.f32 -1.442695, %v7119_v56  ;;  %5367 = vmatprep.mubr.bf16.mxu1 %v2606_v63 }
 0x1de   : > { %v5918_v2 = vpop.eup %5917  ;;  %5943 = vrcp.f32 %v1901_v60  ;;  %v1899_v18 = vadd.f32 1.0, %v5916_v43  ;;  %v1375_v19 = vpop.f32.mrf.mxu0  ;;  %v2277_v23 = vmul.f32 %v5914_v17, %v6977_v62  ;;  %v4532_v1 = vunpack.c.h.bf16 %v7089_v52 }
 0x1df   : > { %v5920_v27 = vpop.eup %5919  ;;  %v1904_v31 = vadd.f32 1.0, %v5918_v2  ;;  %5945 = vpow2.f32 %v4149_v25  ;;  %5368 = vmatmul.mubr.bf16.gmra.mxu1 %v2607_v26  ;;  %v2727_v50 = vpop.f32.mrf.mxu1  ;;  %v4152_v51 = vmul.f32 -1.442695, %v7123_v55  ;;  %v7137_v53 = vadd.f32 %v6903_v15, %v1375_v19 }
 0x1e0   : > { %v5922_v13 = vpop.eup %5921  ;;  %v2275_v32 = vmul.f32 %v5920_v27, %v6987_v3  ;;  %5947 = vrcp.f32 %v1899_v18  ;;  %v5250_v62 = vpop.f32.mrf.mxu0  ;;  %v2532_v45 = vadd.f32 %v4527_v37, %v2276_v34  ;;  %v2530_v3 = vadd.f32 %v4523_v40, %v2274_v9 }
 0x1e1   : > { %v5924_v8 = vpop.eup %5923  ;;  %5949 = vrcp.f32 %v1904_v31  ;;  %v1902_v42 = vadd.f32 1.0, %v5922_v13  ;;  %v7142_v4 = vadd.f32 %v6903_v15, %v5250_v62  ;;  %v5274_v59 = vpop.f32.mrf.mxu1  ;;  %v2736_v20 = vadd.f32 %v5273_v35, %v7132_v6 }
 0x1e2   : > { %v5926_v28 = vpop.eup %5925  ;;  %5951 = vpow2.f32 %v4147_v47  ;;  %v4150_v0 = vmul.f32 -1.442695, %v7137_v53  ;;  %v1378_v30 = vpop.f32.mrf.mxu0  ;;  %v2531_v37 = vadd.f32 %v4524_v24, %v2275_v32  ;;  %v2739_v60 = vadd.f32 %v5274_v59, %v7132_v6 }
 0x1e3   : > { %v5928_v25 = vpop.eup %5927  ;;  %5953 = vrcp.f32 %v1902_v42  ;;  %v4153_v17 = vmul.f32 -1.442695, %v7142_v4  ;;  %v2730_v63 = vpop.f32.mrf.mxu1  ;;  %v2533_v40 = vadd.f32 %v4528_v61, %v2277_v23  ;;  %v2728_v43 = vadd.f32 %v7132_v6, %v2727_v50 }
 0x1e4   : > { %v5930_v49 = vpop.eup %5929  ;;  %5955 = vpow2.f32 %v4152_v51  ;;  %v7163_v33 = vadd.f32 %v6903_v15, %v1378_v30  ;;  %v5253_v24 = vpop.f32.mrf.mxu0  ;;  %v2280_v35 = vmul.f32 %v5924_v8, %v6991_v10  ;;  %v4561_v39 = vpack.c.bf16 %v2739_v60, %v2736_v20 }
 0x1e5   : > { %v5932_v34 = vpop.eup %5931  ;;  %v1905_v26 = vadd.f32 1.0, %v5930_v49  ;;  %5957 = vpow2.f32 %v4150_v0  ;;  %v5277_v61 = vpop.f32.mrf.mxu1  ;;  %v2278_v9 = vmul.f32 %v5926_v28, %v7001_v44  ;;  %v2281_v18 = vmul.f32 %v5928_v25, %v7006_v46 }
 0x1e6   : > { %v5934_v2 = vpop.eup %5933  ;;  %5959 = vpow2.f32 %v4153_v17  ;;  %v4151_v47 = vmul.f32 -1.442695, %v7163_v33  ;;  %v1391_v19 = vpop.f32.mrf.mxu0  ;;  %4904 = vst [vmem:[%s7160_s11 + $0x8] sm:$0xff] %v4561_v39   ;;  %v2731_v10 = vadd.f32 %v7132_v6, %v2730_v63  ;;  %v2608_v31 = vpack.c.bf16 %v2531_v37, %v2530_v3 }
 0x1e7   : > { %v7169_v27 = vpop.eup %5935  ;;  %5961 = vrcp.f32 %v1905_v26  ;;  %v1903_v23 = vadd.f32 1.0, %v5934_v2  ;;  %v2743_v50 = vpop.f32.mrf.mxu1  ;;  %v2279_v32 = vmul.f32 %v5932_v34, %v7016_v29  ;;  %v7175_v44 = vadd.f32 %v6903_v15, %v5253_v24 }
 0x1e8   : > { %v5938_v13 = vpop.eup %5937  ;;  %5963 = vpow2.f32 %v4151_v47  ;;  %v2609_v46 = vpack.c.bf16 %v2533_v40, %v2532_v45  ;;  %v5254_v51 = vpop.f32.mrf.mxu0  ;;  %v4556_v8 = vpack.c.bf16 %v2731_v10, %v2728_v43  ;;  %5371 = vmatprep.mubr.bf16.mxu1 %v2608_v31  ;;  %v7179_v28 = vadd.f32 %v4535_v22, %v2280_v35 }
 0x1e9   : > { %v5940_v62 = vpop.eup %5939  ;;  %5965 = vrcp.f32 %v1903_v23  ;;  %v5278_v42 = vpop.f32.mrf.mxu1  ;;  %v2534_v29 = vadd.f32 %v4531_v11, %v2278_v9  ;;  %v4156_v3 = vmul.f32 -1.442695, %v7175_v44  ;;  %v7185_v45 = vadd.f32 %v6903_v15, %v1391_v19  ;;  %v7207_v19 = vld [vmem:[%s6245_s24 + $0xe0] sm:$0xff]  }
 0x1ea   : > { %v5942_v59 = vpop.eup %5941  ;;  %5372 = vmatmul.mubr.bf16.gmra.mxu1 %v2609_v46  ;;  %v2537_v0 = vadd.f32 %v4536_v54, %v2281_v18  ;;  %v1908_v30 = vadd.f32 1.0, %v5938_v13  ;;  %4557 = vst [vmem:[%s7160_s11] sm:$0xff] %v4556_v8   ;;  %v7191_v37 = vadd.f32 %v6903_v15, %v5254_v51  ;;  %v1394_v17 = vpop.f32.mrf.mxu0  ;;  %v2535_v49 = vadd.f32 %v4532_v1, %v2279_v32 }
 0x1eb   : > { %v5944_v20 = vpop.eup %5943  ;;  %v1906_v25 = vadd.f32 1.0, %v5942_v59  ;;  %v2746_v60 = vpop.f32.mrf.mxu1  ;;  %5967 = vpow2.f32 %v4156_v3  ;;  %v2752_v40 = vadd.f32 %v5277_v61, %v7132_v6  ;;  %v4154_v43 = vmul.f32 -1.442695, %v7185_v45 }
 0x1ec   : > { %v5946_v63 = vpop.eup %5945  ;;  %v4157_v35 = vmul.f32 -1.442695, %v7191_v37  ;;  %v2755_v26 = vadd.f32 %v5278_v42, %v7132_v6  ;;  %v2282_v9 = vmul.f32 %v5940_v62, %v7029_v38  ;;  %v7204_v47 = vadd.f32 %v6903_v15, %v1394_v17 }
 0x1ed   : > { %v5948_v24 = vpop.eup %5947  ;;  %5969 = vrcp.f32 %v1906_v25  ;;  %v1909_v34 = vadd.f32 1.0, %v5946_v63  ;;  %v5281_v39 = vpop.f32.mrf.mxu1  ;;  %v2744_v23 = vadd.f32 %v7132_v6, %v2743_v50  ;;  %v2747_v31 = vadd.f32 %v7132_v6, %v2746_v60 }
 0x1ee   : > { %v7199_v2 = vpop.eup %5949  ;;  %v2283_v18 = vmul.f32 %v5948_v24, %v7051_v7  ;;  %5971 = vpow2.f32 %v4154_v43  ;;  %v4571_v10 = vpack.c.bf16 %v2755_v26, %v2752_v40  ;;  %v2285_v38 = vmul.f32 %v5944_v20, %v7038_v16 }
 0x1ef   : > { %v5952_v61 = vpop.eup %5951  ;;  %5973 = vrcp.f32 %v1908_v30  ;;  %v2759_v13 = vpop.f32.mrf.mxu1  ;;  %v4155_v7 = vmul.f32 -1.442695, %v7204_v47  ;;  %v4566_v62 = vpack.c.bf16 %v2747_v31, %v2744_v23  ;;  %v2610_v50 = vpack.c.bf16 %v2535_v49, %v2534_v29 }
 0x1f0   : > { %v5954_v32 = vpop.eup %5953  ;;  %v1907_v46 = vadd.f32 1.0, %v5952_v61  ;;  %5975 = vpow2.f32 %v4157_v35  ;;  %v2539_v51 = vadd.f32 %v4532_v1, %v2283_v18  ;;  %4906 = vst [vmem:[%s7160_s11 + $0x18] sm:$0xff] %v4571_v10   ;;  %v4539_v59 = vunpack.c.l.bf16 %v7207_v19  ;;  %v7235_v18 = vld [vmem:[%s6245_s24 + $0xe8] sm:$0xff]  }
 0x1f1   : > { %v5956_v15 = vpop.eup %5955  ;;  %5977 = vrcp.f32 %v1909_v34  ;;  %v5282_v8 = vpop.f32.mrf.mxu1  ;;  %v4540_v3 = vunpack.c.h.bf16 %v7207_v19  ;;  %v2611_v16 = vpack.c.bf16 %v2537_v0, %v7179_v28  ;;  %v2284_v30 = vmul.f32 %v7169_v27, %v7024_v12  ;;  %4905 = vst [vmem:[%s7160_s11 + $0x10] sm:$0xff] %v4566_v62   ;;  %5375 = vmatprep.mubr.bf16.mxu1 %v2610_v50 }
 0x1f2   : > { %v5958_v42 = vpop.eup %5957  ;;  %5979 = vrcp.f32 %v1907_v46  ;;  %v2538_v1 = vadd.f32 %v4531_v11, %v2282_v9  ;;  %v2768_v60 = vadd.f32 %v5281_v39, %v7132_v6  ;;  %v2760_v63 = vadd.f32 %v7132_v6, %v2759_v13 }
 0x1f3   : > { %v5960_v20 = vpop.eup %5959  ;;  %v1910_v25 = vadd.f32 1.0, %v5958_v42  ;;  %5981 = vpow2.f32 %v4155_v7  ;;  %v2762_v29 = vpop.f32.mrf.mxu1  ;;  %5376 = vmatmul.mubr.bf16.gmra.mxu1 %v2611_v16  ;;  %v2771_v28 = vadd.f32 %v5282_v8, %v7132_v6  ;;  %v2541_v12 = vadd.f32 %v4536_v54, %v2285_v38 }
 0x1f4   : > { %v5962_v17 = vpop.eup %5961  ;;  %v2763_v0 = vadd.f32 %v7132_v6, %v2762_v29  ;;  %v2286_v52 = vmul.f32 %v5954_v32, %v7066_v57  ;;  %v2612_v11 = vpack.c.bf16 %v2539_v51, %v2538_v1  ;;  %v1913_v43 = vadd.f32 1.0, %v5960_v20 }
 0x1f5   : > { %v5964_v49 = vpop.eup %5963  ;;  %5983 = vrcp.f32 %v1910_v25  ;;  %v5285_v27 = vpop.f32.mrf.mxu1  ;;  %v4581_v34 = vpack.c.bf16 %v2771_v28, %v2768_v60  ;;  %v1912_v39 = vadd.f32 1.0, %v5956_v15  ;;  %v2540_v54 = vadd.f32 %v4535_v22, %v2284_v30 }
 0x1f6   : > { %v5966_v40 = vpop.eup %5965  ;;  %v1911_v24 = vadd.f32 1.0, %v5964_v49  ;;  %v4576_v35 = vpack.c.bf16 %v2763_v0, %v2760_v63  ;;  %5379 = vmatprep.mubr.bf16.mxu1 %v2612_v11  ;;  %v2542_v61 = vadd.f32 %v4539_v59, %v2286_v52  ;;  %v2289_v23 = vmul.f32 %v5962_v17, %v7077_v58  ;;  %v7256_v0 = vld [vmem:[%s6245_s24 + $0xf0] sm:$0xff]  }
 0x1f7   : > { %v2287_v26 = vmul.f32 %v5966_v40, %v7084_v48  ;;  %v2775_v9 = vpop.f32.mrf.mxu1  ;;  %4908 = vst [vmem:[%s7160_s11 + $0x28] sm:$0xff] %v4581_v34   ;;  %v4544_v10 = vunpack.c.h.bf16 %v7235_v18  ;;  %v2784_v14 = vadd.f32 %v5285_v27, %v7132_v6  ;;  %v2613_v22 = vpack.c.bf16 %v2541_v12, %v2540_v54 }
 0x1f8   : > { %5985 = vrcp.f32 %v1911_v24  ;;  %4907 = vst [vmem:[%s7160_s11 + $0x20] sm:$0xff] %v4576_v35   ;;  %v5968_v57 = vpop.eup %5967  ;;  %v2288_v46 = vmul.f32 %v7199_v2, %v7057_v21  ;;  %v4543_v7 = vunpack.c.l.bf16 %v7235_v18  ;;  %v2776_v50 = vadd.f32 %v7132_v6, %v2775_v9 }
 0x1f9   : > { %v2543_v48 = vadd.f32 %v4540_v3, %v2287_v26  ;;  %v5286_v31 = vpop.f32.mrf.mxu1  ;;  %5987 = vrcp.f32 %v1913_v43  ;;  %v1916_v20 = vadd.f32 1.0, %v5968_v57  ;;  %v2545_v2 = vadd.f32 %v4544_v10, %v2289_v23 }
 0x1fa   : > { %v5970_v13 = vpop.eup %5969  ;;  %v2787_v32 = vadd.f32 %v5286_v31, %v7132_v6  ;;  %5989 = vrcp.f32 %v1912_v39  ;;  %v2544_v63 = vadd.f32 %v4543_v7, %v2288_v46  ;;  %v4548_v24 = vunpack.c.h.bf16 %v7256_v0 }
 0x1fb   : > { %v5972_v38 = vpop.eup %5971  ;;  %v2778_v58 = vpop.f32.mrf.mxu1  ;;  %v2614_v15 = vpack.c.bf16 %v2543_v48, %v2542_v61  ;;  %5380 = vmatmul.mubr.bf16.gmra.mxu1 %v2613_v22  ;;  %v2290_v30 = vmul.f32 %v5970_v13, %v7102_v36 }
 0x1fc   : > { %v5974_v51 = vpop.eup %5973  ;;  %v1914_v62 = vadd.f32 1.0, %v5972_v38  ;;  %v4591_v8 = vpack.c.bf16 %v2787_v32, %v2784_v14  ;;  %v2779_v42 = vadd.f32 %v7132_v6, %v2778_v58  ;;  %v2615_v36 = vpack.c.bf16 %v2545_v2, %v2544_v63  ;;  %v4903_v14 = vld [vmem:[%s6245_s24 + $0xf8] sm:$0xff]  }
 0x1fd   : > { %v5976_v16 = vpop.eup %5975  ;;  %5383 = vmatprep.mubr.bf16.mxu1 %v2614_v15  ;;  %v2546_v27 = vadd.f32 %v4539_v59, %v2290_v30  ;;  %v2292_v43 = vmul.f32 %v5974_v51, %v7093_v41  ;;  %v4552_v32 = vunpack.c.h.bf16 %v4903_v14  ;;  %v4551_v51 = vunpack.c.l.bf16 %v4903_v14 }
 0x1fe   : > { %v5978_v21 = vpop.eup %5977  ;;  %v1917_v1 = vadd.f32 1.0, %v5976_v16  ;;  %4910 = vst [vmem:[%s7160_s11 + $0x38] sm:$0xff] %v4591_v8   ;;  %v4586_v25 = vpack.c.bf16 %v2779_v42, %v2776_v50  ;;  %5991 = vrcp.f32 %v1914_v62  ;;  %v5289_v17 = vpop.f32.mrf.mxu1 }
 0x1ff   : > { %v5980_v29 = vpop.eup %5979  ;;  %v2293_v49 = vmul.f32 %v5978_v21, %v7109_v5  ;;  %5993 = vrcp.f32 %v1916_v20  ;;  %v2800_v35 = vadd.f32 %v5289_v17, %v7132_v6  ;;  %v2548_v23 = vadd.f32 %v4543_v7, %v2292_v43 }
 0x200   : > { %v5982_v60 = vpop.eup %5981  ;;  %v2291_v28 = vmul.f32 %v5980_v29, %v7119_v56  ;;  %4909 = vst [vmem:[%s7160_s11 + $0x30] sm:$0xff] %v4586_v25   ;;  %v2791_v52 = vpop.f32.mrf.mxu1  ;;  %5995 = vrcp.f32 %v1917_v1  ;;  %v4547_v56 = vunpack.c.l.bf16 %v7256_v0 }
 0x201   : > { %v1915_v12 = vadd.f32 1.0, %v5982_v60  ;;  %v2792_v9 = vadd.f32 %v7132_v6, %v2791_v52 }
 0x202   : > { %v5984_v11 = vpop.eup %5983  ;;  %v2547_v40 = vadd.f32 %v4540_v3, %v2291_v28  ;;  %v5290_v5 = vpop.f32.mrf.mxu1  ;;  %v2549_v3 = vadd.f32 %v4544_v10, %v2293_v49 }
 0x203   : > { %5997 = vrcp.f32 %v1915_v12  ;;  %v2294_v34 = vmul.f32 %v5984_v11, %v7137_v53  ;;  %5384 = vmatmul.mubr.bf16.gmra.mxu1 %v2615_v36  ;;  %v2803_v26 = vadd.f32 %v5290_v5, %v7132_v6 }
 0x204   : > { %v2616_v59 = vpack.c.bf16 %v2547_v40, %v2546_v27  ;;  %v2794_v39 = vpop.f32.mrf.mxu1  ;;  %v2617_v22 = vpack.c.bf16 %v2549_v3, %v2548_v23 }
 0x205   : > { %v5986_v19 = vpop.eup %5985  ;;  %v4601_v54 = vpack.c.bf16 %v2803_v26, %v2800_v35  ;;  %v2795_v18 = vadd.f32 %v7132_v6, %v2794_v39  ;;  %v2550_v48 = vadd.f32 %v4547_v56, %v2294_v34 }
 0x206   : > { %v2295_v41 = vmul.f32 %v5986_v19, %v7163_v33  ;;  %5387 = vmatprep.mubr.bf16.mxu1 %v2616_v59  ;;  %v5988_v53 = vpop.eup %5987 }
 0x207   : > { %v5293_v57 = vpop.f32.mrf.mxu1  ;;  %v5990_v61 = vpop.eup %5989  ;;  %4912 = vst [vmem:[%s7160_s11 + $0x48] sm:$0xff] %v4601_v54   ;;  %v4596_v13 = vpack.c.bf16 %v2795_v18, %v2792_v9  ;;  %v2297_v33 = vmul.f32 %v5988_v53, %v7142_v4 }
 0x208   : > { %v2551_v31 = vadd.f32 %v4548_v24, %v2295_v41  ;;  %v2296_v15 = vmul.f32 %v5990_v61, %v7123_v55  ;;  %v2816_v7 = vadd.f32 %v5293_v57, %v7132_v6 }
 0x209   : > { %v2807_v10 = vpop.f32.mrf.mxu1  ;;  %4911 = vst [vmem:[%s7160_s11 + $0x40] sm:$0xff] %v4596_v13   ;;  %v2553_v42 = vadd.f32 %v4552_v32, %v2297_v33 }
 0x20a   : > { %v2618_v38 = vpack.c.bf16 %v2551_v31, %v2550_v48  ;;  %v2808_v4 = vadd.f32 %v7132_v6, %v2807_v10  ;;  %v2552_v1 = vadd.f32 %v4551_v51, %v2296_v15 }
 0x20b   : > { %v5294_v46 = vpop.f32.mrf.mxu1  ;;  %v5992_v58 = vpop.eup %5991  ;;  %5388 = vmatmul.mubr.bf16.gmra.mxu1 %v2617_v22 }
 0x20c   : > { %v2819_v62 = vadd.f32 %v5294_v46, %v7132_v6  ;;  %5391 = vmatprep.mubr.bf16.mxu1 %v2618_v38  ;;  %v5994_v8 = vpop.eup %5993  ;;  %v2298_v55 = vmul.f32 %v5992_v58, %v7185_v45  ;;  %v2619_v60 = vpack.c.bf16 %v2553_v42, %v2552_v1 }
 0x20d   : > { %v2810_v50 = vpop.f32.mrf.mxu1  ;;  %v5996_v21 = vpop.eup %5995  ;;  %v2300_v12 = vmul.f32 %v5994_v8, %v7175_v44 }
 0x20e   : > { %v4611_v16 = vpack.c.bf16 %v2819_v62, %v2816_v7  ;;  %v2811_v20 = vadd.f32 %v7132_v6, %v2810_v50  ;;  %v2301_v63 = vmul.f32 %v5996_v21, %v7191_v37  ;;  %v2554_v28 = vadd.f32 %v4547_v56, %v2298_v55 }
 0x20f   : > { %v5297_v2 = vpop.f32.mrf.mxu1  ;;  %v2556_v56 = vadd.f32 %v4551_v51, %v2300_v12 }
 0x210   : > { %v5998_v30 = vpop.eup %5997  ;;  %4914 = vst [vmem:[%s7160_s11 + $0x58] sm:$0xff] %v4611_v16   ;;  %v4606_v25 = vpack.c.bf16 %v2811_v20, %v2808_v4  ;;  %v2832_v45 = vadd.f32 %v5297_v2, %v7132_v6 }
 0x211   : > { %v2299_v29 = vmul.f32 %v5998_v30, %v7204_v47  ;;  %v2823_v17 = vpop.f32.mrf.mxu1  ;;  %v2557_v47 = vadd.f32 %v4552_v32, %v2301_v63 }
 0x212   : > { %4913 = vst [vmem:[%s7160_s11 + $0x50] sm:$0xff] %v4606_v25   ;;  %v2824_v27 = vadd.f32 %v7132_v6, %v2823_v17 }
 0x213   : > { %v2555_v0 = vadd.f32 %v4548_v24, %v2299_v29  ;;  %v5298_v49 = vpop.f32.mrf.mxu1  ;;  %5392 = vmatmul.mubr.bf16.gmra.mxu1 %v2619_v60  ;;  %v2621_v5 = vpack.c.bf16 %v2557_v47, %v2556_v56 }
 0x214   : > { %v2835_v52 = vadd.f32 %v5298_v49, %v7132_v6 }
 0x215   : > { %v2826_v11 = vpop.f32.mrf.mxu1  ;;  %v2620_v36 = vpack.c.bf16 %v2555_v0, %v2554_v28 }
 0x216   : > { %v4621_v40 = vpack.c.bf16 %v2835_v52, %v2832_v45  ;;  %v2827_v37 = vadd.f32 %v7132_v6, %v2826_v11 }
 0x217   : > { %5395 = vmatprep.mubr.bf16.mxu1 %v2620_v36  ;;  %v5301_v43 = vpop.f32.mrf.mxu1 }
 0x218   : > { %4916 = vst [vmem:[%s7160_s11 + $0x68] sm:$0xff] %v4621_v40   ;;  %v4616_v44 = vpack.c.bf16 %v2827_v37, %v2824_v27  ;;  %v2848_v35 = vadd.f32 %v5301_v43, %v7132_v6 }
 0x219   : > { %v2839_v24 = vpop.f32.mrf.mxu1 }
 0x21a   : > { %4915 = vst [vmem:[%s7160_s11 + $0x60] sm:$0xff] %v4616_v44   ;;  %v2840_v19 = vadd.f32 %v7132_v6, %v2839_v24 }
 0x21b   : > { %v5302_v34 = vpop.f32.mrf.mxu1  ;;  %5396 = vmatmul.mubr.bf16.gmra.mxu1 %v2621_v5 }
 0x21c   : > { %v2851_v26 = vadd.f32 %v5302_v34, %v7132_v6 }
 0x21d   : > { %v2842_v59 = vpop.f32.mrf.mxu1 }
 0x21e   : > { %v4631_v3 = vpack.c.bf16 %v2851_v26, %v2848_v35  ;;  %v2843_v39 = vadd.f32 %v7132_v6, %v2842_v59 }
 0x21f   : > { %v5305_v41 = vpop.f32.mrf.mxu1 }
 0x220   : > { %4918 = vst [vmem:[%s7160_s11 + $0x78] sm:$0xff] %v4631_v3   ;;  %v4626_v9 = vpack.c.bf16 %v2843_v39, %v2840_v19  ;;  %v2864_v53 = vadd.f32 %v5305_v41, %v7132_v6 }
 0x221   : > { %v2855_v54 = vpop.f32.mrf.mxu1 }
 0x222   : > { %4917 = vst [vmem:[%s7160_s11 + $0x70] sm:$0xff] %v4626_v9   ;;  %v2856_v23 = vadd.f32 %v7132_v6, %v2855_v54 }
 0x223   : > { %v5306_v18 = vpop.f32.mrf.mxu1 }
 0x224   : > { %v2867_v57 = vadd.f32 %v5306_v18, %v7132_v6 }
 0x225   : > { %v2858_v61 = vpop.f32.mrf.mxu1 }
 0x226   : > { %v4641_v48 = vpack.c.bf16 %v2867_v57, %v2864_v53  ;;  %v2859_v31 = vadd.f32 %v7132_v6, %v2858_v61 }
 0x227   : > { %v5309_v13 = vpop.f32.mrf.mxu1 }
 0x228   : > { %4920 = vst [vmem:[%s7160_s11 + $0x88] sm:$0xff] %v4641_v48   ;;  %v4636_v14 = vpack.c.bf16 %v2859_v31, %v2856_v23  ;;  %v2880_v33 = vadd.f32 %v5309_v13, %v7132_v6 }
 0x229   : > { %v2871_v10 = vpop.f32.mrf.mxu1 }
 0x22a   : > { %4919 = vst [vmem:[%s7160_s11 + $0x80] sm:$0xff] %v4636_v14   ;;  %v2872_v46 = vadd.f32 %v7132_v6, %v2871_v10 }
 0x22b   : > { %v5310_v22 = vpop.f32.mrf.mxu1 }
 0x22c   : > { %v2883_v32 = vadd.f32 %v5310_v22, %v7132_v6 }
 0x22d   : > { %v2874_v38 = vpop.f32.mrf.mxu1 }
 0x22e   : > { %v4651_v58 = vpack.c.bf16 %v2883_v32, %v2880_v33  ;;  %v2875_v15 = vadd.f32 %v7132_v6, %v2874_v38 }
 0x22f   : > { %v5313_v51 = vpop.f32.mrf.mxu1 }
 0x230   : > { %4922 = vst [vmem:[%s7160_s11 + $0x98] sm:$0xff] %v4651_v58   ;;  %v4646_v7 = vpack.c.bf16 %v2875_v15, %v2872_v46  ;;  %v2896_v8 = vadd.f32 %v5313_v51, %v7132_v6 }
 0x231   : > { %v2887_v62 = vpop.f32.mrf.mxu1 }
 0x232   : > { %4921 = vst [vmem:[%s7160_s11 + $0x90] sm:$0xff] %v4646_v7   ;;  %v2888_v16 = vadd.f32 %v7132_v6, %v2887_v62 }
 0x233   : > { %v5314_v50 = vpop.f32.mrf.mxu1 }
 0x234   : > { %v2899_v42 = vadd.f32 %v5314_v50, %v7132_v6 }
 0x235   : > { %v2890_v4 = vpop.f32.mrf.mxu1 }
 0x236   : > { %v4661_v20 = vpack.c.bf16 %v2899_v42, %v2896_v8  ;;  %v2891_v21 = vadd.f32 %v7132_v6, %v2890_v4 }
 0x237   : > { %v5317_v55 = vpop.f32.mrf.mxu1 }
 0x238   : > { %4924 = vst [vmem:[%s7160_s11 + $0xa8] sm:$0xff] %v4661_v20   ;;  %v4656_v2 = vpack.c.bf16 %v2891_v21, %v2888_v16  ;;  %v2912_v25 = vadd.f32 %v5317_v55, %v7132_v6 }
 0x239   : > { %v2903_v30 = vpop.f32.mrf.mxu1 }
 0x23a   : > { %4923 = vst [vmem:[%s7160_s11 + $0xa0] sm:$0xff] %v4656_v2   ;;  %v2904_v60 = vadd.f32 %v7132_v6, %v2903_v30 }
 0x23b   : > { %v5318_v1 = vpop.f32.mrf.mxu1 }
 0x23c   : > { %v2915_v29 = vadd.f32 %v5318_v1, %v7132_v6 }
 0x23d   : > { %v2906_v17 = vpop.f32.mrf.mxu1 }
 0x23e   : > { %v4671_v63 = vpack.c.bf16 %v2915_v29, %v2912_v25  ;;  %v2907_v28 = vadd.f32 %v7132_v6, %v2906_v17 }
 0x23f   : > { %v5321_v0 = vpop.f32.mrf.mxu1 }
 0x240   : > { %4926 = vst [vmem:[%s7160_s11 + $0xb8] sm:$0xff] %v4671_v63   ;;  %v4666_v49 = vpack.c.bf16 %v2907_v28, %v2904_v60  ;;  %v2928_v52 = vadd.f32 %v5321_v0, %v7132_v6 }
 0x241   : > { %v2919_v12 = vpop.f32.mrf.mxu1 }
 0x242   : > { %4925 = vst [vmem:[%s7160_s11 + $0xb0] sm:$0xff] %v4666_v49   ;;  %v2920_v47 = vadd.f32 %v7132_v6, %v2919_v12 }
 0x243   : > { %v5322_v45 = vpop.f32.mrf.mxu1 }
 0x244   : > { %v2931_v11 = vadd.f32 %v5322_v45, %v7132_v6 }
 0x245   : > { %v2922_v36 = vpop.f32.mrf.mxu1 }
 0x246   : > { %v4681_v27 = vpack.c.bf16 %v2931_v11, %v2928_v52  ;;  %v2923_v40 = vadd.f32 %v7132_v6, %v2922_v36 }
 0x247   : > { %v5325_v37 = vpop.f32.mrf.mxu1 }
 0x248   : > { %4928 = vst [vmem:[%s7160_s11 + $0xc8] sm:$0xff] %v4681_v27   ;;  %v4676_v43 = vpack.c.bf16 %v2923_v40, %v2920_v47  ;;  %v2944_v24 = vadd.f32 %v5325_v37, %v7132_v6 }
 0x249   : > { %v2935_v56 = vpop.f32.mrf.mxu1 }
 0x24a   : > { %4927 = vst [vmem:[%s7160_s11 + $0xc0] sm:$0xff] %v4676_v43   ;;  %v2936_v35 = vadd.f32 %v7132_v6, %v2935_v56 }
 0x24b   : > { %v5326_v44 = vpop.f32.mrf.mxu1 }
 0x24c   : > { %v2947_v5 = vadd.f32 %v5326_v44, %v7132_v6 }
 0x24d   : > { %v2938_v34 = vpop.f32.mrf.mxu1 }
 0x24e   : > { %v4691_v26 = vpack.c.bf16 %v2947_v5, %v2944_v24  ;;  %v2939_v59 = vadd.f32 %v7132_v6, %v2938_v34 }
 0x24f   : > { %v5329_v19 = vpop.f32.mrf.mxu1 }
 0x250   : > { %4930 = vst [vmem:[%s7160_s11 + $0xd8] sm:$0xff] %v4691_v26   ;;  %v4686_v3 = vpack.c.bf16 %v2939_v59, %v2936_v35  ;;  %v2960_v9 = vadd.f32 %v5329_v19, %v7132_v6 }
 0x251   : > { %v2951_v39 = vpop.f32.mrf.mxu1 }
 0x252   : > { %4929 = vst [vmem:[%s7160_s11 + $0xd0] sm:$0xff] %v4686_v3   ;;  %v2952_v53 = vadd.f32 %v7132_v6, %v2951_v39 }
 0x253   : > { %v5330_v41 = vpop.f32.mrf.mxu1 }
 0x254   : > { %v2963_v54 = vadd.f32 %v5330_v41, %v7132_v6 }
 0x255   : > { %v2954_v18 = vpop.f32.mrf.mxu1 }
 0x256   : > { %v4701_v57 = vpack.c.bf16 %v2963_v54, %v2960_v9  ;;  %v2955_v61 = vadd.f32 %v7132_v6, %v2954_v18 }
 0x257   : > { %v5333_v23 = vpop.f32.mrf.mxu1 }
 0x258   : > { %4932 = vst [vmem:[%s7160_s11 + $0xe8] sm:$0xff] %v4701_v57   ;;  %v4696_v48 = vpack.c.bf16 %v2955_v61, %v2952_v53  ;;  %v2976_v14 = vadd.f32 %v5333_v23, %v7132_v6 }
 0x259   : > { %v2967_v31 = vpop.f32.mrf.mxu1 }
 0x25a   : > { %4931 = vst [vmem:[%s7160_s11 + $0xe0] sm:$0xff] %v4696_v48   ;;  %v2968_v33 = vadd.f32 %v7132_v6, %v2967_v31 }
 0x25b   : > { %v5334_v13 = vpop.f32.mrf.mxu1 }
 0x25c   : > { %v2979_v10 = vadd.f32 %v5334_v13, %v7132_v6 }
 0x25d   : > { %v2970_v22 = vpop.f32.mrf.mxu1 }
 0x25e   : > { %v4711_v32 = vpack.c.bf16 %v2979_v10, %v2976_v14  ;;  %v2971_v38 = vadd.f32 %v7132_v6, %v2970_v22 }
 0x25f   : > { %v5337_v46 = vpop.f32.mrf.mxu1 }
 0x260   : > { %4934 = vst [vmem:[%s7160_s11 + $0xf8] sm:$0xff] %v4711_v32   ;;  %v4706_v58 = vpack.c.bf16 %v2971_v38, %v2968_v33  ;;  %v2992_v7 = vadd.f32 %v5337_v46, %v7132_v6 }
 0x261   : > { %v2983_v15 = vpop.f32.mrf.mxu1 }
 0x262   : > { %4933 = vst [vmem:[%s7160_s11 + $0xf0] sm:$0xff] %v4706_v58   ;;  %v2984_v8 = vadd.f32 %v7132_v6, %v2983_v15 }
 0x263   : > { %v5338_v51 = vpop.f32.mrf.mxu1 }
 0x264   : > { %v2995_v62 = vadd.f32 %v5338_v51, %v7132_v6 }
 0x265   : > { %v2986_v50 = vpop.f32.mrf.mxu1 }
 0x266   : > { %v4721_v42 = vpack.c.bf16 %v2995_v62, %v2992_v7  ;;  %v2987_v4 = vadd.f32 %v7132_v6, %v2986_v50 }
 0x267   : > { %v5341_v16 = vpop.f32.mrf.mxu1 }
 0x268   : > { %4936 = vst [vmem:[%s7160_s11 + $0x108] sm:$0xff] %v4721_v42   ;;  %v4716_v20 = vpack.c.bf16 %v2987_v4, %v2984_v8  ;;  %v3008_v2 = vadd.f32 %v5341_v16, %v7132_v6 }
 0x269   : > { %v2999_v21 = vpop.f32.mrf.mxu1 }
 0x26a   : > { %4935 = vst [vmem:[%s7160_s11 + $0x100] sm:$0xff] %v4716_v20   ;;  %v3000_v25 = vadd.f32 %v7132_v6, %v2999_v21 }
 0x26b   : > { %v5342_v55 = vpop.f32.mrf.mxu1 }
 0x26c   : > { %v3011_v30 = vadd.f32 %v5342_v55, %v7132_v6 }
 0x26d   : > { %v3002_v1 = vpop.f32.mrf.mxu1 }
 0x26e   : > { %v4731_v29 = vpack.c.bf16 %v3011_v30, %v3008_v2  ;;  %v3003_v17 = vadd.f32 %v7132_v6, %v3002_v1 }
 0x26f   : > { %v5345_v60 = vpop.f32.mrf.mxu1 }
 0x270   : > { %4938 = vst [vmem:[%s7160_s11 + $0x118] sm:$0xff] %v4731_v29   ;;  %v4726_v63 = vpack.c.bf16 %v3003_v17, %v3000_v25  ;;  %v3024_v49 = vadd.f32 %v5345_v60, %v7132_v6 }
 0x271   : > { %v3015_v28 = vpop.f32.mrf.mxu1 }
 0x272   : > { %4937 = vst [vmem:[%s7160_s11 + $0x110] sm:$0xff] %v4726_v63   ;;  %v3016_v52 = vadd.f32 %v7132_v6, %v3015_v28 }
 0x273   : > { %v5346_v0 = vpop.f32.mrf.mxu1 }
 0x274   : > { %v3027_v12 = vadd.f32 %v5346_v0, %v7132_v6 }
 0x275   : > { %v3018_v45 = vpop.f32.mrf.mxu1 }
 0x276   : > { %v4741_v11 = vpack.c.bf16 %v3027_v12, %v3024_v49  ;;  %v3019_v36 = vadd.f32 %v7132_v6, %v3018_v45 }
 0x277   : > { %v5349_v47 = vpop.f32.mrf.mxu1 }
 0x278   : > { %4940 = vst [vmem:[%s7160_s11 + $0x128] sm:$0xff] %v4741_v11   ;;  %v4736_v27 = vpack.c.bf16 %v3019_v36, %v3016_v52  ;;  %v3040_v43 = vadd.f32 %v5349_v47, %v7132_v6 }
 0x279   : > { %v3031_v40 = vpop.f32.mrf.mxu1 }
 0x27a   : > { %4939 = vst [vmem:[%s7160_s11 + $0x120] sm:$0xff] %v4736_v27   ;;  %v3032_v24 = vadd.f32 %v7132_v6, %v3031_v40 }
 0x27b   : > { %v5350_v37 = vpop.f32.mrf.mxu1 }
 0x27c   : > { %v3043_v56 = vadd.f32 %v5350_v37, %v7132_v6 }
 0x27d   : > { %v3034_v44 = vpop.f32.mrf.mxu1 }
 0x27e   : > { %v4751_v5 = vpack.c.bf16 %v3043_v56, %v3040_v43  ;;  %v3035_v34 = vadd.f32 %v7132_v6, %v3034_v44 }
 0x27f   : > { %v5353_v35 = vpop.f32.mrf.mxu1 }
 0x280   : > { %4942 = vst [vmem:[%s7160_s11 + $0x138] sm:$0xff] %v4751_v5   ;;  %v4746_v26 = vpack.c.bf16 %v3035_v34, %v3032_v24  ;;  %v3056_v3 = vadd.f32 %v5353_v35, %v7132_v6 }
 0x281   : > { %v3047_v59 = vpop.f32.mrf.mxu1 }
 0x282   : > { %4941 = vst [vmem:[%s7160_s11 + $0x130] sm:$0xff] %v4746_v26   ;;  %v3048_v9 = vadd.f32 %v7132_v6, %v3047_v59  ;;  %v7412_v59 = vld [vmem:[%s7457_s5] ss:$0 sm:$0xff] }
 0x283   : > { %v5354_v19 = vpop.f32.mrf.mxu1 }
 0x284   : > { %v3059_v39 = vadd.f32 %v5354_v19, %v7132_v6 }
 0x285   : > { %v3050_v41 = vpop.f32.mrf.mxu1 }
 0x286   : > { %v4761_v54 = vpack.c.bf16 %v3059_v39, %v3056_v3  ;;  %v3051_v18 = vadd.f32 %v7132_v6, %v3050_v41 }
 0x287   : > { %v5357_v53 = vpop.f32.mrf.mxu1 }
 0x288   : > { %4944 = vst [vmem:[%s7160_s11 + $0x148] sm:$0xff] %v4761_v54   ;;  %v4756_v57 = vpack.c.bf16 %v3051_v18, %v3048_v9  ;;  %v3072_v48 = vadd.f32 %v5357_v53, %v7132_v6 }
 0x289   : > { %v3063_v61 = vpop.f32.mrf.mxu1 }
 0x28a   : > { %4943 = vst [vmem:[%s7160_s11 + $0x140] sm:$0xff] %v4756_v57   ;;  %v3064_v14 = vadd.f32 %v7132_v6, %v3063_v61 }
 0x28b   : > { %v5358_v23 = vpop.f32.mrf.mxu1 }
 0x28c   : > { %v3075_v31 = vadd.f32 %v5358_v23, %v7132_v6 }
 0x28d   : > { %v3066_v13 = vpop.f32.mrf.mxu1 }
 0x28e   : > { %v4771_v10 = vpack.c.bf16 %v3075_v31, %v3072_v48  ;;  %v3067_v22 = vadd.f32 %v7132_v6, %v3066_v13 }
 0x28f   : > { %v5361_v33 = vpop.f32.mrf.mxu1 }
 0x290   : > { %4946 = vst [vmem:[%s7160_s11 + $0x158] sm:$0xff] %v4771_v10   ;;  %v4766_v32 = vpack.c.bf16 %v3067_v22, %v3064_v14  ;;  %v3088_v58 = vadd.f32 %v5361_v33, %v7132_v6 }
 0x291   : > { %v3079_v38 = vpop.f32.mrf.mxu1 }
 0x292   : > { %4945 = vst [vmem:[%s7160_s11 + $0x150] sm:$0xff] %v4766_v32   ;;  %v3080_v7 = vadd.f32 %v7132_v6, %v3079_v38 }
 0x293   : > { %v5362_v46 = vpop.f32.mrf.mxu1 }
 0x294   : > { %v3091_v15 = vadd.f32 %v5362_v46, %v7132_v6 }
 0x295   : > { %v3082_v51 = vpop.f32.mrf.mxu1 }
 0x296   : > { %v4781_v62 = vpack.c.bf16 %v3091_v15, %v3088_v58  ;;  %v3083_v50 = vadd.f32 %v7132_v6, %v3082_v51 }
 0x297   : > { %v5365_v8 = vpop.f32.mrf.mxu1 }
 0x298   : > { %4948 = vst [vmem:[%s7160_s11 + $0x168] sm:$0xff] %v4781_v62   ;;  %v4776_v42 = vpack.c.bf16 %v3083_v50, %v3080_v7  ;;  %v3104_v20 = vadd.f32 %v5365_v8, %v7132_v6 }
 0x299   : > { %v3095_v4 = vpop.f32.mrf.mxu1 }
 0x29a   : > { %4947 = vst [vmem:[%s7160_s11 + $0x160] sm:$0xff] %v4776_v42   ;;  %v3096_v2 = vadd.f32 %v7132_v6, %v3095_v4 }
 0x29b   : > { %v5366_v16 = vpop.f32.mrf.mxu1 }
 0x29c   : > { %v3107_v21 = vadd.f32 %v5366_v16, %v7132_v6 }
 0x29d   : > { %v3098_v55 = vpop.f32.mrf.mxu1 }
 0x29e   : > { %v4791_v30 = vpack.c.bf16 %v3107_v21, %v3104_v20  ;;  %v3099_v1 = vadd.f32 %v7132_v6, %v3098_v55 }
 0x29f   : > { %v5369_v25 = vpop.f32.mrf.mxu1 }
 0x2a0   : > { %4950 = vst [vmem:[%s7160_s11 + $0x178] sm:$0xff] %v4791_v30   ;;  %v4786_v29 = vpack.c.bf16 %v3099_v1, %v3096_v2  ;;  %v3120_v63 = vadd.f32 %v5369_v25, %v7132_v6 }
 0x2a1   : > { %v3111_v17 = vpop.f32.mrf.mxu1 }
 0x2a2   : > { %4949 = vst [vmem:[%s7160_s11 + $0x170] sm:$0xff] %v4786_v29   ;;  %v3112_v49 = vadd.f32 %v7132_v6, %v3111_v17 }
 0x2a3   : > { %v5370_v60 = vpop.f32.mrf.mxu1 }
 0x2a4   : > { %v3123_v28 = vadd.f32 %v5370_v60, %v7132_v6 }
 0x2a5   : > { %v3114_v0 = vpop.f32.mrf.mxu1 }
 0x2a6   : > { %v4801_v12 = vpack.c.bf16 %v3123_v28, %v3120_v63  ;;  %v3115_v45 = vadd.f32 %v7132_v6, %v3114_v0 }
 0x2a8   : > { %4952 = vst [vmem:[%s7160_s11 + $0x188] sm:$0xff] %v4801_v12   ;;  %v4796_v52 = vpack.c.bf16 %v3115_v45, %v3112_v49 }
 0x2aa   : > { %4951 = vst [vmem:[%s7160_s11 + $0x180] sm:$0xff] %v4796_v52   ;;  %v5373_v11 = vpop.f32.mrf.mxu1 }
 0x2ab   : > { %v3136_v27 = vadd.f32 %v5373_v11, %v7132_v6 }
 0x2ac   : > { %v3127_v36 = vpop.f32.mrf.mxu1 }
 0x2ad   : > { %v3128_v43 = vadd.f32 %v7132_v6, %v3127_v36 }
 0x2ae   : > { %v5374_v47 = vpop.f32.mrf.mxu1 }
 0x2af   : > { %v3139_v40 = vadd.f32 %v5374_v47, %v7132_v6 }
 0x2b0   : > { %v3130_v37 = vpop.f32.mrf.mxu1 }
 0x2b1   : > { %v4811_v56 = vpack.c.bf16 %v3139_v40, %v3136_v27  ;;  %v3131_v44 = vadd.f32 %v7132_v6, %v3130_v37 }
 0x2b3   : > { %4954 = vst [vmem:[%s7160_s11 + $0x198] sm:$0xff] %v4811_v56   ;;  %v4806_v24 = vpack.c.bf16 %v3131_v44, %v3128_v43  ;;  %v5377_v5 = vpop.f32.mrf.mxu1 }
 0x2b4   : > { %v3152_v26 = vadd.f32 %v5377_v5, %v7132_v6 }
 0x2b5   : > { %4953 = vst [vmem:[%s7160_s11 + $0x190] sm:$0xff] %v4806_v24   ;;  %v3143_v34 = vpop.f32.mrf.mxu1 }
 0x2b6   : > { %v3144_v39 = vadd.f32 %v7412_v59, %v3143_v34 }
 0x2b7   : > { %v5378_v35 = vpop.f32.mrf.mxu1 }
 0x2b8   : > { %v3155_v19 = vadd.f32 %v7412_v59, %v5378_v35 }
 0x2b9   : > { %v3146_v3 = vpop.f32.mrf.mxu1 }
 0x2ba   : > { %v4821_v41 = vpack.c.bf16 %v3155_v19, %v3152_v26  ;;  %v3147_v9 = vadd.f32 %v7412_v59, %v3146_v3 }
 0x2bb   : > { %v5381_v54 = vpop.f32.mrf.mxu1 }
 0x2bc   : > { %4956 = vst [vmem:[%s7160_s11 + $0x1a8] sm:$0xff] %v4821_v41   ;;  %v4816_v18 = vpack.c.bf16 %v3147_v9, %v3144_v39  ;;  %v3168_v57 = vadd.f32 %v7412_v59, %v5381_v54 }
 0x2bd   : > { %v3159_v53 = vpop.f32.mrf.mxu1 }
 0x2be   : > { %4955 = vst [vmem:[%s7160_s11 + $0x1a0] sm:$0xff] %v4816_v18   ;;  %v3160_v48 = vadd.f32 %v7412_v59, %v3159_v53 }
 0x2bf   : > { %v5382_v6 = vpop.f32.mrf.mxu1 }
 0x2c0   : > { %v3171_v61 = vadd.f32 %v7412_v59, %v5382_v6 }
 0x2c1   : > { %v3162_v23 = vpop.f32.mrf.mxu1 }
 0x2c2   : > { %v4831_v31 = vpack.c.bf16 %v3171_v61, %v3168_v57  ;;  %v3163_v13 = vadd.f32 %v7412_v59, %v3162_v23 }
 0x2c3   : > { %v5385_v14 = vpop.f32.mrf.mxu1 }
 0x2c4   : > { %4958 = vst [vmem:[%s7160_s11 + $0x1b8] sm:$0xff] %v4831_v31   ;;  %v4826_v10 = vpack.c.bf16 %v3163_v13, %v3160_v48  ;;  %v3184_v32 = vadd.f32 %v7412_v59, %v5385_v14 }
 0x2c5   : > { %v3175_v22 = vpop.f32.mrf.mxu1 }
 0x2c6   : > { %4957 = vst [vmem:[%s7160_s11 + $0x1b0] sm:$0xff] %v4826_v10   ;;  %v3176_v58 = vadd.f32 %v7412_v59, %v3175_v22 }
 0x2c7   : > { %v5386_v33 = vpop.f32.mrf.mxu1 }
 0x2c8   : > { %v3187_v38 = vadd.f32 %v7412_v59, %v5386_v33 }
 0x2c9   : > { %v3178_v46 = vpop.f32.mrf.mxu1 }
 0x2ca   : > { %v4841_v15 = vpack.c.bf16 %v3187_v38, %v3184_v32  ;;  %v3179_v51 = vadd.f32 %v7412_v59, %v3178_v46 }
 0x2cb   : > { %v5389_v7 = vpop.f32.mrf.mxu1 }
 0x2cc   : > { %4960 = vst [vmem:[%s7160_s11 + $0x1c8] sm:$0xff] %v4841_v15   ;;  %v4836_v62 = vpack.c.bf16 %v3179_v51, %v3176_v58  ;;  %v3200_v42 = vadd.f32 %v7412_v59, %v5389_v7 }
 0x2cd   : > { %v3191_v50 = vpop.f32.mrf.mxu1 }
 0x2ce   : > { %4959 = vst [vmem:[%s7160_s11 + $0x1c0] sm:$0xff] %v4836_v62   ;;  %v3192_v20 = vadd.f32 %v7412_v59, %v3191_v50 }
 0x2cf   : > { %v5390_v8 = vpop.f32.mrf.mxu1 }
 0x2d0   : > { %v3203_v4 = vadd.f32 %v7412_v59, %v5390_v8 }
 0x2d1   : > { %v3194_v16 = vpop.f32.mrf.mxu1 }
 0x2d2   : > { %v4851_v21 = vpack.c.bf16 %v3203_v4, %v3200_v42  ;;  %v3195_v55 = vadd.f32 %v7412_v59, %v3194_v16 }
 0x2d3   : > { %v5393_v2 = vpop.f32.mrf.mxu1 }
 0x2d4   : > { %4962 = vst [vmem:[%s7160_s11 + $0x1d8] sm:$0xff] %v4851_v21   ;;  %v4846_v30 = vpack.c.bf16 %v3195_v55, %v3192_v20  ;;  %v3216_v29 = vadd.f32 %v7412_v59, %v5393_v2 }
 0x2d5   : > { %v3207_v1 = vpop.f32.mrf.mxu1 }
 0x2d6   : > { %4961 = vst [vmem:[%s7160_s11 + $0x1d0] sm:$0xff] %v4846_v30   ;;  %v3208_v63 = vadd.f32 %v7412_v59, %v3207_v1 }
 0x2d7   : > { %v5394_v25 = vpop.f32.mrf.mxu1 }
 0x2d8   : > { %v3219_v17 = vadd.f32 %v7412_v59, %v5394_v25 }
 0x2d9   : > { %v3210_v60 = vpop.f32.mrf.mxu1 }
 0x2da   : > { %v4861_v28 = vpack.c.bf16 %v3219_v17, %v3216_v29  ;;  %v3211_v0 = vadd.f32 %v7412_v59, %v3210_v60 }
 0x2db   : > { %v5397_v49 = vpop.f32.mrf.mxu1 }
 0x2dc   : > { %4964 = vst [vmem:[%s7160_s11 + $0x1e8] sm:$0xff] %v4861_v28   ;;  %v4856_v12 = vpack.c.bf16 %v3211_v0, %v3208_v63  ;;  %v3232_v11 = vadd.f32 %v7412_v59, %v5397_v49 }
 0x2dd   : > { %v3223_v45 = vpop.f32.mrf.mxu1 }
 0x2de   : > { %4963 = vst [vmem:[%s7160_s11 + $0x1e0] sm:$0xff] %v4856_v12   ;;  %v3224_v27 = vadd.f32 %v7412_v59, %v3223_v45 }
 0x2df   : > { %v5398_v52 = vpop.f32.mrf.mxu1 }
 0x2e0   : > { %v3235_v36 = vadd.f32 %v7412_v59, %v5398_v52 }
 0x2e1   : > { %v3226_v47 = vpop.f32.mrf.mxu1 }
 0x2e2   : > { %v4871_v40 = vpack.c.bf16 %v3235_v36, %v3232_v11  ;;  %v3227_v37 = vadd.f32 %v7412_v59, %v3226_v47 }
 0x2e4   : > { %4966 = vst [vmem:[%s7160_s11 + $0x1f8] sm:$0xff] %v4871_v40   ;;  %v4866_v43 = vpack.c.bf16 %v3227_v37, %v3224_v27 }
 0x2e6   : > { %4965 = vst [vmem:[%s7160_s11 + $0x1f0] sm:$0xff] %v4866_v43  }
 0x2e7 PF: > { %s16_s21 = sadd.s32 1, %s6008_s21  }
 0x2e8   : > { %p13_p5 = scmp.ge.s32.totalorder %s16_s21, 4  }
 0x2ea   :  { %15 = sbr.rel (!%p13_p5) target bundleno = 1 (0x1), region = 77 }

</bundles_post_ra>
